<compile_context>
chip_gen: v5e
topology: v5e:2x2
jax: 0.10.0
libtpu: 0.0.40
codegen_flags: <defaults>
</compile_context>

<pallas_src>
import numpy as np
import jax
import jax.numpy as jnp
from jax.experimental import pallas as pl
from jax.experimental.pallas import tpu as pltpu

jax.config.update("jax_default_matmul_precision", "highest")


# ----------------------------------------------------------------------------
# Fused forward kernel.  All tensors live in VMEM; shapes are tiny (<1 MiB).
#
#   x1f/x2f : (B*N, Din)      flattened node features per modality
#   ew*b    : (B*N, B*N)      block-diagonal (edge_weight per batch element)
#   p*b     : (B*C, B*N)      block-diagonal proj^T per batch element
#   rsel    : (B,  B*C)       block "read" conv weights (row b = rw at batch b)
# ----------------------------------------------------------------------------
def fused_kernel(x1_ref, x2_ref,
                 w11_ref, b11_ref, w12_ref, b12_ref,
                 w21_ref, b21_ref, w22_ref, b22_ref,
                 ew1_ref, ew2_ref, p1_ref, p2_ref,
                 rsel_ref, rb_ref,
                 mw1_ref, mb1_ref, mw2_ref, mb2_ref, mw3_ref, mb3_ref,
                 out_ref, closs_ref, lat_ref):
    f32 = jnp.float32
    H = w11_ref.shape[1]
    B = out_ref.shape[0]

    def adapt_layer(h_in, w_ref, b_ref, ewb, is_last):
        # h = x @ W + b     (batch folded onto the M axis)
        h = jnp.dot(h_in, w_ref[...], preferred_element_type=f32) + b_ref[...]
        # F.normalize(h, p=2, dim=-1, eps=1e-12) == h * rsqrt(max(|h|^2, eps^2))
        sq = jnp.sum(h * h, axis=-1, keepdims=True)
        hn = h * jax.lax.rsqrt(jnp.maximum(sq, 1e-24))
        # cos similarity; cross-batch blocks are killed by the block-diag ewb.
        cos = jax.lax.dot_general(hn, hn, (((1,), (1,)), ((), ())),
                                  preferred_element_type=f32)       # (BN, BN)
        agg = jnp.dot(ewb * cos, h, preferred_element_type=f32)      # (BN, H)
        if not is_last:
            agg = jnp.maximum(agg, 0.0)                              # ReLU
        return agg

    ew1b = ew1_ref[...]
    ew2b = ew2_ref[...]

    # Encoder 1 (fMRI) and encoder 2 (EEG), 2 layers each.
    h1 = adapt_layer(x1_ref[...], w11_ref, b11_ref, ew1b, False)
    h1 = adapt_layer(h1, w12_ref, b12_ref, ew1b, True)
    h2 = adapt_layer(x2_ref[...], w21_ref, b21_ref, ew2b, False)
    h2 = adapt_layer(h2, w22_ref, b22_ref, ew2b, True)

    # Component projections: rows are (b, c) pairs, features along lanes.
    Xc = jnp.dot(p1_ref[...], h1, preferred_element_type=f32)        # (BC, H)
    Yc = jnp.dot(p2_ref[...], h2, preferred_element_type=f32)        # (BC, H)

    # Pearson correlation along H; batch-mean + (-sum) done in-kernel.
    Xd = Xc - jnp.mean(Xc, axis=-1, keepdims=True)
    Yd = Yc - jnp.mean(Yc, axis=-1, keepdims=True)
    num = jnp.sum(Xd * Yd, axis=-1, keepdims=True)                   # (BC, 1)
    sxx = jnp.sum(Xd * Xd, axis=-1, keepdims=True)
    syy = jnp.sum(Yd * Yd, axis=-1, keepdims=True)
    corr = num * jax.lax.rsqrt(sxx * syy)                            # (BC, 1)
    closs_ref[...] = -jnp.sum(corr, axis=0, keepdims=True) * (1.0 / B)

    # "read" Conv2d(1, 1, (C, 1)): per-batch weighted sum over components.
    latX = jnp.dot(rsel_ref[...], Xc, preferred_element_type=f32) + rb_ref[...]
    latY = jnp.dot(rsel_ref[...], Yc, preferred_element_type=f32) + rb_ref[...]
    lat_ref[:, 0:H] = latX                                           # (B, H)
    lat_ref[:, H:2 * H] = latY

    # MLP head on concat([latX, latY]) -- concat avoided by splitting W1 rows.
    m1 = (jnp.dot(latX, mw1_ref[0:H, :], preferred_element_type=f32)
          + jnp.dot(latY, mw1_ref[H:2 * H, :], preferred_element_type=f32)
          + mb1_ref[...])
    m1 = jnp.maximum(m1, 0.0)
    m2 = jnp.maximum(jnp.dot(m1, mw2_ref[...], preferred_element_type=f32)
                     + mb2_ref[...], 0.0)
    out_ref[...] = (jnp.dot(m2, mw3_ref[...], preferred_element_type=f32)
                    + mb3_ref[...])


# ----------------------------------------------------------------------------
# Wrapper: build block-diagonal helpers (tiny XLA ops) and launch ONE kernel.
# ----------------------------------------------------------------------------
def build_edge_weight(tw, N):
    idx = jnp.tril_indices(N, -1)
    ew = jnp.ones((N, N), jnp.float32)
    ew = ew.at[idx[0], idx[1]].set(tw)
    ew = ew.at[idx[1], idx[0]].set(tw)
    return ew


def block_diag(m, B):
    r, c = m.shape
    eye = jnp.eye(B, dtype=m.dtype)
    return jnp.einsum("ab,ij->aibj", eye, m).reshape(B * r, B * c)


@jax.jit
def pallas_forward(params, x):
    B, _, N, Din = x.shape
    (w11, b11), (w12, b12) = params["enc1"]
    (w21, b21), (w22, b22) = params["enc2"]
    H = w11.shape[1]
    C = params["proj1"].shape[1]

    ew1b = block_diag(build_edge_weight(params["tw1"], N), B)   # (BN, BN)
    ew2b = block_diag(build_edge_weight(params["tw2"], N), B)
    p1b = block_diag(params["proj1"].T, B)                      # (BC, BN)
    p2b = block_diag(params["proj2"].T, B)
    eyeB = jnp.eye(B, dtype=jnp.float32)
    rsel = jnp.einsum("ab,c->abc", eyeB, params["read_w"]).reshape(B, B * C)

    x1f = x[:, 0].reshape(B * N, Din)
    x2f = x[:, 1].reshape(B * N, Din)

    def vmem():
        return pl.BlockSpec(memory_space=pltpu.MemorySpace.VMEM)

    out, closs, lat = pl.pallas_call(
        fused_kernel,
        out_shape=(
            jax.ShapeDtypeStruct((B, 1), jnp.float32),        # mlp output
            jax.ShapeDtypeStruct((1, 1), jnp.float32),        # corr_loss
            jax.ShapeDtypeStruct((B, 2 * H), jnp.float32),    # latent
        ),
        in_specs=[vmem() for _ in range(22)],
        out_specs=(vmem(), vmem(), vmem()),
    )(x1f, x2f,
      w11, b11.reshape(1, -1), w12, b12.reshape(1, -1),
      w21, b21.reshape(1, -1), w22, b22.reshape(1, -1),
      ew1b, ew2b, p1b, p2b,
      rsel, params["read_b"].reshape(1, 1),
      params["mlp_w1"], params["mlp_b1"].reshape(1, -1),
      params["mlp_w2"], params["mlp_b2"].reshape(1, -1),
      params["mlp_w3"], params["mlp_b3"].reshape(1, -1))

    return out, closs[0, 0], lat


# ----------------------------------------------------------------------------
# Pure-JAX reference (mirrors the PyTorch forward)
# ----------------------------------------------------------------------------
def ref_forward(params, x):
    B, _, N, _ = x.shape

    def normalize(v):
        n = jnp.sqrt(jnp.sum(v * v, axis=-1, keepdims=True))
        return v / jnp.maximum(n, 1e-12)

    def adapt_conv_ref(h, w, b, ew, is_last):
        h = h @ w + b
        hn = normalize(h)
        cos = jnp.einsum("bij,bkj->bik", hn, hn)
        eww = ew[None, :, :] * cos
        h = jnp.einsum("bpq,bqc->bpc", eww, h)
        if not is_last:
            h = jax.nn.relu(h)
        return h

    ew1 = build_edge_weight(params["tw1"], N)
    ew2 = build_edge_weight(params["tw2"], N)

    x1 = x[:, 0]
    for i, (w, b) in enumerate(params["enc1"]):
        x1 = adapt_conv_ref(x1, w, b, ew1, i == len(params["enc1"]) - 1)
    x2 = x[:, 1]
    for i, (w, b) in enumerate(params["enc2"]):
        x2 = adapt_conv_ref(x2, w, b, ew2, i == len(params["enc2"]) - 1)

    Xc = jnp.einsum("bnh,nc->bch", x1, params["proj1"])   # == X.transpose(2,1)
    Yc = jnp.einsum("bnh,nc->bch", x2, params["proj2"])

    Xd = Xc - Xc.mean(-1, keepdims=True)
    Yd = Yc - Yc.mean(-1, keepdims=True)
    corr = (Xd * Yd).sum(-1) / jnp.sqrt((Xd ** 2).sum(-1) * (Yd ** 2).sum(-1))
    corr = corr.mean(0)
    corr_loss = -corr.sum()

    cat = jnp.concatenate([Xc, Yc], axis=2)               # (B, C, 2H)
    lat = jnp.einsum("c,bcj->bj", params["read_w"], cat) + params["read_b"]
    h = jax.nn.relu(lat @ params["mlp_w1"] + params["mlp_b1"])
    h = jax.nn.relu(h @ params["mlp_w2"] + params["mlp_b2"])
    out = h @ params["mlp_w3"] + params["mlp_b3"]
    return out, corr_loss, lat


# ----------------------------------------------------------------------------
if __name__ == "__main__":
    B, N, IN_DIM, HIDDEN, N_COMP = 2, 16, 16, 32, 8

    key = jax.random.PRNGKey(0)
    ks = jax.random.split(key, 24)

    def lin_init(kw, kb, fan_in, fan_out):
        w = jax.random.normal(kw, (fan_in, fan_out), jnp.float32) / jnp.sqrt(fan_in)
        b = jax.random.normal(kb, (fan_out,), jnp.float32) * 0.01
        return w, b

    params = dict(
        enc1=[lin_init(ks[0], ks[1], IN_DIM, HIDDEN),
              lin_init(ks[2], ks[3], HIDDEN, HIDDEN)],
        enc2=[lin_init(ks[4], ks[5], IN_DIM, HIDDEN),
              lin_init(ks[6], ks[7], HIDDEN, HIDDEN)],
        proj1=jax.random.normal(ks[8], (N, N_COMP), jnp.float32) / jnp.sqrt(N),
        proj2=jax.random.normal(ks[9], (N, N_COMP), jnp.float32) / jnp.sqrt(N),
        tw1=jax.random.normal(ks[10], (N * (N - 1) // 2,), jnp.float32),
        tw2=jax.random.normal(ks[11], (N * (N - 1) // 2,), jnp.float32),
        read_w=jax.random.normal(ks[12], (N_COMP,), jnp.float32) / jnp.sqrt(N_COMP),
        read_b=jax.random.normal(ks[13], (), jnp.float32) * 0.01,
    )
    w1, b1 = lin_init(ks[14], ks[15], 2 * HIDDEN, 128)
    w2, b2 = lin_init(ks[16], ks[17], 128, 32)
    w3, b3 = lin_init(ks[18], ks[19], 32, 1)
    params.update(mlp_w1=w1, mlp_b1=b1, mlp_w2=w2, mlp_b2=b2,
                  mlp_w3=w3, mlp_b3=b3)

    x = jax.random.normal(ks[20], (B, 2, N, IN_DIM), jnp.float32)

    out, corr_loss, latent = pallas_forward(params, x)
    jax.block_until_ready((out, corr_loss, latent))

    r_out, r_corr_loss, r_lat = ref_forward(params, x)
    np.testing.assert_allclose(np.asarray(out), np.asarray(r_out),
                               rtol=1e-2, atol=1e-2)
    np.testing.assert_allclose(np.asarray(corr_loss), np.asarray(r_corr_loss),
                               rtol=1e-2, atol=1e-2)
    np.testing.assert_allclose(np.asarray(latent), np.asarray(r_lat),
                               rtol=1e-2, atol=1e-2)

    print("KERNEL_OK")
</pallas_src>

<mosaic_0001>
module attributes {stable_mosaic.version = 11 : i64} {
  func.func @fused_kernel(%arg0: memref<32x16xf32, #tpu.memory_space<vmem>>, %arg1: memref<32x16xf32, #tpu.memory_space<vmem>>, %arg2: memref<16x32xf32, #tpu.memory_space<vmem>>, %arg3: memref<1x32xf32, #tpu.memory_space<vmem>>, %arg4: memref<32x32xf32, #tpu.memory_space<vmem>>, %arg5: memref<1x32xf32, #tpu.memory_space<vmem>>, %arg6: memref<16x32xf32, #tpu.memory_space<vmem>>, %arg7: memref<1x32xf32, #tpu.memory_space<vmem>>, %arg8: memref<32x32xf32, #tpu.memory_space<vmem>>, %arg9: memref<1x32xf32, #tpu.memory_space<vmem>>, %arg10: memref<32x32xf32, #tpu.memory_space<vmem>>, %arg11: memref<32x32xf32, #tpu.memory_space<vmem>>, %arg12: memref<16x32xf32, #tpu.memory_space<vmem>>, %arg13: memref<16x32xf32, #tpu.memory_space<vmem>>, %arg14: memref<2x16xf32, #tpu.memory_space<vmem>>, %arg15: memref<1x1xf32, #tpu.memory_space<vmem>>, %arg16: memref<64x128xf32, #tpu.memory_space<vmem>>, %arg17: memref<1x128xf32, #tpu.memory_space<vmem>>, %arg18: memref<128x32xf32, #tpu.memory_space<vmem>>, %arg19: memref<1x32xf32, #tpu.memory_space<vmem>>, %arg20: memref<32x1xf32, #tpu.memory_space<vmem>>, %arg21: memref<1x1xf32, #tpu.memory_space<vmem>>, %arg22: memref<2x1xf32, #tpu.memory_space<vmem>>, %arg23: memref<1x1xf32, #tpu.memory_space<vmem>>, %arg24: memref<2x64xf32, #tpu.memory_space<vmem>>) attributes {dimension_semantics = [], scalar_prefetch = 0 : i64, scratch_operands = 0 : i64, tpu.core_type = #tpu.core_type<tc>} {
    %c0 = arith.constant 0 : index
    %c0_0 = arith.constant 0 : index
    %0 = vector.load %arg10[%c0, %c0_0] : memref<32x32xf32, #tpu.memory_space<vmem>>, vector<32x32xf32>
    %c0_1 = arith.constant 0 : index
    %c0_2 = arith.constant 0 : index
    %1 = vector.load %arg11[%c0_1, %c0_2] : memref<32x32xf32, #tpu.memory_space<vmem>>, vector<32x32xf32>
    %c0_3 = arith.constant 0 : index
    %c0_4 = arith.constant 0 : index
    %2 = vector.load %arg0[%c0_3, %c0_4] : memref<32x16xf32, #tpu.memory_space<vmem>>, vector<32x16xf32>
    %c0_5 = arith.constant 0 : index
    %c0_6 = arith.constant 0 : index
    %3 = vector.load %arg2[%c0_5, %c0_6] : memref<16x32xf32, #tpu.memory_space<vmem>>, vector<16x32xf32>
    %cst = arith.constant dense<0.000000e+00> : vector<32x32xf32>
    %4 = tpu.matmul %2, %3, %cst {dimension_numbers = #tpu.dot_dimension_numbers<[1], [0], [0], [1], [0, 0, 1, 1], [], []>, precision = #tpu.contract_precision<fp32>} : vector<32x16xf32>, vector<16x32xf32>, vector<32x32xf32> -> vector<32x32xf32>
    %c0_7 = arith.constant 0 : index
    %c0_8 = arith.constant 0 : index
    %5 = vector.load %arg3[%c0_7, %c0_8] : memref<1x32xf32, #tpu.memory_space<vmem>>, vector<1x32xf32>
    %6 = vector.broadcast %5 : vector<1x32xf32> to vector<32x32xf32>
    %7 = arith.addf %4, %6 : vector<32x32xf32>
    %8 = arith.mulf %7, %7 : vector<32x32xf32>
    %cst_9 = arith.constant dense<0.000000e+00> : vector<32xf32>
    %9 = vector.multi_reduction <add>, %8, %cst_9 [1] : vector<32x32xf32> to vector<32xf32>
    %10 = vector.shape_cast %9 : vector<32xf32> to vector<32x1xf32>
    %cst_10 = arith.constant 1.000000e-24 : f32
    %11 = vector.broadcast %cst_10 : f32 to vector<32x1xf32>
    %12 = arith.maximumf %10, %11 : vector<32x1xf32>
    %13 = math.rsqrt %12 : vector<32x1xf32>
    %14 = vector.broadcast %13 : vector<32x1xf32> to vector<32x32xf32>
    %15 = arith.mulf %7, %14 : vector<32x32xf32>
    %cst_11 = arith.constant dense<0.000000e+00> : vector<32x32xf32>
    %16 = tpu.matmul %15, %15, %cst_11 {dimension_numbers = #tpu.dot_dimension_numbers<[1], [1], [0], [0], [0, 0, 1, 0], [], []>, precision = #tpu.contract_precision<fp32>} : vector<32x32xf32>, vector<32x32xf32>, vector<32x32xf32> -> vector<32x32xf32>
    %17 = arith.mulf %0, %16 : vector<32x32xf32>
    %cst_12 = arith.constant dense<0.000000e+00> : vector<32x32xf32>
    %18 = tpu.matmul %17, %7, %cst_12 {dimension_numbers = #tpu.dot_dimension_numbers<[1], [0], [0], [1], [0, 0, 1, 1], [], []>, precision = #tpu.contract_precision<fp32>} : vector<32x32xf32>, vector<32x32xf32>, vector<32x32xf32> -> vector<32x32xf32>
    %cst_13 = arith.constant 0.000000e+00 : f32
    %19 = vector.broadcast %cst_13 : f32 to vector<32x32xf32>
    %20 = arith.maximumf %18, %19 : vector<32x32xf32>
    %c0_14 = arith.constant 0 : index
    %c0_15 = arith.constant 0 : index
    %21 = vector.load %arg4[%c0_14, %c0_15] : memref<32x32xf32, #tpu.memory_space<vmem>>, vector<32x32xf32>
    %cst_16 = arith.constant dense<0.000000e+00> : vector<32x32xf32>
    %22 = tpu.matmul %20, %21, %cst_16 {dimension_numbers = #tpu.dot_dimension_numbers<[1], [0], [0], [1], [0, 0, 1, 1], [], []>, precision = #tpu.contract_precision<fp32>} : vector<32x32xf32>, vector<32x32xf32>, vector<32x32xf32> -> vector<32x32xf32>
    %c0_17 = arith.constant 0 : index
    %c0_18 = arith.constant 0 : index
    %23 = vector.load %arg5[%c0_17, %c0_18] : memref<1x32xf32, #tpu.memory_space<vmem>>, vector<1x32xf32>
    %24 = vector.broadcast %23 : vector<1x32xf32> to vector<32x32xf32>
    %25 = arith.addf %22, %24 : vector<32x32xf32>
    %26 = arith.mulf %25, %25 : vector<32x32xf32>
    %cst_19 = arith.constant dense<0.000000e+00> : vector<32xf32>
    %27 = vector.multi_reduction <add>, %26, %cst_19 [1] : vector<32x32xf32> to vector<32xf32>
    %28 = vector.shape_cast %27 : vector<32xf32> to vector<32x1xf32>
    %cst_20 = arith.constant 1.000000e-24 : f32
    %29 = vector.broadcast %cst_20 : f32 to vector<32x1xf32>
    %30 = arith.maximumf %28, %29 : vector<32x1xf32>
    %31 = math.rsqrt %30 : vector<32x1xf32>
    %32 = vector.broadcast %31 : vector<32x1xf32> to vector<32x32xf32>
    %33 = arith.mulf %25, %32 : vector<32x32xf32>
    %cst_21 = arith.constant dense<0.000000e+00> : vector<32x32xf32>
    %34 = tpu.matmul %33, %33, %cst_21 {dimension_numbers = #tpu.dot_dimension_numbers<[1], [1], [0], [0], [0, 0, 1, 0], [], []>, precision = #tpu.contract_precision<fp32>} : vector<32x32xf32>, vector<32x32xf32>, vector<32x32xf32> -> vector<32x32xf32>
    %35 = arith.mulf %0, %34 : vector<32x32xf32>
    %cst_22 = arith.constant dense<0.000000e+00> : vector<32x32xf32>
    %36 = tpu.matmul %35, %25, %cst_22 {dimension_numbers = #tpu.dot_dimension_numbers<[1], [0], [0], [1], [0, 0, 1, 1], [], []>, precision = #tpu.contract_precision<fp32>} : vector<32x32xf32>, vector<32x32xf32>, vector<32x32xf32> -> vector<32x32xf32>
    %c0_23 = arith.constant 0 : index
    %c0_24 = arith.constant 0 : index
    %37 = vector.load %arg1[%c0_23, %c0_24] : memref<32x16xf32, #tpu.memory_space<vmem>>, vector<32x16xf32>
    %c0_25 = arith.constant 0 : index
    %c0_26 = arith.constant 0 : index
    %38 = vector.load %arg6[%c0_25, %c0_26] : memref<16x32xf32, #tpu.memory_space<vmem>>, vector<16x32xf32>
    %cst_27 = arith.constant dense<0.000000e+00> : vector<32x32xf32>
    %39 = tpu.matmul %37, %38, %cst_27 {dimension_numbers = #tpu.dot_dimension_numbers<[1], [0], [0], [1], [0, 0, 1, 1], [], []>, precision = #tpu.contract_precision<fp32>} : vector<32x16xf32>, vector<16x32xf32>, vector<32x32xf32> -> vector<32x32xf32>
    %c0_28 = arith.constant 0 : index
    %c0_29 = arith.constant 0 : index
    %40 = vector.load %arg7[%c0_28, %c0_29] : memref<1x32xf32, #tpu.memory_space<vmem>>, vector<1x32xf32>
    %41 = vector.broadcast %40 : vector<1x32xf32> to vector<32x32xf32>
    %42 = arith.addf %39, %41 : vector<32x32xf32>
    %43 = arith.mulf %42, %42 : vector<32x32xf32>
    %cst_30 = arith.constant dense<0.000000e+00> : vector<32xf32>
    %44 = vector.multi_reduction <add>, %43, %cst_30 [1] : vector<32x32xf32> to vector<32xf32>
    %45 = vector.shape_cast %44 : vector<32xf32> to vector<32x1xf32>
    %cst_31 = arith.constant 1.000000e-24 : f32
    %46 = vector.broadcast %cst_31 : f32 to vector<32x1xf32>
    %47 = arith.maximumf %45, %46 : vector<32x1xf32>
    %48 = math.rsqrt %47 : vector<32x1xf32>
    %49 = vector.broadcast %48 : vector<32x1xf32> to vector<32x32xf32>
    %50 = arith.mulf %42, %49 : vector<32x32xf32>
    %cst_32 = arith.constant dense<0.000000e+00> : vector<32x32xf32>
    %51 = tpu.matmul %50, %50, %cst_32 {dimension_numbers = #tpu.dot_dimension_numbers<[1], [1], [0], [0], [0, 0, 1, 0], [], []>, precision = #tpu.contract_precision<fp32>} : vector<32x32xf32>, vector<32x32xf32>, vector<32x32xf32> -> vector<32x32xf32>
    %52 = arith.mulf %1, %51 : vector<32x32xf32>
    %cst_33 = arith.constant dense<0.000000e+00> : vector<32x32xf32>
    %53 = tpu.matmul %52, %42, %cst_33 {dimension_numbers = #tpu.dot_dimension_numbers<[1], [0], [0], [1], [0, 0, 1, 1], [], []>, precision = #tpu.contract_precision<fp32>} : vector<32x32xf32>, vector<32x32xf32>, vector<32x32xf32> -> vector<32x32xf32>
    %cst_34 = arith.constant 0.000000e+00 : f32
    %54 = vector.broadcast %cst_34 : f32 to vector<32x32xf32>
    %55 = arith.maximumf %53, %54 : vector<32x32xf32>
    %c0_35 = arith.constant 0 : index
    %c0_36 = arith.constant 0 : index
    %56 = vector.load %arg8[%c0_35, %c0_36] : memref<32x32xf32, #tpu.memory_space<vmem>>, vector<32x32xf32>
    %cst_37 = arith.constant dense<0.000000e+00> : vector<32x32xf32>
    %57 = tpu.matmul %55, %56, %cst_37 {dimension_numbers = #tpu.dot_dimension_numbers<[1], [0], [0], [1], [0, 0, 1, 1], [], []>, precision = #tpu.contract_precision<fp32>} : vector<32x32xf32>, vector<32x32xf32>, vector<32x32xf32> -> vector<32x32xf32>
    %c0_38 = arith.constant 0 : index
    %c0_39 = arith.constant 0 : index
    %58 = vector.load %arg9[%c0_38, %c0_39] : memref<1x32xf32, #tpu.memory_space<vmem>>, vector<1x32xf32>
    %59 = vector.broadcast %58 : vector<1x32xf32> to vector<32x32xf32>
    %60 = arith.addf %57, %59 : vector<32x32xf32>
    %61 = arith.mulf %60, %60 : vector<32x32xf32>
    %cst_40 = arith.constant dense<0.000000e+00> : vector<32xf32>
    %62 = vector.multi_reduction <add>, %61, %cst_40 [1] : vector<32x32xf32> to vector<32xf32>
    %63 = vector.shape_cast %62 : vector<32xf32> to vector<32x1xf32>
    %cst_41 = arith.constant 1.000000e-24 : f32
    %64 = vector.broadcast %cst_41 : f32 to vector<32x1xf32>
    %65 = arith.maximumf %63, %64 : vector<32x1xf32>
    %66 = math.rsqrt %65 : vector<32x1xf32>
    %67 = vector.broadcast %66 : vector<32x1xf32> to vector<32x32xf32>
    %68 = arith.mulf %60, %67 : vector<32x32xf32>
    %cst_42 = arith.constant dense<0.000000e+00> : vector<32x32xf32>
    %69 = tpu.matmul %68, %68, %cst_42 {dimension_numbers = #tpu.dot_dimension_numbers<[1], [1], [0], [0], [0, 0, 1, 0], [], []>, precision = #tpu.contract_precision<fp32>} : vector<32x32xf32>, vector<32x32xf32>, vector<32x32xf32> -> vector<32x32xf32>
    %70 = arith.mulf %1, %69 : vector<32x32xf32>
    %cst_43 = arith.constant dense<0.000000e+00> : vector<32x32xf32>
    %71 = tpu.matmul %70, %60, %cst_43 {dimension_numbers = #tpu.dot_dimension_numbers<[1], [0], [0], [1], [0, 0, 1, 1], [], []>, precision = #tpu.contract_precision<fp32>} : vector<32x32xf32>, vector<32x32xf32>, vector<32x32xf32> -> vector<32x32xf32>
    %c0_44 = arith.constant 0 : index
    %c0_45 = arith.constant 0 : index
    %72 = vector.load %arg12[%c0_44, %c0_45] : memref<16x32xf32, #tpu.memory_space<vmem>>, vector<16x32xf32>
    %cst_46 = arith.constant dense<0.000000e+00> : vector<16x32xf32>
    %73 = tpu.matmul %72, %36, %cst_46 {dimension_numbers = #tpu.dot_dimension_numbers<[1], [0], [0], [1], [0, 0, 1, 1], [], []>, precision = #tpu.contract_precision<fp32>} : vector<16x32xf32>, vector<32x32xf32>, vector<16x32xf32> -> vector<16x32xf32>
    %c0_47 = arith.constant 0 : index
    %c0_48 = arith.constant 0 : index
    %74 = vector.load %arg13[%c0_47, %c0_48] : memref<16x32xf32, #tpu.memory_space<vmem>>, vector<16x32xf32>
    %cst_49 = arith.constant dense<0.000000e+00> : vector<16x32xf32>
    %75 = tpu.matmul %74, %71, %cst_49 {dimension_numbers = #tpu.dot_dimension_numbers<[1], [0], [0], [1], [0, 0, 1, 1], [], []>, precision = #tpu.contract_precision<fp32>} : vector<16x32xf32>, vector<32x32xf32>, vector<16x32xf32> -> vector<16x32xf32>
    %cst_50 = arith.constant dense<0.000000e+00> : vector<16xf32>
    %76 = vector.multi_reduction <add>, %73, %cst_50 [1] : vector<16x32xf32> to vector<16xf32>
    %77 = vector.shape_cast %76 : vector<16xf32> to vector<16x1xf32>
    %cst_51 = arith.constant 3.200000e+01 : f32
    %78 = vector.broadcast %cst_51 : f32 to vector<16x1xf32>
    %79 = arith.divf %77, %78 : vector<16x1xf32>
    %80 = vector.broadcast %79 : vector<16x1xf32> to vector<16x32xf32>
    %81 = arith.subf %73, %80 : vector<16x32xf32>
    %cst_52 = arith.constant dense<0.000000e+00> : vector<16xf32>
    %82 = vector.multi_reduction <add>, %75, %cst_52 [1] : vector<16x32xf32> to vector<16xf32>
    %83 = vector.shape_cast %82 : vector<16xf32> to vector<16x1xf32>
    %cst_53 = arith.constant 3.200000e+01 : f32
    %84 = vector.broadcast %cst_53 : f32 to vector<16x1xf32>
    %85 = arith.divf %83, %84 : vector<16x1xf32>
    %86 = vector.broadcast %85 : vector<16x1xf32> to vector<16x32xf32>
    %87 = arith.subf %75, %86 : vector<16x32xf32>
    %88 = arith.mulf %81, %87 : vector<16x32xf32>
    %cst_54 = arith.constant dense<0.000000e+00> : vector<16xf32>
    %89 = vector.multi_reduction <add>, %88, %cst_54 [1] : vector<16x32xf32> to vector<16xf32>
    %90 = vector.shape_cast %89 : vector<16xf32> to vector<16x1xf32>
    %91 = arith.mulf %81, %81 : vector<16x32xf32>
    %cst_55 = arith.constant dense<0.000000e+00> : vector<16xf32>
    %92 = vector.multi_reduction <add>, %91, %cst_55 [1] : vector<16x32xf32> to vector<16xf32>
    %93 = vector.shape_cast %92 : vector<16xf32> to vector<16x1xf32>
    %94 = arith.mulf %87, %87 : vector<16x32xf32>
    %cst_56 = arith.constant dense<0.000000e+00> : vector<16xf32>
    %95 = vector.multi_reduction <add>, %94, %cst_56 [1] : vector<16x32xf32> to vector<16xf32>
    %96 = vector.shape_cast %95 : vector<16xf32> to vector<16x1xf32>
    %97 = arith.mulf %93, %96 : vector<16x1xf32>
    %98 = math.rsqrt %97 : vector<16x1xf32>
    %99 = arith.mulf %90, %98 : vector<16x1xf32>
    %cst_57 = arith.constant dense<0.000000e+00> : vector<1xf32>
    %100 = vector.multi_reduction <add>, %99, %cst_57 [0] : vector<16x1xf32> to vector<1xf32>
    %101 = vector.shape_cast %100 : vector<1xf32> to vector<1x1xf32>
    %cst_58 = arith.constant 0.000000e+00 : f32
    %102 = vector.broadcast %cst_58 : f32 to vector<1x1xf32>
    %103 = arith.subf %102, %101 : vector<1x1xf32>
    %cst_59 = arith.constant 5.000000e-01 : f32
    %104 = vector.broadcast %cst_59 : f32 to vector<1x1xf32>
    %105 = arith.mulf %103, %104 : vector<1x1xf32>
    %c0_60 = arith.constant 0 : index
    %c0_61 = arith.constant 0 : index
    %106 = vector.load %arg23[%c0_60, %c0_61] : memref<1x1xf32, #tpu.memory_space<vmem>>, vector<1x1xf32>
    tpu.vector_store %arg23[%c0_60, %c0_61], %105 {strides = array<i32>} : memref<1x1xf32, #tpu.memory_space<vmem>>, vector<1x1xf32>,
    %c0_62 = arith.constant 0 : index
    %c0_63 = arith.constant 0 : index
    %107 = vector.load %arg14[%c0_62, %c0_63] : memref<2x16xf32, #tpu.memory_space<vmem>>, vector<2x16xf32>
    %cst_64 = arith.constant dense<0.000000e+00> : vector<2x32xf32>
    %108 = tpu.matmul %107, %73, %cst_64 {dimension_numbers = #tpu.dot_dimension_numbers<[1], [0], [0], [1], [0, 0, 1, 1], [], []>, precision = #tpu.contract_precision<fp32>} : vector<2x16xf32>, vector<16x32xf32>, vector<2x32xf32> -> vector<2x32xf32>
    %c0_65 = arith.constant 0 : index
    %c0_66 = arith.constant 0 : index
    %109 = vector.load %arg15[%c0_65, %c0_66] : memref<1x1xf32, #tpu.memory_space<vmem>>, vector<1x1xf32>
    %110 = vector.broadcast %109 : vector<1x1xf32> to vector<2x32xf32>
    %111 = arith.addf %108, %110 : vector<2x32xf32>
    %c0_67 = arith.constant 0 : index
    %c0_68 = arith.constant 0 : index
    %112 = vector.load %arg14[%c0_67, %c0_68] : memref<2x16xf32, #tpu.memory_space<vmem>>, vector<2x16xf32>
    %cst_69 = arith.constant dense<0.000000e+00> : vector<2x32xf32>
    %113 = tpu.matmul %112, %75, %cst_69 {dimension_numbers = #tpu.dot_dimension_numbers<[1], [0], [0], [1], [0, 0, 1, 1], [], []>, precision = #tpu.contract_precision<fp32>} : vector<2x16xf32>, vector<16x32xf32>, vector<2x32xf32> -> vector<2x32xf32>
    %c0_70 = arith.constant 0 : index
    %c0_71 = arith.constant 0 : index
    %114 = vector.load %arg15[%c0_70, %c0_71] : memref<1x1xf32, #tpu.memory_space<vmem>>, vector<1x1xf32>
    %115 = vector.broadcast %114 : vector<1x1xf32> to vector<2x32xf32>
    %116 = arith.addf %113, %115 : vector<2x32xf32>
    %c0_72 = arith.constant 0 : index
    %c0_73 = arith.constant 0 : index
    %117 = vector.load %arg24[%c0_72, %c0_73] : memref<2x64xf32, #tpu.memory_space<vmem>>, vector<2x32xf32>
    tpu.vector_store %arg24[%c0_72, %c0_73], %111 {strides = array<i32>} : memref<2x64xf32, #tpu.memory_space<vmem>>, vector<2x32xf32>,
    %c0_74 = arith.constant 0 : index
    %c32 = arith.constant 32 : index
    %118 = vector.load %arg24[%c0_74, %c32] : memref<2x64xf32, #tpu.memory_space<vmem>>, vector<2x32xf32>
    tpu.vector_store %arg24[%c0_74, %c32], %116 {strides = array<i32>} : memref<2x64xf32, #tpu.memory_space<vmem>>, vector<2x32xf32>,
    %c0_75 = arith.constant 0 : index
    %c0_76 = arith.constant 0 : index
    %119 = vector.load %arg16[%c0_75, %c0_76] : memref<64x128xf32, #tpu.memory_space<vmem>>, vector<32x128xf32>
    %cst_77 = arith.constant dense<0.000000e+00> : vector<2x128xf32>
    %120 = tpu.matmul %111, %119, %cst_77 {dimension_numbers = #tpu.dot_dimension_numbers<[1], [0], [0], [1], [0, 0, 1, 1], [], []>, precision = #tpu.contract_precision<fp32>} : vector<2x32xf32>, vector<32x128xf32>, vector<2x128xf32> -> vector<2x128xf32>
    %c32_78 = arith.constant 32 : index
    %c0_79 = arith.constant 0 : index
    %121 = vector.load %arg16[%c32_78, %c0_79] : memref<64x128xf32, #tpu.memory_space<vmem>>, vector<32x128xf32>
    %cst_80 = arith.constant dense<0.000000e+00> : vector<2x128xf32>
    %122 = tpu.matmul %116, %121, %cst_80 {dimension_numbers = #tpu.dot_dimension_numbers<[1], [0], [0], [1], [0, 0, 1, 1], [], []>, precision = #tpu.contract_precision<fp32>} : vector<2x32xf32>, vector<32x128xf32>, vector<2x128xf32> -> vector<2x128xf32>
    %123 = arith.addf %120, %122 : vector<2x128xf32>
    %c0_81 = arith.constant 0 : index
    %c0_82 = arith.constant 0 : index
    %124 = vector.load %arg17[%c0_81, %c0_82] : memref<1x128xf32, #tpu.memory_space<vmem>>, vector<1x128xf32>
    %125 = vector.broadcast %124 : vector<1x128xf32> to vector<2x128xf32>
    %126 = arith.addf %123, %125 : vector<2x128xf32>
    %cst_83 = arith.constant 0.000000e+00 : f32
    %127 = vector.broadcast %cst_83 : f32 to vector<2x128xf32>
    %128 = arith.maximumf %126, %127 : vector<2x128xf32>
    %c0_84 = arith.constant 0 : index
    %c0_85 = arith.constant 0 : index
    %129 = vector.load %arg18[%c0_84, %c0_85] : memref<128x32xf32, #tpu.memory_space<vmem>>, vector<128x32xf32>
    %cst_86 = arith.constant dense<0.000000e+00> : vector<2x32xf32>
    %130 = tpu.matmul %128, %129, %cst_86 {dimension_numbers = #tpu.dot_dimension_numbers<[1], [0], [0], [1], [0, 0, 1, 1], [], []>, precision = #tpu.contract_precision<fp32>} : vector<2x128xf32>, vector<128x32xf32>, vector<2x32xf32> -> vector<2x32xf32>
    %c0_87 = arith.constant 0 : index
    %c0_88 = arith.constant 0 : index
    %131 = vector.load %arg19[%c0_87, %c0_88] : memref<1x32xf32, #tpu.memory_space<vmem>>, vector<1x32xf32>
    %132 = vector.broadcast %131 : vector<1x32xf32> to vector<2x32xf32>
    %133 = arith.addf %130, %132 : vector<2x32xf32>
    %cst_89 = arith.constant 0.000000e+00 : f32
    %134 = vector.broadcast %cst_89 : f32 to vector<2x32xf32>
    %135 = arith.maximumf %133, %134 : vector<2x32xf32>
    %c0_90 = arith.constant 0 : index
    %c0_91 = arith.constant 0 : index
    %136 = vector.load %arg20[%c0_90, %c0_91] : memref<32x1xf32, #tpu.memory_space<vmem>>, vector<32x1xf32>
    %cst_92 = arith.constant dense<0.000000e+00> : vector<2x1xf32>
    %137 = tpu.matmul %135, %136, %cst_92 {dimension_numbers = #tpu.dot_dimension_numbers<[1], [0], [0], [1], [0, 0, 1, 1], [], []>, precision = #tpu.contract_precision<fp32>} : vector<2x32xf32>, vector<32x1xf32>, vector<2x1xf32> -> vector<2x1xf32>
    %c0_93 = arith.constant 0 : index
    %c0_94 = arith.constant 0 : index
    %138 = vector.load %arg21[%c0_93, %c0_94] : memref<1x1xf32, #tpu.memory_space<vmem>>, vector<1x1xf32>
    %139 = vector.broadcast %138 : vector<1x1xf32> to vector<2x1xf32>
    %140 = arith.addf %137, %139 : vector<2x1xf32>
    %c0_95 = arith.constant 0 : index
    %c0_96 = arith.constant 0 : index
    %141 = vector.load %arg22[%c0_95, %c0_96] : memref<2x1xf32, #tpu.memory_space<vmem>>, vector<2x1xf32>
    tpu.vector_store %arg22[%c0_95, %c0_96], %140 {strides = array<i32>} : memref<2x1xf32, #tpu.memory_space<vmem>>, vector<2x1xf32>,
    return
  }
}

</mosaic_0001>

<bundles_post_ra>
// kernel: pallas_forward.1
= control target key start
LH: loop header
LB: loop body
LE: loop exit
PB: predicated region body
PF: predicated region fallthrough
CT: control target
= control target key end

     0   :  { %s7420_s0 = inlined_call_operand.vmem [shape: f32[32,16], index: 0, kind: input, shape index: {}]   ;;  %s7421_s1 = inlined_call_operand.vmem [shape: f32[32,16], index: 1, kind: input, shape index: {}]   ;;  %s7422_s2 = inlined_call_operand.vmem [shape: f32[16,32], index: 2, kind: input, shape index: {}]   ;;  %s7423_s3 = inlined_call_operand.vmem [shape: f32[1,32], index: 3, kind: input, shape index: {}]   ;;  %s7424_s4 = inlined_call_operand.vmem [shape: f32[32,32], index: 4, kind: input, shape index: {}]   ;;  %s7425_s5 = inlined_call_operand.vmem [shape: f32[1,32], index: 5, kind: input, shape index: {}]   ;;  %s7426_s6 = inlined_call_operand.vmem [shape: f32[16,32], index: 6, kind: input, shape index: {}]   ;;  %s7427_s7 = inlined_call_operand.vmem [shape: f32[1,32], index: 7, kind: input, shape index: {}]   ;;  %s7428_s8 = inlined_call_operand.vmem [shape: f32[32,32], index: 8, kind: input, shape index: {}]   ;;  %s7429_s9 = inlined_call_operand.vmem [shape: f32[1,32], index: 9, kind: input, shape index: {}]   ;;  %s7430_s10 = inlined_call_operand.vmem [shape: f32[32,32], index: 10, kind: input, shape index: {}]   ;;  %s7431_s11 = inlined_call_operand.vmem [shape: f32[32,32], index: 11, kind: input, shape index: {}]   ;;  %s7432_s12 = inlined_call_operand.vmem [shape: f32[16,32], index: 12, kind: input, shape index: {}]   ;;  %s7433_s13 = inlined_call_operand.vmem [shape: f32[16,32], index: 13, kind: input, shape index: {}]   ;;  %s7434_s14 = inlined_call_operand.vmem [shape: f32[2,16], index: 14, kind: input, shape index: {}]   ;;  %s7435_s15 = inlined_call_operand.<no memory space> [shape: f32[1,1], index: 15, kind: input, shape index: {}]   ;;  %s7436_s16 = inlined_call_operand.vmem [shape: f32[64,128], index: 16, kind: input, shape index: {}]   ;;  %s7437_s17 = inlined_call_operand.vmem [shape: f32[1,128], index: 17, kind: input, shape index: {}]   ;;  %s7438_s18 = inlined_call_operand.vmem [shape: f32[128,32], index: 18, kind: input, shape index: {}]   ;;  %s7439_s19 = inlined_call_operand.vmem [shape: f32[1,32], index: 19, kind: input, shape index: {}]   ;;  %s7440_s20 = inlined_call_operand.vmem [shape: f32[32,1], index: 20, kind: input, shape index: {}]   ;;  %s7441_s22 = inlined_call_operand.vmem [shape: f32[2,1], index: 22, kind: output, shape index: {0}]   ;;  %s7442_s23 = inlined_call_operand.hbm [shape: f32[1,1], index: 23, kind: output, shape index: {1}]   ;;  %s7443_s24 = inlined_call_operand.hbm [shape: f32[2,64], index: 24, kind: output, shape index: {2}]   ;;  %s7444_s21 = inlined_call_operand.<no memory space> [shape: f32[1,1], index: 21, kind: input, shape index: {}]  }
   0x1   :  { %7451 = sst [smem:[#allocation10_spill]] %s7420_s0  ;;  %v30_v0 = vstv %s7435_s15  ;;  %v32_v1 = vstv %s7444_s21 }
   0x2   :  { %7452 = sst [smem:[#allocation11_spill]] %s7421_s1  ;;  %31 = vst [vmem:[#allocation2] sm:$0x1] %v30_v0 }
   0x3   :  { %7453 = sst [smem:[#allocation12_spill]] %s7422_s2  ;;  %33 = vst [vmem:[#allocation3] sm:$0x1] %v32_v1 }
   0x4   :  { %7454 = sst [smem:[#allocation13_spill]] %s7423_s3 }
   0x5   :  { %7455 = sst [smem:[#allocation14_spill]] %s7424_s4 }
   0x6   :  { %7456 = sst [smem:[#allocation15_spill]] %s7425_s5 }
   0x7   :  { %7457 = sst [smem:[#allocation16_spill]] %s7426_s6 }
   0x8   :  { %7458 = sst [smem:[#allocation17_spill]] %s7427_s7 }
   0x9   :  { %7459 = sst [smem:[#allocation18_spill]] %s7428_s8 }
   0xa   :  { %34 = vsyncpa [#allocation5], 0  ;;  %s7460_s29 = sld [smem:[#allocation12_spill]]  ;;  %vm98_vm0 = vcmask 130048  }
   0xb   :  { %s7461_s25 = sld [smem:[#allocation10_spill]] }
  0x10   :  { %v93_v2 = vld [vmem:[%s7460_s29 + $0x8] sm:$0xff]  ;;  %v92_v3 = vld [vmem:[%s7460_s29] sm:$0xff] }
  0x11   :  { %v88_v4 = vld [vmem:[%s7461_s25] sm:$0xff]  ;;  %v125_v5 = vand.u32 4294901760, %v93_v2  ;;  %v127_v6 = vand.u32 4294901760, %v92_v3  ;;  %v89_v8 = vld [vmem:[%s7461_s25 + $0x8] sm:$0xff]  ;;  %v90_v9 = vld [vmem:[%s7461_s25 + $0x10] sm:$0xff] }
  0x12   :  { %v100_v7 = vsel %vm98_vm0, %v88_v4, 0  ;;  %v103_v11 = vsel %vm98_vm0, %v89_v8, 0  ;;  %v106_v16 = vsel %vm98_vm0, %v90_v9, 0 }
  0x13   :  { %v129_v10 = vand.u32 4294901760, %v100_v7  ;;  %v177_v12 = vsub.f32 %v93_v2, %v125_v5  ;;  %126 = vmatpush.msra.mxu0 %v125_v5  ;;  %v183_v13 = vsub.f32 %v92_v3, %v127_v6  ;;  %261 = vmatpush.msra.mxu3 %v125_v5  ;;  %v137_v14 = vand.u32 4294901760, %v103_v11 }
  0x15   :  { %v130_v15 = vsub.f32 %v100_v7, %v129_v10  ;;  %221 = vmatpush.msra.mxu2 %v177_v12  ;;  %128 = vmatpush.msra.mxu0 %v127_v6  ;;  %v178_v17 = vand.u32 4294901760, %v177_v12  ;;  %v184_v18 = vand.u32 4294901760, %v183_v13  ;;  %v138_v19 = vsub.f32 %v103_v11, %v137_v14 }
  0x16   :  { %263 = vmatpush.msra.mxu3 %v127_v6 }
  0x17   :  { %v131_v20 = vand.u32 4294901760, %v130_v15 }
  0x18   :  { %35 = vsyncpa [#allocation7], 0  ;;  %224 = vmatpush.msra.mxu2 %v183_v13  ;;  %v179_v21 = vsub.f32 %v177_v12, %v178_v17  ;;  %v185_v22 = vsub.f32 %v183_v13, %v184_v18  ;;  %306 = vmatpush.msrb.mxu0 %v178_v17  ;;  %v139_v24 = vand.u32 4294901760, %v138_v19  ;;  %v145_v25 = vand.u32 4294901760, %v106_v16  ;;  %v91_v29 = vld [vmem:[%s7461_s25 + $0x18] sm:$0xff]  ;;  %s7462_s28 = sld [smem:[#allocation13_spill]] }
  0x19   :  { %227 = vmatmul.f32.vlgmr.msra.gmra.mxu2 %v130_v15  ;;  %v132_v23 = vsub.f32 %v130_v15, %v131_v20  ;;  %267 = vmatmul.f32.vlgmr.msra.gmra.mxu3 %v131_v20  ;;  %v109_v32 = vsel %vm98_vm0, %v91_v29, 0  ;;  %vm367_vm1 = vcmask 261120   ;;  %s7463_s21 = sld [smem:[#allocation14_spill]]  ;;  %s5663_s25 = sshll.u32 %s7442_s23, 4  ;;  %s5664_s25 = int_to_ptr.hbm [resolvable:$true] %s5663_s25 }
  0x1a   :  { %v180_v26 = vand.u32 4294901760, %v179_v21  ;;  %v186_v27 = vand.u32 4294901760, %v185_v22  ;;  %310 = vmatpush.msrb.mxu0 %v184_v18  ;;  %v140_v30 = vsub.f32 %v138_v19, %v139_v24  ;;  %v146_v31 = vsub.f32 %v106_v16, %v145_v25  ;;  %s7464_s2 = sld [smem:[#allocation15_spill]] }
  0x1b   :  { %v133_v28 = vand.u32 4294901760, %v132_v23  ;;  %v153_v35 = vand.u32 4294901760, %v109_v32  ;;  %s7465_s7 = sld [smem:[#allocation16_spill]] }
  0x1c   :  { %181 = vmatpush.msra.mxu1 %v180_v26  ;;  %v141_v33 = vand.u32 4294901760, %v140_v30  ;;  %v147_v34 = vand.u32 4294901760, %v146_v31  ;;  %s7466_s15 = sld [smem:[#allocation11_spill]] }
  0x1d   :  { %134 = vmatmul.f32.vlgmr.msra.gmra.mxu0 %v133_v28  ;;  %v154_v37 = vsub.f32 %v109_v32, %v153_v35  ;;  %s7467_s6 = sld [smem:[#allocation17_spill]] }
  0x1e   :  { %187 = vmatpush.msra.mxu1 %v186_v27  ;;  %v148_v36 = vsub.f32 %v146_v31, %v147_v34  ;;  %v5697_v51 = vld [vmem:[%s7462_s28] ss:$0 sm:$0xff]  ;;  %s7468_s8 = sld [smem:[#allocation18_spill]] }
  0x1f   :  { %189 = vmatmul.f32.vlgmr.msra.gmra.mxu1 %v129_v10  ;;  %v155_v39 = vand.u32 4294901760, %v154_v37 }
  0x20   :  { %343 = vmatpush.msrb.mxu1 %v125_v5  ;;  %v149_v38 = vand.u32 4294901760, %v148_v36 }
  0x21   :  { %232 = vmatmul.f32.gmra.mxu2 %v138_v19  ;;  %273 = vmatmul.f32.gmra.mxu3 %v139_v24  ;;  %v156_v40 = vsub.f32 %v154_v37, %v155_v39 }
  0x22   :  { %345 = vmatpush.msrb.mxu1 %v127_v6 }
  0x23   :  { %v157_v41 = vand.u32 4294901760, %v156_v40 }
  0x25   :  { %142 = vmatmul.f32.gmra.mxu0 %v141_v33 }
  0x27   :  { %193 = vmatmul.f32.gmra.mxu1 %v137_v14 }
  0x29   :  { %237 = vmatmul.f32.gmra.mxu2 %v146_v31  ;;  %279 = vmatmul.f32.gmra.mxu3 %v147_v34 }
  0x2d   :  { %150 = vmatmul.f32.gmra.mxu0 %v149_v38 }
  0x2f   :  { %197 = vmatmul.f32.gmra.mxu1 %v145_v25 }
  0x31   :  { %242 = vmatmul.f32.gmra.mxu2 %v154_v37  ;;  %285 = vmatmul.f32.gmra.mxu3 %v155_v39 }
  0x35   :  { %158 = vmatmul.f32.gmra.mxu0 %v157_v41 }
  0x37   :  { %201 = vmatmul.f32.gmra.mxu1 %v153_v35 }
  0x3d   :  { %312 = vmatmul.f32.vlgmr.msrb.gmra.mxu0 %v129_v10 }
  0x3f   :  { %347 = vmatmul.f32.vlgmr.msrb.gmra.mxu1 %v129_v10 }
  0x45   :  { %316 = vmatmul.f32.gmra.mxu0 %v137_v14 }
  0x47   :  { %351 = vmatmul.f32.gmra.mxu1 %v137_v14 }
  0x4d   :  { %320 = vmatmul.f32.gmra.mxu0 %v145_v25 }
  0x4f   :  { %355 = vmatmul.f32.gmra.mxu1 %v145_v25 }
  0x55   :  { %324 = vmatmul.f32.gmra.mxu0 %v153_v35 }
  0x57   :  { %359 = vmatmul.f32.gmra.mxu1 %v153_v35 }
  0x9a   :  { %v135_v42 = vpop.f32.mrf.mxu0 }
  0x9b   :  { %v136_v55 = vadd.f32 %v5697_v51, %v135_v42 }
  0x9c   :  { %v190_v43 = vpop.f32.mrf.mxu1  ;;  %v228_v47 = vpop.f32.mrf.mxu2 }
  0x9d   :  { %v268_v49 = vpop.f32.mrf.mxu3  ;;  %v191_v59 = vadd.f32 %v190_v43, %v136_v55 }
  0x9f   :  { %v229_v62 = vadd.f32 %v228_v47, %v191_v59 }
  0xa1   :  { %v269_v2 = vadd.f32 %v268_v49, %v229_v62 }
  0xa2   :  { %v143_v44 = vpop.f32.mrf.mxu0 }
  0xa3   :  { %v144_v53 = vadd.f32 %v5697_v51, %v143_v44 }
  0xa4   :  { %v194_v45 = vpop.f32.mrf.mxu1  ;;  %v233_v54 = vpop.f32.mrf.mxu2 }
  0xa5   :  { %v195_v56 = vadd.f32 %v194_v45, %v144_v53  ;;  %v274_v57 = vpop.f32.mrf.mxu3 }
  0xa7   :  { %v234_v61 = vadd.f32 %v233_v54, %v195_v56 }
  0xa9   :  { %v275_v0 = vadd.f32 %v274_v57, %v234_v61 }
  0xaa   :  { %v151_v46 = vpop.f32.mrf.mxu0 }
  0xab   :  { %v152_v9 = vadd.f32 %v5697_v51, %v151_v46 }
  0xac   :  { %v198_v48 = vpop.f32.mrf.mxu1  ;;  %v238_v63 = vpop.f32.mrf.mxu2 }
  0xad   :  { %v280_v4 = vpop.f32.mrf.mxu3  ;;  %v199_v16 = vadd.f32 %v198_v48, %v152_v9 }
  0xaf   :  { %v239_v21 = vadd.f32 %v238_v63, %v199_v16 }
  0xb1   :  { %v281_v25 = vadd.f32 %v280_v4, %v239_v21 }
  0xb2   :  { %v159_v50 = vpop.f32.mrf.mxu0 }
  0xb3   :  { %v160_v6 = vadd.f32 %v5697_v51, %v159_v50 }
  0xb4   :  { %v202_v52 = vpop.f32.mrf.mxu1  ;;  %v243_v14 = vpop.f32.mrf.mxu2 }
  0xb5   :  { %v203_v11 = vadd.f32 %v202_v52, %v160_v6  ;;  %v286_v20 = vpop.f32.mrf.mxu3 }
  0xb7   :  { %v244_v18 = vadd.f32 %v243_v14, %v203_v11 }
  0xb9   :  { %v287_v22 = vadd.f32 %v286_v20, %v244_v18 }
  0xba   :  { %v313_v58 = vpop.f32.mrf.mxu0 }
  0xbb   :  { %v314_v7 = vadd.f32 %v313_v58, %v269_v2 }
  0xbc   :  { %v348_v60 = vpop.f32.mrf.mxu1 }
  0xbd   :  { %v5964_v12 = vadd.f32 %v348_v60, %v314_v7 }
  0xbf   :  { %v363_v19 = vmul.f32 %v5964_v12, %v5964_v12 }
  0xc1   :  { %v368_v23 = vsel %vm367_vm1, %v363_v19, 0.0 }
  0xc2   :  { %v317_v1 = vpop.f32.mrf.mxu0 }
  0xc3   :  { %v318_v3 = vadd.f32 %v317_v1, %v275_v0 }
  0xc4   :  { %v352_v5 = vpop.f32.mrf.mxu1 }
  0xc5   :  { %v5960_v8 = vadd.f32 %v352_v5, %v318_v3 }
  0xc7   :  { %v364_v10 = vmul.f32 %v5960_v8, %v5960_v8 }
  0xc9   :  { %v371_v13 = vsel %vm367_vm1, %v364_v10, 0.0 }
  0xca   :  { %v321_v15 = vpop.f32.mrf.mxu0  ;;  %372 = vadd.xlane.f32.xlu1 %v371_v13 }
  0xcb   :  { %v322_v28 = vadd.f32 %v321_v15, %v281_v25  ;;  %v6015_v25 = vand.u32 4294901760, %v5960_v8 }
  0xcc   :  { %v356_v17 = vpop.f32.mrf.mxu1 }
  0xcd   :  { %v5974_v31 = vadd.f32 %v356_v17, %v322_v28 }
  0xcf   :  { %v365_v33 = vmul.f32 %v5974_v31, %v5974_v31  ;;  %v6005_v21 = vand.u32 4294901760, %v5974_v31 }
  0xd1   :  { %v374_v34 = vsel %vm367_vm1, %v365_v33, 0.0  ;;  %v6025_v33 = vand.u32 4294901760, %v5964_v12 }
  0xd2   :  { %v325_v24 = vpop.f32.mrf.mxu0  ;;  %369 = vadd.xlane.f32.xlu1 %v368_v23 }
  0xd3   :  { %v326_v26 = vadd.f32 %v325_v24, %v287_v22 }
  0xd4   :  { %v360_v27 = vpop.f32.mrf.mxu1 }
  0xd5   :  { %v5970_v29 = vadd.f32 %v360_v27, %v326_v26 }
  0xd7   :  { %v366_v30 = vmul.f32 %v5970_v29, %v5970_v29  ;;  %v5989_v14 = vand.u32 4294901760, %v5970_v29 }
  0xd9   :  { %v377_v32 = vsel %vm367_vm1, %v366_v30, 0.0  ;;  %v6010_v23 = vsub.f32 %v5970_v29, %v5989_v14 }
  0xda   :  { %378 = vadd.xlane.f32.xlu0 %v377_v32 }
  0xe2   :  { %375 = vadd.xlane.f32.xlu0 %v374_v34 }
 0x13d   :  { %v373_v35 = vpop.xlane.xlu1 %372 }
 0x13e   :  { %v381_v36 = vmax.f32 %v373_v35, 1e-24  ;;  %v801_v35 = vand.u32 4294901760, %v6010_v23 }
 0x140   :  { %5705 = vrsqrt.f32 %v381_v36  ;;  %vm400_vm5 = vweird.f32 %v381_v36 }
 0x145   :  { %v370_v37 = vpop.xlane.xlu1 %369 }
 0x146   :  { %v380_v38 = vmax.f32 %v370_v37, 1e-24  ;;  %v5706_v39 = vpop.eup %5705  ;;  %v6040_v37 = vsub.f32 %v5960_v8, %v6015_v25 }
 0x147   :  { %v395_v40 = vmul.f32 %v5706_v39, %v381_v36  ;;  %vm401_vm3 = vweird.f32 %v5706_v39 }
 0x148   :  { %5707 = vrsqrt.f32 %v380_v38  ;;  %vm390_vm4 = vweird.f32 %v380_v38  ;;  %vm402_vm8 = vmor %vm400_vm5, %vm401_vm3 }
 0x149   :  { %v396_v44 = vmul.f32 %v5706_v39, %v395_v40  ;;  %v818_v40 = vsub.f32 %v5964_v12, %v6025_v33 }
 0x14b   :  { %v397_v47 = vmul.f32 0.5, %v396_v44 }
 0x14d   :  { %v379_v41 = vpop.xlane.xlu0 %378  ;;  %v398_v53 = vsub.f32 1.5, %v397_v47  ;;  %v819_v47 = vand.u32 4294901760, %v818_v40 }
 0x14e   :  { %v5708_v42 = vpop.eup %5707  ;;  %v383_v43 = vmax.f32 %v379_v41, 1e-24 }
 0x14f   :  { %v385_v45 = vmul.f32 %v5708_v42, %v380_v38  ;;  %vm391_vm2 = vweird.f32 %v5708_v42  ;;  %v399_v57 = vmul.f32 %v5706_v39, %v398_v53 }
 0x150   :  { %5709 = vrsqrt.f32 %v383_v43  ;;  %vm392_vm6 = vmor %vm390_vm4, %vm391_vm2  ;;  %vm420_vm9 = vweird.f32 %v383_v43 }
 0x151   :  { %v386_v46 = vmul.f32 %v5708_v42, %v385_v45  ;;  %v403_v62 = vsel %vm402_vm8, %v5706_v39, %v399_v57 }
 0x152   :  { %v425_v4 = vmul.f32 %v403_v62, %v5960_v8 }
 0x153   :  { %v387_v48 = vmul.f32 0.5, %v386_v46 }
 0x154   :  { %v432_v13 = vsel %vm367_vm1, %v425_v4, 0 }
 0x155   :  { %v376_v49 = vpop.xlane.xlu0 %375  ;;  %v388_v51 = vsub.f32 1.5, %v387_v48  ;;  %v5998_v18 = vand.u32 4294901760, %v432_v13 }
 0x156   :  { %v5710_v50 = vpop.eup %5709  ;;  %v382_v52 = vmax.f32 %v376_v49, 1e-24 }
 0x157   :  { %v415_v54 = vmul.f32 %v5710_v50, %v383_v43  ;;  %v389_v56 = vmul.f32 %v5708_v42, %v388_v51  ;;  %vm421_vm7 = vweird.f32 %v5710_v50  ;;  %v469_v32 = vsub.f32 %v432_v13, %v5998_v18 }
 0x158   :  { %5711 = vrsqrt.f32 %v382_v52  ;;  %vm422_vm10 = vmor %vm420_vm9, %vm421_vm7  ;;  %vm410_vm12 = vweird.f32 %v382_v52  ;;  %v813_v43 = vand.u32 4294901760, %v6040_v37 }
 0x159   :  { %v416_v55 = vmul.f32 %v5710_v50, %v415_v54  ;;  %v393_v61 = vsel %vm392_vm6, %v5708_v42, %v389_v56  ;;  %v470_v38 = vand.u32 4294901760, %v469_v32  ;;  %v802_v42 = vsub.f32 %v6010_v23, %v801_v35 }
 0x15a   :  { %v424_v1 = vmul.f32 %v393_v61, %v5964_v12  ;;  %v814_v49 = vsub.f32 %v6040_v37, %v813_v43 }
 0x15b   :  { %v417_v58 = vmul.f32 0.5, %v416_v55  ;;  %v471_v45 = vsub.f32 %v469_v32, %v470_v38  ;;  %v803_v12 = vand.u32 4294901760, %v802_v42 }
 0x15c   :  { %v429_v9 = vsel %vm367_vm1, %v424_v1, 0  ;;  %v815_v53 = vand.u32 4294901760, %v814_v49 }
 0x15d   :  { %v418_v59 = vsub.f32 1.5, %v417_v58  ;;  %v5996_v17 = vand.u32 4294901760, %v429_v9 }
 0x15e   :  { %v5712_v60 = vpop.eup %5711 }
 0x15f   :  { %v419_v63 = vmul.f32 %v5710_v50, %v418_v59  ;;  %v405_v0 = vmul.f32 %v5712_v60, %v382_v52  ;;  %vm411_vm11 = vweird.f32 %v5712_v60  ;;  %v461_v27 = vsub.f32 %v429_v9, %v5996_v17 }
 0x160   :  { %vm412_vm13 = vmor %vm410_vm12, %vm411_vm11  ;;  %v820_v52 = vsub.f32 %v818_v40, %v819_v47 }
 0x161   :  { %v423_v2 = vsel %vm422_vm10, %v5710_v50, %v419_v63  ;;  %v406_v3 = vmul.f32 %v5712_v60, %v405_v0  ;;  %v462_v36 = vand.u32 4294901760, %v461_v27  ;;  %v472_v50 = vand.u32 4294901760, %v471_v45 }
 0x162   :  { %v427_v5 = vmul.f32 %v423_v2, %v5970_v29  ;;  %v6029_v29 = vsub.f32 %v5974_v31, %v6005_v21  ;;  %v821_v54 = vand.u32 4294901760, %v820_v52 }
 0x163   :  { %v407_v6 = vmul.f32 0.5, %v406_v3  ;;  %v463_v8 = vsub.f32 %v461_v27, %v462_v36 }
 0x164   :  { %v438_v7 = vsel %vm367_vm1, %v427_v5, 0  ;;  %v807_v39 = vand.u32 4294901760, %v6029_v29 }
 0x165   :  { %v5985_v10 = vand.u32 4294901760, %v438_v7  ;;  %v408_v11 = vsub.f32 1.5, %v407_v6  ;;  %v464_v48 = vand.u32 4294901760, %v463_v8 }
 0x166   :  { %v808_v46 = vsub.f32 %v6029_v29, %v807_v39 }
 0x167   :  { %v409_v15 = vmul.f32 %v5712_v60, %v408_v11  ;;  %453 = vmatpush.xpose.msrb.mxu2 %v5985_v10  ;;  %604 = vmatpush.xpose.msra.mxu1 %v5985_v10  ;;  %v5994_v16 = vsub.f32 %v438_v7, %v5985_v10 }
 0x168   :  { %v809_v51 = vand.u32 4294901760, %v808_v46 }
 0x169   :  { %v413_v19 = vsel %vm412_vm13, %v5712_v60, %v409_v15  ;;  %560 = vmatpush.xpose.msra.mxu0 %v5994_v16  ;;  %v6002_v20 = vand.u32 4294901760, %v5994_v16 }
 0x16a   :  { %v426_v22 = vmul.f32 %v413_v19, %v5974_v31 }
 0x16b   :  { %v487_v24 = vsub.f32 %v5994_v16, %v6002_v20 }
 0x16c   :  { %v435_v26 = vsel %vm367_vm1, %v426_v22, 0 }
 0x16d   :  { %v6019_v28 = vand.u32 4294901760, %v435_v26  ;;  %v6021_v30 = vand.u32 4294901760, %v487_v24  ;;  %v6110_v24 = vld [vmem:[%s7430_s10 + $0x8] sm:$0xff] }
 0x16f   :  { %455 = vmatpush.xpose.msrb.mxu2 %v6019_v28  ;;  %510 = vmatpush.xpose.msrb.mxu3 %v6021_v30  ;;  %v6034_v34 = vsub.f32 %v435_v26, %v6019_v28 }
 0x170   :  { %606 = vmatpush.xpose.msra.mxu1 %v6019_v28 }
 0x171   :  { %563 = vmatpush.xpose.msra.mxu0 %v6034_v34  ;;  %v6044_v31 = vand.u32 4294901760, %v6034_v34 }
 0x173   :  { %457 = vmatpush.xpose.msrb.mxu2 %v5998_v18  ;;  %v479_v41 = vsub.f32 %v6034_v34, %v6044_v31 }
 0x174   :  { %608 = vmatpush.xpose.msra.mxu1 %v5998_v18 }
 0x175   :  { %566 = vmatpush.xpose.msra.mxu0 %v469_v32  ;;  %v480_v44 = vand.u32 4294901760, %v479_v41 }
 0x177   :  { %459 = vmatpush.xpose.msrb.mxu2 %v5996_v17  ;;  %516 = vmatpush.xpose.msrb.mxu3 %v480_v44 }
 0x178   :  { %610 = vmatpush.xpose.msra.mxu1 %v5996_v17 }
 0x179   :  { %569 = vmatpush.xpose.msra.mxu0 %v461_v27 }
 0x17a   :  { %465 = vmatmul.f32.vlgmr.msrb.gmra.mxu2 %v464_v48 }
 0x17b   :  { %651 = vmatpush.xpose.msra.mxu2 %v6002_v20  ;;  %614 = vmatmul.f32.vlgmr.msra.gmra.mxu1 %v462_v36 }
 0x17c   :  { %804 = vmatpush.msrb.mxu1 %v803_v12  ;;  %522 = vmatpush.xpose.msrb.mxu3 %v472_v50 }
 0x17d   :  { %747 = vmatpush.msrb.mxu0 %v5989_v14 }
 0x17e   :  { %810 = vmatpush.msrb.mxu1 %v809_v51  ;;  %572 = vmatmul.f32.vlgmr.msra.gmra.mxu0 %v461_v27 }
 0x17f   :  { %655 = vmatpush.xpose.msra.mxu2 %v6044_v31  ;;  %749 = vmatpush.msrb.mxu0 %v6005_v21 }
 0x180   :  { %816 = vmatpush.msrb.mxu1 %v815_v53  ;;  %528 = vmatpush.xpose.msrb.mxu3 %v464_v48  ;;  %v6125_v53 = vld [vmem:[%s7430_s10 + $0x18] sm:$0xff] }
 0x181   :  { %751 = vmatpush.msrb.mxu0 %v6015_v25 }
 0x182   :  { %822 = vmatpush.msrb.mxu1 %v821_v54  ;;  %473 = vmatmul.f32.gmra.mxu2 %v472_v50 }
 0x183   :  { %659 = vmatpush.xpose.msra.mxu2 %v470_v38  ;;  %753 = vmatpush.msrb.mxu0 %v6025_v33 }
 0x184   :  { %694 = vmatpush.xpose.msra.mxu3 %v5985_v10  ;;  %988 = vmatpush.msra.mxu1 %v5989_v14 }
 0x185   :  { %945 = vmatpush.msra.mxu0 %v801_v35  ;;  %530 = vmatmul.f32.vlgmr.msrb.gmra.mxu3 %v5996_v17 }
 0x186   :  { %990 = vmatpush.msra.mxu1 %v6005_v21  ;;  %577 = vmatmul.f32.gmra.mxu0 %v469_v32 }
 0x187   :  { %620 = vmatmul.f32.gmra.mxu1 %v470_v38  ;;  %949 = vmatpush.msra.mxu0 %v807_v39 }
 0x188   :  { %992 = vmatpush.msra.mxu1 %v6015_v25  ;;  %663 = vmatpush.xpose.msra.mxu2 %v462_v36 }
 0x189   :  { %696 = vmatpush.xpose.msra.mxu3 %v6019_v28  ;;  %953 = vmatpush.msra.mxu0 %v813_v43 }
 0x18a   :  { %994 = vmatpush.msra.mxu1 %v6025_v33  ;;  %481 = vmatmul.f32.gmra.mxu2 %v480_v44 }
 0x18b   :  { %957 = vmatpush.msra.mxu0 %v819_v47 }
 0x18c   :  { %854 = vmatpush.msrb.mxu2 %v6010_v23 }
 0x18d   :  { %698 = vmatpush.xpose.msra.mxu3 %v5998_v18 }
 0x18e   :  { %857 = vmatpush.msrb.mxu2 %v6029_v29  ;;  %534 = vmatmul.f32.gmra.mxu3 %v5998_v18 }
 0x18f   :  { %626 = vmatmul.f32.gmra.mxu1 %v6044_v31  ;;  %582 = vmatmul.f32.gmra.mxu0 %v6034_v34 }
 0x190   :  { %860 = vmatpush.msrb.mxu2 %v6040_v37 }
 0x191   :  { %700 = vmatpush.xpose.msra.mxu3 %v5996_v17 }
 0x192   :  { %863 = vmatpush.msrb.mxu2 %v818_v40  ;;  %v6118_v40 = vld [vmem:[%s7430_s10 + $0x10] sm:$0xff] }
 0x193   :  { %489 = vmatmul.f32.gmra.mxu2 %v6021_v30 }
 0x195   :  { %898 = vmatpush.msrb.mxu3 %v5989_v14 }
 0x196   :  { %538 = vmatmul.f32.gmra.mxu3 %v6019_v28 }
 0x197   :  { %900 = vmatpush.msrb.mxu3 %v6005_v21  ;;  %632 = vmatmul.f32.gmra.mxu1 %v6002_v20 }
 0x198   :  { %587 = vmatmul.f32.gmra.mxu0 %v5994_v16 }
 0x199   :  { %902 = vmatpush.msrb.mxu3 %v6015_v25 }
 0x19b   :  { %904 = vmatpush.msrb.mxu3 %v6025_v33  ;;  %665 = vmatmul.f32.vlgmr.msra.gmra.mxu2 %v5996_v17 }
 0x19e   :  { %542 = vmatmul.f32.gmra.mxu3 %v5985_v10 }
 0x1a3   :  { %669 = vmatmul.f32.gmra.mxu2 %v5998_v18 }
 0x1a6   :  { %702 = vmatmul.f32.vlgmr.msra.gmra.mxu3 %v5996_v17 }
 0x1ab   :  { %673 = vmatmul.f32.gmra.mxu2 %v6019_v28 }
 0x1ae   :  { %706 = vmatmul.f32.gmra.mxu3 %v5998_v18 }
 0x1b3   :  { %677 = vmatmul.f32.gmra.mxu2 %v5985_v10 }
 0x1b6   :  { %710 = vmatmul.f32.gmra.mxu3 %v6019_v28 }
 0x1be   :  { %714 = vmatmul.f32.gmra.mxu3 %v5985_v10  ;;  %v6100_v10 = vld [vmem:[%s7430_s10] sm:$0xff]  ;;  %s5802_s10 = smov [#allocation4]  }
 0x1f8   :  { %v615_v63 = vpop.f32.mrf.mxu1 }
 0x1fb   :  { %v573_v62 = vpop.f32.mrf.mxu0 }
 0x1fd   :  { %v466_v55 = vpop.f32.mrf.mxu2 }
 0x203   :  { %v578_v4 = vpop.f32.mrf.mxu0 }
 0x204   :  { %v621_v7 = vpop.f32.mrf.mxu1 }
 0x205   :  { %v474_v56 = vpop.f32.mrf.mxu2 }
 0x208   :  { %v531_v57 = vpop.f32.mrf.mxu3 }
 0x209   :  { %v532_v0 = vadd.f32 %v531_v57, %v466_v55 }
 0x20b   :  { %v574_v3 = vadd.f32 %v573_v62, %v532_v0 }
 0x20c   :  { %v583_v20 = vpop.f32.mrf.mxu0  ;;  %v627_v28 = vpop.f32.mrf.mxu1 }
 0x20d   :  { %v482_v58 = vpop.f32.mrf.mxu2  ;;  %v616_v6 = vadd.f32 %v615_v63, %v574_v3 }
 0x211   :  { %v535_v59 = vpop.f32.mrf.mxu3 }
 0x212   :  { %v536_v5 = vadd.f32 %v535_v59, %v474_v56 }
 0x214   :  { %v579_v14 = vadd.f32 %v578_v4, %v536_v5  ;;  %v633_v46 = vpop.f32.mrf.mxu1  ;;  %v1019_v4 = vld [vmem:[%s7463_s21 + $0x18] sm:$0xff] }
 0x215   :  { %v588_v39 = vpop.f32.mrf.mxu0  ;;  %v1048_v5 = vand.u32 4294901760, %v1019_v4 }
 0x216   :  { %v490_v60 = vpop.f32.mrf.mxu2  ;;  %v622_v18 = vadd.f32 %v621_v7, %v579_v14 }
 0x217   :  { %1049 = vmatpush.msra.mxu2 %v1048_v5  ;;  %v1102_v7 = vsub.f32 %v1019_v4, %v1048_v5 }
 0x219   :  { %v539_v61 = vpop.f32.mrf.mxu3 }
 0x21a   :  { %v540_v17 = vadd.f32 %v539_v61, %v482_v58 }
 0x21c   :  { %v584_v26 = vadd.f32 %v583_v20, %v540_v17 }
 0x21e   :  { %v666_v1 = vpop.f32.mrf.mxu2  ;;  %v628_v35 = vadd.f32 %v627_v28, %v584_v26 }
 0x21f   :  { %v667_v9 = vadd.f32 %v666_v1, %v616_v6  ;;  %v1018_v6 = vld [vmem:[%s7463_s21 + $0x10] sm:$0xff] }
 0x221   :  { %v543_v2 = vpop.f32.mrf.mxu3 }
 0x222   :  { %v544_v34 = vadd.f32 %v543_v2, %v490_v60 }
 0x224   :  { %v589_v8 = vadd.f32 %v588_v39, %v544_v34 }
 0x226   :  { %v670_v11 = vpop.f32.mrf.mxu2  ;;  %v634_v48 = vadd.f32 %v633_v46, %v589_v8 }
 0x227   :  { %v671_v22 = vadd.f32 %v670_v11, %v622_v18  ;;  %v1017_v11 = vld [vmem:[%s7463_s21 + $0x8] sm:$0xff] }
 0x229   :  { %v703_v13 = vpop.f32.mrf.mxu3 }
 0x22a   :  { %v704_v15 = vadd.f32 %v703_v13, %v667_v9  ;;  %v1050_v9 = vand.u32 4294901760, %v1018_v6  ;;  %v1103_v13 = vand.u32 4294901760, %v1102_v7 }
 0x22c   :  { %v718_v16 = vmul.f32 %v704_v15, %v6100_v10  ;;  %v1108_v14 = vsub.f32 %v1018_v6, %v1050_v9  ;;  %v1052_v15 = vand.u32 4294901760, %v1017_v11  ;;  %1051 = vmatpush.msra.mxu2 %v1050_v9 }
 0x22e   :  { %v723_v19 = vsel %vm367_vm1, %v718_v16, 0  ;;  %v674_v30 = vpop.f32.mrf.mxu2  ;;  %v1016_v16 = vld [vmem:[%s7463_s21] sm:$0xff]  ;;  %v1109_v20 = vand.u32 4294901760, %v1108_v14  ;;  %1053 = vmatpush.msra.mxu2 %v1052_v15  ;;  %s5803_s21 = smov [#allocation6]  }
 0x22f   :  { %v6104_v21 = vand.u32 4294901760, %v723_v19  ;;  %v675_v38 = vadd.f32 %v674_v30, %v628_v35 }
 0x231   :  { %v755_v23 = vsub.f32 %v723_v19, %v6104_v21  ;;  %v707_v25 = vpop.f32.mrf.mxu3  ;;  %824 = vmatmul.f32.vlgmr.msrb.gmra.mxu1 %v6104_v21  ;;  %v1104_v19 = vsub.f32 %v1102_v7, %v1103_v13 }
 0x232   :  { %v708_v27 = vadd.f32 %v707_v25, %v671_v22  ;;  %1200 = vmatpush.msrb.mxu1 %v1048_v5  ;;  %v1054_v22 = vand.u32 4294901760, %v1016_v16  ;;  %v1110_v25 = vsub.f32 %v1108_v14, %v1109_v20 }
 0x233   :  { %866 = vmatmul.f32.vlgmr.msrb.gmra.mxu2 %v755_v23  ;;  %v756_v32 = vand.u32 4294901760, %v755_v23 }
 0x234   :  { %v719_v33 = vmul.f32 %v708_v27, %v6110_v24  ;;  %1202 = vmatpush.msrb.mxu1 %v1050_v9  ;;  %v1120_v27 = vsub.f32 %v1016_v16, %v1054_v22  ;;  %1055 = vmatpush.msra.mxu2 %v1054_v22  ;;  %v1111_v28 = vand.u32 4294901760, %v1110_v25 }
 0x235   :  { %908 = vmatmul.f32.vlgmr.msrb.gmra.mxu3 %v756_v32  ;;  %v757_v29 = vsub.f32 %v755_v23, %v756_v32  ;;  %v1105_v23 = vand.u32 4294901760, %v1104_v19 }
 0x236   :  { %v726_v36 = vsel %vm367_vm1, %v719_v33, 0  ;;  %v678_v47 = vpop.f32.mrf.mxu2  ;;  %1204 = vmatpush.msrb.mxu1 %v1052_v15  ;;  %v1121_v32 = vand.u32 4294901760, %v1120_v27  ;;  %1247 = vmatpush.msrb.mxu2 %v1103_v13 }
 0x237   :  { %v762_v37 = vand.u32 4294901760, %v726_v36  ;;  %v758_v31 = vand.u32 4294901760, %v757_v29  ;;  %v679_v52 = vadd.f32 %v678_v47, %v634_v48  ;;  %1106 = vmatpush.msra.mxu3 %v1105_v23 }
 0x238   :  { %1206 = vmatpush.msrb.mxu1 %v1054_v22  ;;  %v1122_v29 = vsub.f32 %v1120_v27, %v1121_v32  ;;  %1251 = vmatpush.msrb.mxu2 %v1109_v20 }
 0x239   :  { %v711_v41 = vpop.f32.mrf.mxu3  ;;  %759 = vmatmul.f32.vlgmr.msrb.gmra.mxu0 %v758_v31  ;;  %828 = vmatmul.f32.gmra.mxu1 %v762_v37  ;;  %v763_v42 = vsub.f32 %v726_v36, %v762_v37 }
 0x23a   :  { %v712_v43 = vadd.f32 %v711_v41, %v675_v38  ;;  %1156 = vmatpush.msrb.mxu0 %v1102_v7  ;;  %1112 = vmatpush.msra.mxu3 %v1111_v28  ;;  %v1123_v36 = vand.u32 4294901760, %v1122_v29 }
 0x23b   :  { %871 = vmatmul.f32.gmra.mxu2 %v763_v42  ;;  %v764_v44 = vand.u32 4294901760, %v763_v42 }
 0x23c   :  { %v720_v45 = vmul.f32 %v712_v43, %v6118_v40  ;;  %1159 = vmatpush.msrb.mxu0 %v1108_v14 }
 0x23d   :  { %914 = vmatmul.f32.gmra.mxu3 %v764_v44  ;;  %v765_v12 = vsub.f32 %v763_v42, %v764_v44 }
 0x23e   :  { %v729_v49 = vsel %vm367_vm1, %v720_v45, 0 }
 0x23f   :  { %v770_v50 = vand.u32 4294901760, %v729_v49  ;;  %v766_v51 = vand.u32 4294901760, %v765_v12 }
 0x241   :  { %v715_v54 = vpop.f32.mrf.mxu3  ;;  %767 = vmatmul.f32.gmra.mxu0 %v766_v51  ;;  %832 = vmatmul.f32.gmra.mxu1 %v770_v50  ;;  %v771_v55 = vsub.f32 %v729_v49, %v770_v50 }
 0x242   :  { %v716_v56 = vadd.f32 %v715_v54, %v679_v52 }
 0x243   :  { %876 = vmatmul.f32.gmra.mxu2 %v771_v55  ;;  %v772_v57 = vand.u32 4294901760, %v771_v55 }
 0x244   :  { %v721_v58 = vmul.f32 %v716_v56, %v6125_v53 }
 0x245   :  { %920 = vmatmul.f32.gmra.mxu3 %v772_v57  ;;  %v773_v59 = vsub.f32 %v771_v55, %v772_v57 }
 0x246   :  { %v732_v60 = vsel %vm367_vm1, %v721_v58, 0 }
 0x247   :  { %v778_v61 = vand.u32 4294901760, %v732_v60  ;;  %v774_v62 = vand.u32 4294901760, %v773_v59 }
 0x249   :  { %775 = vmatmul.f32.gmra.mxu0 %v774_v62  ;;  %836 = vmatmul.f32.gmra.mxu1 %v778_v61  ;;  %v779_v63 = vsub.f32 %v732_v60, %v778_v61 }
 0x24b   :  { %881 = vmatmul.f32.gmra.mxu2 %v779_v63  ;;  %v780_v0 = vand.u32 4294901760, %v779_v63 }
 0x24d   :  { %926 = vmatmul.f32.gmra.mxu3 %v780_v0  ;;  %v781_v1 = vsub.f32 %v779_v63, %v780_v0 }
 0x24f   :  { %v782_v2 = vand.u32 4294901760, %v781_v1 }
 0x251   :  { %783 = vmatmul.f32.gmra.mxu0 %v782_v2  ;;  %996 = vmatmul.f32.vlgmr.msra.gmra.mxu1 %v6104_v21 }
 0x259   :  { %959 = vmatmul.f32.vlgmr.msra.gmra.mxu0 %v6104_v21  ;;  %1000 = vmatmul.f32.gmra.mxu1 %v762_v37  ;;  %v1114_v21 = vsub.f32 %v1017_v11, %v1052_v15 }
 0x25b   :  { %v1115_v26 = vand.u32 4294901760, %v1114_v21  ;;  %1162 = vmatpush.msrb.mxu0 %v1114_v21 }
 0x25d   :  { %v1116_v30 = vsub.f32 %v1114_v21, %v1115_v26  ;;  %1165 = vmatpush.msrb.mxu0 %v1120_v27  ;;  %1255 = vmatpush.msrb.mxu2 %v1115_v26 }
 0x25f   :  { %v1117_v33 = vand.u32 4294901760, %v1116_v30  ;;  %1259 = vmatpush.msrb.mxu2 %v1121_v32 }
 0x261   :  { %963 = vmatmul.f32.gmra.mxu0 %v762_v37  ;;  %1004 = vmatmul.f32.gmra.mxu1 %v770_v50 }
 0x262   :  { %1118 = vmatpush.msra.mxu3 %v1117_v33 }
 0x264   :  { %1124 = vmatpush.msra.mxu3 %v1123_v36 }
 0x266   :  { %1290 = vmatpush.msrb.mxu3 %v1048_v5 }
 0x268   :  { %1292 = vmatpush.msrb.mxu3 %v1050_v9 }
 0x269   :  { %967 = vmatmul.f32.gmra.mxu0 %v770_v50  ;;  %1008 = vmatmul.f32.gmra.mxu1 %v778_v61 }
 0x26a   :  { %1294 = vmatpush.msrb.mxu3 %v1052_v15 }
 0x26c   :  { %1296 = vmatpush.msrb.mxu3 %v1054_v22 }
 0x271   :  { %971 = vmatmul.f32.gmra.mxu0 %v778_v61 }
 0x2ae   :  { %v825_v3 = vpop.f32.mrf.mxu1 }
 0x2b6   :  { %v760_v17 = vpop.f32.mrf.mxu0  ;;  %v829_v18 = vpop.f32.mrf.mxu1 }
 0x2b7   :  { %v867_v38 = vpop.f32.mrf.mxu2  ;;  %v826_v39 = vadd.f32 %v825_v3, %v760_v17 }
 0x2b8   :  { %v909_v41 = vpop.f32.mrf.mxu3 }
 0x2b9   :  { %v868_v8 = vadd.f32 %v867_v38, %v826_v39 }
 0x2bb   :  { %v910_v45 = vadd.f32 %v909_v41, %v868_v8 }
 0x2be   :  { %v768_v34 = vpop.f32.mrf.mxu0  ;;  %v833_v35 = vpop.f32.mrf.mxu1 }
 0x2bf   :  { %v872_v44 = vpop.f32.mrf.mxu2  ;;  %v830_v46 = vadd.f32 %v829_v18, %v768_v34 }
 0x2c0   :  { %v915_v48 = vpop.f32.mrf.mxu3 }
 0x2c1   :  { %v873_v49 = vadd.f32 %v872_v44, %v830_v46 }
 0x2c3   :  { %v916_v54 = vadd.f32 %v915_v48, %v873_v49 }
 0x2c6   :  { %v776_v37 = vpop.f32.mrf.mxu0  ;;  %v837_v31 = vpop.f32.mrf.mxu1 }
 0x2c7   :  { %v834_v55 = vadd.f32 %v833_v35, %v776_v37  ;;  %v877_v57 = vpop.f32.mrf.mxu2 }
 0x2c8   :  { %v921_v0 = vpop.f32.mrf.mxu3 }
 0x2c9   :  { %v878_v62 = vadd.f32 %v877_v57, %v834_v55 }
 0x2cb   :  { %v922_v4 = vadd.f32 %v921_v0, %v878_v62 }
 0x2ce   :  { %v784_v42 = vpop.f32.mrf.mxu0  ;;  %v997_v43 = vpop.f32.mrf.mxu1 }
 0x2cf   :  { %v838_v5 = vadd.f32 %v837_v31, %v784_v42  ;;  %v882_v15 = vpop.f32.mrf.mxu2 }
 0x2d0   :  { %v927_v21 = vpop.f32.mrf.mxu3 }
 0x2d1   :  { %v883_v17 = vadd.f32 %v882_v15, %v838_v5 }
 0x2d3   :  { %v928_v23 = vadd.f32 %v927_v21, %v883_v17 }
 0x2d6   :  { %v960_v47 = vpop.f32.mrf.mxu0  ;;  %v1001_v52 = vpop.f32.mrf.mxu1 }
 0x2d7   :  { %v961_v12 = vadd.f32 %v960_v47, %v910_v45 }
 0x2d9   :  { %v998_v50 = vadd.f32 %v997_v43, %v961_v12  ;;  %v5698_v12 = vld [vmem:[%s7464_s2] ss:$0 sm:$0xff] }
 0x2db   :  { %v1012_v51 = vmax.f32 %v998_v50, 0.0 }
 0x2dd   :  { %v1025_v56 = vsel %vm367_vm1, %v1012_v51, 0 }
 0x2de   :  { %v1056_v58 = vand.u32 4294901760, %v1025_v56  ;;  %v964_v59 = vpop.f32.mrf.mxu0  ;;  %v1005_v9 = vpop.f32.mrf.mxu1 }
 0x2df   :  { %v965_v60 = vadd.f32 %v964_v59, %v916_v54 }
 0x2e0   :  { %v1057_v61 = vsub.f32 %v1025_v56, %v1056_v58  ;;  %1126 = vmatmul.f32.vlgmr.msra.gmra.mxu3 %v1056_v58 }
 0x2e1   :  { %v1002_v63 = vadd.f32 %v1001_v52, %v965_v60 }
 0x2e2   :  { %1168 = vmatmul.f32.vlgmr.msrb.gmra.mxu0 %v1057_v61  ;;  %v1058_v1 = vand.u32 4294901760, %v1057_v61 }
 0x2e3   :  { %v1013_v2 = vmax.f32 %v1002_v63, 0.0 }
 0x2e4   :  { %1210 = vmatmul.f32.vlgmr.msrb.gmra.mxu1 %v1058_v1  ;;  %v1059_v3 = vsub.f32 %v1057_v61, %v1058_v1 }
 0x2e5   :  { %v1028_v6 = vsel %vm367_vm1, %v1013_v2, 0 }
 0x2e6   :  { %v1064_v7 = vand.u32 4294901760, %v1028_v6  ;;  %v968_v11 = vpop.f32.mrf.mxu0  ;;  %v1060_v13 = vand.u32 4294901760, %v1059_v3  ;;  %v1009_v32 = vpop.f32.mrf.mxu1 }
 0x2e7   :  { %v969_v14 = vadd.f32 %v968_v11, %v922_v4 }
 0x2e8   :  { %1061 = vmatmul.f32.vlgmr.msra.gmra.mxu2 %v1060_v13  ;;  %1130 = vmatmul.f32.gmra.mxu3 %v1064_v7  ;;  %v1065_v16 = vsub.f32 %v1028_v6, %v1064_v7 }
 0x2e9   :  { %v1006_v18 = vadd.f32 %v1005_v9, %v969_v14 }
 0x2ea   :  { %1173 = vmatmul.f32.gmra.mxu0 %v1065_v16  ;;  %v1066_v19 = vand.u32 4294901760, %v1065_v16 }
 0x2eb   :  { %v1014_v20 = vmax.f32 %v1006_v18, 0.0 }
 0x2ec   :  { %1216 = vmatmul.f32.gmra.mxu1 %v1066_v19  ;;  %v1067_v22 = vsub.f32 %v1065_v16, %v1066_v19 }
 0x2ed   :  { %v1031_v25 = vsel %vm367_vm1, %v1014_v20, 0 }
 0x2ee   :  { %v1072_v26 = vand.u32 4294901760, %v1031_v25  ;;  %v972_v27 = vpop.f32.mrf.mxu0  ;;  %v1068_v28 = vand.u32 4294901760, %v1067_v22 }
 0x2ef   :  { %v973_v30 = vadd.f32 %v972_v27, %v928_v23 }
 0x2f0   :  { %1069 = vmatmul.f32.gmra.mxu2 %v1068_v28  ;;  %1134 = vmatmul.f32.gmra.mxu3 %v1072_v26  ;;  %v1073_v33 = vsub.f32 %v1031_v25, %v1072_v26 }
 0x2f1   :  { %v1010_v29 = vadd.f32 %v1009_v32, %v973_v30 }
 0x2f2   :  { %1178 = vmatmul.f32.gmra.mxu0 %v1073_v33  ;;  %v1074_v34 = vand.u32 4294901760, %v1073_v33 }
 0x2f3   :  { %v1015_v35 = vmax.f32 %v1010_v29, 0.0 }
 0x2f4   :  { %1222 = vmatmul.f32.gmra.mxu1 %v1074_v34  ;;  %v1075_v36 = vsub.f32 %v1073_v33, %v1074_v34 }
 0x2f5   :  { %v1034_v37 = vsel %vm367_vm1, %v1015_v35, 0 }
 0x2f6   :  { %v1080_v31 = vand.u32 4294901760, %v1034_v37  ;;  %v1076_v38 = vand.u32 4294901760, %v1075_v36 }
 0x2f8   :  { %1077 = vmatmul.f32.gmra.mxu2 %v1076_v38  ;;  %1138 = vmatmul.f32.gmra.mxu3 %v1080_v31  ;;  %v1081_v39 = vsub.f32 %v1034_v37, %v1080_v31 }
 0x2fa   :  { %1183 = vmatmul.f32.gmra.mxu0 %v1081_v39  ;;  %v1082_v41 = vand.u32 4294901760, %v1081_v39 }
 0x2fc   :  { %1228 = vmatmul.f32.gmra.mxu1 %v1082_v41  ;;  %v1083_v42 = vsub.f32 %v1081_v39, %v1082_v41 }
 0x2fe   :  { %v1084_v8 = vand.u32 4294901760, %v1083_v42 }
 0x300   :  { %1085 = vmatmul.f32.gmra.mxu2 %v1084_v8  ;;  %1298 = vmatmul.f32.vlgmr.msrb.gmra.mxu3 %v1056_v58 }
 0x308   :  { %1261 = vmatmul.f32.vlgmr.msrb.gmra.mxu2 %v1056_v58  ;;  %1302 = vmatmul.f32.gmra.mxu3 %v1064_v7 }
 0x310   :  { %1265 = vmatmul.f32.gmra.mxu2 %v1064_v7  ;;  %1306 = vmatmul.f32.gmra.mxu3 %v1072_v26 }
 0x318   :  { %1269 = vmatmul.f32.gmra.mxu2 %v1072_v26  ;;  %1310 = vmatmul.f32.gmra.mxu3 %v1080_v31 }
 0x320   :  { %1273 = vmatmul.f32.gmra.mxu2 %v1080_v31 }
 0x35f   :  { %v1169_v51 = vpop.f32.mrf.mxu0 }
 0x361   :  { %v1211_v54 = vpop.f32.mrf.mxu1 }
 0x363   :  { %v1127_v43 = vpop.f32.mrf.mxu3 }
 0x367   :  { %v1174_v59 = vpop.f32.mrf.mxu0 }
 0x369   :  { %v1217_v0 = vpop.f32.mrf.mxu1 }
 0x36b   :  { %v1062_v44 = vpop.f32.mrf.mxu2  ;;  %v1131_v45 = vpop.f32.mrf.mxu3 }
 0x36c   :  { %v1063_v50 = vadd.f32 %v5698_v12, %v1062_v44 }
 0x36e   :  { %v1128_v52 = vadd.f32 %v1127_v43, %v1063_v50 }
 0x36f   :  { %v1179_v7 = vpop.f32.mrf.mxu0 }
 0x370   :  { %v1170_v57 = vadd.f32 %v1169_v51, %v1128_v52 }
 0x371   :  { %v1223_v15 = vpop.f32.mrf.mxu1 }
 0x372   :  { %v1212_v61 = vadd.f32 %v1211_v54, %v1170_v57 }
 0x373   :  { %v1070_v46 = vpop.f32.mrf.mxu2  ;;  %v1135_v47 = vpop.f32.mrf.mxu3 }
 0x374   :  { %v1071_v56 = vadd.f32 %v5698_v12, %v1070_v46 }
 0x376   :  { %v1132_v60 = vadd.f32 %v1131_v45, %v1071_v56 }
 0x377   :  { %v1184_v23 = vpop.f32.mrf.mxu0 }
 0x378   :  { %v1175_v2 = vadd.f32 %v1174_v59, %v1132_v60 }
 0x379   :  { %v1229_v27 = vpop.f32.mrf.mxu1 }
 0x37a   :  { %v1218_v5 = vadd.f32 %v1217_v0, %v1175_v2 }
 0x37b   :  { %v1078_v48 = vpop.f32.mrf.mxu2  ;;  %v1139_v49 = vpop.f32.mrf.mxu3 }
 0x37c   :  { %v1079_v16 = vadd.f32 %v5698_v12, %v1078_v48 }
 0x37e   :  { %v1136_v22 = vadd.f32 %v1135_v47, %v1079_v16 }
 0x380   :  { %v1180_v26 = vadd.f32 %v1179_v7, %v1136_v22 }
 0x382   :  { %v1224_v32 = vadd.f32 %v1223_v15, %v1180_v26 }
 0x383   :  { %v1086_v55 = vpop.f32.mrf.mxu2  ;;  %v1299_v58 = vpop.f32.mrf.mxu3 }
 0x384   :  { %v1087_v13 = vadd.f32 %v5698_v12, %v1086_v55 }
 0x386   :  { %v1140_v18 = vadd.f32 %v1139_v49, %v1087_v13 }
 0x388   :  { %v1185_v25 = vadd.f32 %v1184_v23, %v1140_v18 }
 0x38a   :  { %v1230_v28 = vadd.f32 %v1229_v27, %v1185_v25 }
 0x38b   :  { %v1262_v62 = vpop.f32.mrf.mxu2  ;;  %v1303_v4 = vpop.f32.mrf.mxu3 }
 0x38c   :  { %v1263_v63 = vadd.f32 %v1262_v62, %v1212_v61 }
 0x38e   :  { %v6150_v1 = vadd.f32 %v1299_v58, %v1263_v63 }
 0x390   :  { %v1314_v3 = vmul.f32 %v6150_v1, %v6150_v1 }
 0x392   :  { %v1318_v6 = vsel %vm367_vm1, %v1314_v3, 0.0 }
 0x393   :  { %v1266_v9 = vpop.f32.mrf.mxu2  ;;  %1319 = vadd.xlane.f32.xlu1 %v1318_v6  ;;  %v1307_v20 = vpop.f32.mrf.mxu3 }
 0x394   :  { %v1267_v11 = vadd.f32 %v1266_v9, %v1218_v5 }
 0x396   :  { %v6155_v14 = vadd.f32 %v1303_v4, %v1267_v11 }
 0x398   :  { %v1315_v17 = vmul.f32 %v6155_v14, %v6155_v14 }
 0x39a   :  { %v1321_v19 = vsel %vm367_vm1, %v1315_v17, 0.0 }
 0x39b   :  { %v1270_v21 = vpop.f32.mrf.mxu2  ;;  %1322 = vadd.xlane.f32.xlu0 %v1321_v19  ;;  %v1311_v29 = vpop.f32.mrf.mxu3 }
 0x39c   :  { %v1271_v34 = vadd.f32 %v1270_v21, %v1224_v32 }
 0x39e   :  { %v6164_v37 = vadd.f32 %v1307_v20, %v1271_v34 }
 0x3a0   :  { %v1316_v38 = vmul.f32 %v6164_v37, %v6164_v37  ;;  %v6195_v32 = vand.u32 4294901760, %v6164_v37 }
 0x3a2   :  { %v1324_v39 = vsel %vm367_vm1, %v1316_v38, 0.0 }
 0x3a3   :  { %v1274_v30 = vpop.f32.mrf.mxu2 }
 0x3a4   :  { %v1275_v33 = vadd.f32 %v1274_v30, %v1230_v28 }
 0x3a6   :  { %v6160_v35 = vadd.f32 %v1311_v29, %v1275_v33 }
 0x3a8   :  { %v1317_v36 = vmul.f32 %v6160_v35, %v6160_v35  ;;  %v6179_v22 = vand.u32 4294901760, %v6160_v35 }
 0x3aa   :  { %v1327_v31 = vsel %vm367_vm1, %v1317_v36, 0.0  ;;  %v6200_v29 = vsub.f32 %v6160_v35, %v6179_v22  ;;  %v6205_v36 = vand.u32 4294901760, %v6155_v14 }
 0x3ab   :  { %1328 = vadd.xlane.f32.xlu2 %v1327_v31 }
 0x3b3   :  { %1325 = vadd.xlane.f32.xlu2 %v1324_v39 }
 0x406   :  { %v1320_v41 = vpop.xlane.xlu1 %1319 }
 0x407   :  { %v1330_v42 = vmax.f32 %v1320_v41, 1e-24 }
 0x409   :  { %5713 = vrsqrt.f32 %v1330_v42  ;;  %vm1340_vm2 = vweird.f32 %v1330_v42 }
 0x40e   :  { %v1323_v8 = vpop.xlane.xlu0 %1322 }
 0x40f   :  { %v1331_v43 = vmax.f32 %v1323_v8, 1e-24  ;;  %v5714_v44 = vpop.eup %5713  ;;  %v6215_v8 = vand.u32 4294901760, %v6150_v1 }
 0x410   :  { %v1335_v46 = vmul.f32 %v5714_v44, %v1330_v42  ;;  %vm1341_vm14 = vweird.f32 %v5714_v44 }
 0x411   :  { %5715 = vrsqrt.f32 %v1331_v43  ;;  %vm1342_vm3 = vmor %vm1340_vm2, %vm1341_vm14  ;;  %vm1350_vm4 = vweird.f32 %v1331_v43 }
 0x412   :  { %v1336_v48 = vmul.f32 %v5714_v44, %v1335_v46  ;;  %v6230_v46 = vsub.f32 %v6155_v14, %v6205_v36 }
 0x414   :  { %v1337_v51 = vmul.f32 0.5, %v1336_v48  ;;  %v1768_v48 = vsub.f32 %v6150_v1, %v6215_v8 }
 0x416   :  { %v1338_v56 = vsub.f32 1.5, %v1337_v51  ;;  %v1763_v51 = vand.u32 4294901760, %v6230_v46 }
 0x417   :  { %v5716_v45 = vpop.eup %5715 }
 0x418   :  { %v1345_v47 = vmul.f32 %v5716_v45, %v1331_v43  ;;  %v1339_v61 = vmul.f32 %v5714_v44, %v1338_v56  ;;  %vm1351_vm15 = vweird.f32 %v5716_v45  ;;  %v1769_v56 = vand.u32 4294901760, %v1768_v48 }
 0x419   :  { %vm1352_vm6 = vmor %vm1350_vm4, %vm1351_vm15 }
 0x41a   :  { %v1346_v50 = vmul.f32 %v5716_v45, %v1345_v47  ;;  %v1343_v3 = vsel %vm1342_vm3, %v5714_v44, %v1339_v61  ;;  %v1751_v44 = vand.u32 4294901760, %v6200_v29  ;;  %v1770_v61 = vsub.f32 %v1768_v48, %v1769_v56 }
 0x41b   :  { %v1374_v7 = vmul.f32 %v1343_v3, %v6150_v1 }
 0x41c   :  { %v1347_v52 = vmul.f32 0.5, %v1346_v50  ;;  %v1752_v50 = vsub.f32 %v6200_v29, %v1751_v44 }
 0x41d   :  { %v1379_v18 = vsel %vm367_vm1, %v1374_v7, 0 }
 0x41e   :  { %v1329_v12 = vpop.xlane.xlu2 %1328  ;;  %v1348_v58 = vsub.f32 1.5, %v1347_v52  ;;  %v6186_v26 = vand.u32 4294901760, %v1379_v18  ;;  %v1753_v1 = vand.u32 4294901760, %v1752_v50 }
 0x41f   :  { %v1333_v49 = vmax.f32 %v1329_v12, 1e-24 }
 0x420   :  { %v1349_v62 = vmul.f32 %v5716_v45, %v1348_v58  ;;  %v1411_v38 = vsub.f32 %v1379_v18, %v6186_v26  ;;  %v1764_v58 = vsub.f32 %v6230_v46, %v1763_v51 }
 0x421   :  { %5717 = vrsqrt.f32 %v1333_v49  ;;  %vm1370_vm7 = vweird.f32 %v1333_v49 }
 0x422   :  { %v1353_v4 = vsel %vm1352_vm6, %v5716_v45, %v1349_v62  ;;  %v1412_v45 = vand.u32 4294901760, %v1411_v38  ;;  %v1765_v62 = vand.u32 4294901760, %v1764_v58 }
 0x423   :  { %v1375_v13 = vmul.f32 %v1353_v4, %v6155_v14 }
 0x424   :  { %v1413_v14 = vsub.f32 %v1411_v38, %v1412_v45 }
 0x425   :  { %v1382_v21 = vsel %vm367_vm1, %v1375_v13, 0 }
 0x426   :  { %v1326_v54 = vpop.xlane.xlu2 %1325  ;;  %v6188_v27 = vand.u32 4294901760, %v1382_v21 }
 0x427   :  { %v5718_v55 = vpop.eup %5717  ;;  %v1332_v57 = vmax.f32 %v1326_v54, 1e-24 }
 0x428   :  { %v1365_v59 = vmul.f32 %v5718_v55, %v1333_v49  ;;  %vm1371_vm5 = vweird.f32 %v5718_v55  ;;  %v1419_v42 = vsub.f32 %v1382_v21, %v6188_v27 }
 0x429   :  { %5719 = vrsqrt.f32 %v1332_v57  ;;  %vm1372_vm8 = vmor %vm1370_vm7, %vm1371_vm5  ;;  %vm1360_vm10 = vweird.f32 %v1332_v57 }
 0x42a   :  { %v1366_v60 = vmul.f32 %v5718_v55, %v1365_v59  ;;  %v1420_v47 = vand.u32 4294901760, %v1419_v42 }
 0x42c   :  { %v1367_v63 = vmul.f32 0.5, %v1366_v60  ;;  %v1421_v54 = vsub.f32 %v1419_v42, %v1420_v47 }
 0x42e   :  { %v1368_v0 = vsub.f32 1.5, %v1367_v63  ;;  %v1422_v59 = vand.u32 4294901760, %v1421_v54  ;;  %v1771_v63 = vand.u32 4294901760, %v1770_v61 }
 0x42f   :  { %v5720_v2 = vpop.eup %5719 }
 0x430   :  { %v1369_v5 = vmul.f32 %v5718_v55, %v1368_v0  ;;  %v1355_v6 = vmul.f32 %v5720_v2, %v1332_v57  ;;  %vm1361_vm9 = vweird.f32 %v5720_v2  ;;  %v1414_v57 = vand.u32 4294901760, %v1413_v14 }
 0x431   :  { %vm1362_vm11 = vmor %vm1360_vm10, %vm1361_vm9 }
 0x432   :  { %v1373_v9 = vsel %vm1372_vm8, %v5718_v55, %v1369_v5  ;;  %v1356_v11 = vmul.f32 %v5720_v2, %v1355_v6 }
 0x433   :  { %v1377_v15 = vmul.f32 %v1373_v9, %v6160_v35  ;;  %v6219_v35 = vsub.f32 %v6164_v37, %v6195_v32 }
 0x434   :  { %v1357_v16 = vmul.f32 0.5, %v1356_v11 }
 0x435   :  { %v1388_v17 = vsel %vm367_vm1, %v1377_v15, 0  ;;  %v1757_v12 = vand.u32 4294901760, %v6219_v35 }
 0x436   :  { %v6175_v19 = vand.u32 4294901760, %v1388_v17  ;;  %v1358_v20 = vsub.f32 1.5, %v1357_v16 }
 0x437   :  { %v1758_v55 = vsub.f32 %v6219_v35, %v1757_v12 }
 0x438   :  { %v1359_v23 = vmul.f32 %v5720_v2, %v1358_v20  ;;  %1403 = vmatpush.xpose.msra.mxu0 %v6175_v19  ;;  %1554 = vmatpush.xpose.msra.mxu3 %v6175_v19  ;;  %v6184_v25 = vsub.f32 %v1388_v17, %v6175_v19 }
 0x439   :  { %v1759_v60 = vand.u32 4294901760, %v1758_v55  ;;  %v1966_v55 = vld [vmem:[%s7465_s7] sm:$0xff] }
 0x43a   :  { %v1363_v28 = vsel %vm1362_vm11, %v5720_v2, %v1359_v23  ;;  %1510 = vmatpush.xpose.msra.mxu2 %v6184_v25  ;;  %v6192_v30 = vand.u32 4294901760, %v6184_v25 }
 0x43b   :  { %v1376_v33 = vmul.f32 %v1363_v28, %v6164_v37 }
 0x43c   :  { %v1437_v34 = vsub.f32 %v6184_v25, %v6192_v30 }
 0x43d   :  { %v1385_v31 = vsel %vm367_vm1, %v1376_v33, 0 }
 0x43e   :  { %v6209_v39 = vand.u32 4294901760, %v1385_v31  ;;  %v6211_v41 = vand.u32 4294901760, %v1437_v34 }
 0x440   :  { %1405 = vmatpush.xpose.msra.mxu0 %v6209_v39  ;;  %1460 = vmatpush.xpose.msra.mxu1 %v6211_v41  ;;  %v6224_v43 = vsub.f32 %v1385_v31, %v6209_v39 }
 0x441   :  { %1556 = vmatpush.xpose.msra.mxu3 %v6209_v39 }
 0x442   :  { %1513 = vmatpush.xpose.msra.mxu2 %v6224_v43  ;;  %v6234_v37 = vand.u32 4294901760, %v6224_v43 }
 0x444   :  { %1407 = vmatpush.xpose.msra.mxu0 %v6188_v27  ;;  %v1429_v49 = vsub.f32 %v6224_v43, %v6234_v37 }
 0x445   :  { %1558 = vmatpush.xpose.msra.mxu3 %v6188_v27 }
 0x446   :  { %1516 = vmatpush.xpose.msra.mxu2 %v1419_v42  ;;  %v1430_v52 = vand.u32 4294901760, %v1429_v49 }
 0x448   :  { %1409 = vmatpush.xpose.msra.mxu0 %v6186_v26  ;;  %1466 = vmatpush.xpose.msra.mxu1 %v1430_v52 }
 0x449   :  { %1560 = vmatpush.xpose.msra.mxu3 %v6186_v26 }
 0x44a   :  { %1519 = vmatpush.xpose.msra.mxu2 %v1411_v38 }
 0x44b   :  { %1415 = vmatmul.f32.vlgmr.msra.gmra.mxu0 %v1414_v57 }
 0x44c   :  { %1601 = vmatpush.xpose.msrb.mxu0 %v6192_v30  ;;  %1564 = vmatmul.f32.vlgmr.msra.gmra.mxu3 %v1412_v45 }
 0x44d   :  { %1754 = vmatpush.msrb.mxu3 %v1753_v1  ;;  %1472 = vmatpush.xpose.msra.mxu1 %v1422_v59 }
 0x44e   :  { %1697 = vmatpush.msrb.mxu2 %v6179_v22 }
 0x44f   :  { %1760 = vmatpush.msrb.mxu3 %v1759_v60  ;;  %1522 = vmatmul.f32.vlgmr.msra.gmra.mxu2 %v1411_v38 }
 0x450   :  { %1605 = vmatpush.xpose.msrb.mxu0 %v6234_v37  ;;  %1699 = vmatpush.msrb.mxu2 %v6195_v32 }
 0x451   :  { %1766 = vmatpush.msrb.mxu3 %v1765_v62  ;;  %1478 = vmatpush.xpose.msra.mxu1 %v1414_v57 }
 0x452   :  { %1701 = vmatpush.msrb.mxu2 %v6205_v36 }
 0x453   :  { %1772 = vmatpush.msrb.mxu3 %v1771_v63  ;;  %1423 = vmatmul.f32.gmra.mxu0 %v1422_v59  ;;  %v2000_v59 = vand.u32 4294901760, %v1966_v55 }
 0x454   :  { %1609 = vmatpush.xpose.msrb.mxu0 %v1420_v47  ;;  %1703 = vmatpush.msrb.mxu2 %v6215_v8 }
 0x455   :  { %1644 = vmatpush.xpose.msrb.mxu1 %v6175_v19  ;;  %1938 = vmatpush.msra.mxu3 %v6179_v22  ;;  %v2056_v63 = vsub.f32 %v1966_v55, %v2000_v59 }
 0x456   :  { %1895 = vmatpush.msra.mxu2 %v1751_v44  ;;  %1480 = vmatmul.f32.vlgmr.msra.gmra.mxu1 %v6186_v26 }
 0x457   :  { %1940 = vmatpush.msra.mxu3 %v6195_v32  ;;  %1527 = vmatmul.f32.gmra.mxu2 %v1419_v42 }
 0x458   :  { %1570 = vmatmul.f32.gmra.mxu3 %v1420_v47  ;;  %1899 = vmatpush.msra.mxu2 %v1757_v12 }
 0x459   :  { %1942 = vmatpush.msra.mxu3 %v6205_v36  ;;  %1613 = vmatpush.xpose.msrb.mxu0 %v1412_v45 }
 0x45a   :  { %1646 = vmatpush.xpose.msrb.mxu1 %v6209_v39  ;;  %1903 = vmatpush.msra.mxu2 %v1763_v51 }
 0x45b   :  { %1944 = vmatpush.msra.mxu3 %v6215_v8  ;;  %1431 = vmatmul.f32.gmra.mxu0 %v1430_v52 }
 0x45c   :  { %1907 = vmatpush.msra.mxu2 %v1769_v56  ;;  %v1962_v56 = vld [vmem:[%s7466_s15] sm:$0xff] }
 0x45d   :  { %1804 = vmatpush.msra.mxu0 %v6200_v29  ;;  %v1973_v62 = vsel %vm98_vm0, %v1962_v56, 0 }
 0x45e   :  { %1648 = vmatpush.xpose.msrb.mxu1 %v6188_v27 }
 0x45f   :  { %1807 = vmatpush.msra.mxu0 %v6219_v35  ;;  %1484 = vmatmul.f32.gmra.mxu1 %v6188_v27 }
 0x460   :  { %1576 = vmatmul.f32.gmra.mxu3 %v6234_v37  ;;  %1532 = vmatmul.f32.gmra.mxu2 %v6224_v43 }
 0x461   :  { %1810 = vmatpush.msra.mxu0 %v6230_v46 }
 0x462   :  { %1650 = vmatpush.xpose.msrb.mxu1 %v6186_v26 }
 0x463   :  { %1813 = vmatpush.msra.mxu0 %v1768_v48 }
 0x464   :  { %1439 = vmatmul.f32.gmra.mxu0 %v6211_v41 }
 0x466   :  { %1848 = vmatpush.msra.mxu1 %v6179_v22 }
 0x467   :  { %1488 = vmatmul.f32.gmra.mxu1 %v6209_v39 }
 0x468   :  { %1850 = vmatpush.msra.mxu1 %v6195_v32  ;;  %1582 = vmatmul.f32.gmra.mxu3 %v6192_v30 }
 0x469   :  { %1537 = vmatmul.f32.gmra.mxu2 %v6184_v25 }
 0x46a   :  { %1852 = vmatpush.msra.mxu1 %v6205_v36 }
 0x46c   :  { %1854 = vmatpush.msra.mxu1 %v6215_v8  ;;  %1615 = vmatmul.f32.vlgmr.msrb.gmra.mxu0 %v6186_v26 }
 0x46f   :  { %1492 = vmatmul.f32.gmra.mxu1 %v6175_v19 }
 0x474   :  { %1619 = vmatmul.f32.gmra.mxu0 %v6188_v27 }
 0x477   :  { %1652 = vmatmul.f32.vlgmr.msrb.gmra.mxu1 %v6186_v26 }
 0x47c   :  { %1623 = vmatmul.f32.gmra.mxu0 %v6209_v39 }
 0x47f   :  { %1656 = vmatmul.f32.gmra.mxu1 %v6188_v27 }
 0x484   :  { %1627 = vmatmul.f32.gmra.mxu0 %v6175_v19 }
 0x487   :  { %1660 = vmatmul.f32.gmra.mxu1 %v6209_v39  ;;  %v1967_v39 = vld [vmem:[%s7465_s7 + $0x8] sm:$0xff] }
 0x48f   :  { %1664 = vmatmul.f32.gmra.mxu1 %v6175_v19 }
 0x4c8   :  { %v1416_v0 = vpop.f32.mrf.mxu0 }
 0x4cf   :  { %v1565_v11 = vpop.f32.mrf.mxu3 }
 0x4d0   :  { %v1424_v2 = vpop.f32.mrf.mxu0 }
 0x4d2   :  { %v1523_v9 = vpop.f32.mrf.mxu2 }
 0x4d3   :  { %v1481_v3 = vpop.f32.mrf.mxu1 }
 0x4d4   :  { %v1482_v13 = vadd.f32 %v1481_v3, %v1416_v0 }
 0x4d6   :  { %v1524_v17 = vadd.f32 %v1523_v9, %v1482_v13 }
 0x4d8   :  { %v1432_v4 = vpop.f32.mrf.mxu0  ;;  %v1566_v21 = vadd.f32 %v1565_v11, %v1524_v17  ;;  %v1963_v17 = vld [vmem:[%s7466_s15 + $0x8] sm:$0xff] }
 0x4da   :  { %v1528_v18 = vpop.f32.mrf.mxu2 }
 0x4db   :  { %v1571_v22 = vpop.f32.mrf.mxu3 }
 0x4dc   :  { %v1485_v5 = vpop.f32.mrf.mxu1 }
 0x4dd   :  { %v1486_v20 = vadd.f32 %v1485_v5, %v1424_v2 }
 0x4df   :  { %v1529_v26 = vadd.f32 %v1528_v18, %v1486_v20 }
 0x4e1   :  { %v1440_v6 = vpop.f32.mrf.mxu0  ;;  %v1572_v32 = vadd.f32 %v1571_v22, %v1529_v26 }
 0x4e3   :  { %v1533_v29 = vpop.f32.mrf.mxu2  ;;  %v1577_v8 = vpop.f32.mrf.mxu3 }
 0x4e4   :  { %v1489_v7 = vpop.f32.mrf.mxu1 }
 0x4e5   :  { %v1490_v30 = vadd.f32 %v1489_v7, %v1432_v4 }
 0x4e7   :  { %v1534_v41 = vadd.f32 %v1533_v29, %v1490_v30 }
 0x4e9   :  { %v1616_v15 = vpop.f32.mrf.mxu0  ;;  %v1578_v47 = vadd.f32 %v1577_v8, %v1534_v41 }
 0x4ea   :  { %v1617_v23 = vadd.f32 %v1616_v15, %v1566_v21 }
 0x4eb   :  { %v1583_v0 = vpop.f32.mrf.mxu3 }
 0x4ec   :  { %v1493_v16 = vpop.f32.mrf.mxu1  ;;  %v1538_v52 = vpop.f32.mrf.mxu2 }
 0x4ed   :  { %v1494_v37 = vadd.f32 %v1493_v16, %v1440_v6  ;;  %v2057_v6 = vand.u32 4294901760, %v2056_v63 }
 0x4ef   :  { %v1539_v1 = vadd.f32 %v1538_v52, %v1494_v37  ;;  %v2058_v13 = vsub.f32 %v2056_v63, %v2057_v6 }
 0x4f1   :  { %v1620_v25 = vpop.f32.mrf.mxu0  ;;  %v1584_v4 = vadd.f32 %v1583_v0, %v1539_v1  ;;  %v2059_v20 = vand.u32 4294901760, %v2058_v13 }
 0x4f2   :  { %v1621_v36 = vadd.f32 %v1620_v25, %v1572_v32  ;;  %v1976_v25 = vsel %vm98_vm0, %v1963_v17, 0 }
 0x4f3   :  { %v2010_v32 = vand.u32 4294901760, %v1976_v25 }
 0x4f4   :  { %v1653_v19 = vpop.f32.mrf.mxu1 }
 0x4f5   :  { %v1654_v27 = vadd.f32 %v1653_v19, %v1617_v23 }
 0x4f7   :  { %v1668_v28 = vmul.f32 %v1654_v27, %v6100_v10  ;;  %v6296_v10 = vand.u32 4294901760, %v1967_v39 }
 0x4f9   :  { %v1673_v33 = vsel %vm367_vm1, %v1668_v28, 0  ;;  %v1624_v43 = vpop.f32.mrf.mxu0  ;;  %1999 = vmatpush.msrb.mxu0 %v6296_v10  ;;  %v2050_v45 = vsub.f32 %v1967_v39, %v6296_v10 }
 0x4fa   :  { %v6289_v34 = vand.u32 4294901760, %v1673_v33  ;;  %v1625_v14 = vadd.f32 %v1624_v43, %v1578_v47 }
 0x4fb   :  { %v2051_v48 = vand.u32 4294901760, %v2050_v45  ;;  %2001 = vmatpush.msrb.mxu0 %v2000_v59 }
 0x4fc   :  { %v1705_v31 = vsub.f32 %v1673_v33, %v6289_v34  ;;  %v1657_v38 = vpop.f32.mrf.mxu1  ;;  %1774 = vmatmul.f32.vlgmr.msrb.gmra.mxu3 %v6289_v34 }
 0x4fd   :  { %v1658_v42 = vadd.f32 %v1657_v38, %v1621_v36  ;;  %2134 = vmatpush.msrb.mxu3 %v6296_v10  ;;  %v2052_v51 = vsub.f32 %v2050_v45, %v2051_v48 }
 0x4fe   :  { %v1706_v35 = vand.u32 4294901760, %v1705_v31  ;;  %1816 = vmatmul.f32.vlgmr.msra.gmra.mxu0 %v1705_v31 }
 0x4ff   :  { %v1669_v44 = vmul.f32 %v1658_v42, %v6110_v24  ;;  %v2053_v58 = vand.u32 4294901760, %v2052_v51  ;;  %2179 = vmatpush.msra.mxu0 %v2051_v48  ;;  %2136 = vmatpush.msrb.mxu3 %v2000_v59 }
 0x500   :  { %v1707_v46 = vsub.f32 %v1705_v31, %v1706_v35  ;;  %1858 = vmatmul.f32.vlgmr.msra.gmra.mxu1 %v1706_v35  ;;  %v2011_v31 = vsub.f32 %v1976_v25, %v2010_v32  ;;  %v1965_v35 = vld [vmem:[%s7466_s15 + $0x18] sm:$0xff] }
 0x501   :  { %v1676_v12 = vsel %vm367_vm1, %v1669_v44, 0  ;;  %2054 = vmatpush.msrb.mxu1 %v2053_v58  ;;  %v1628_v2 = vpop.f32.mrf.mxu0  ;;  %2183 = vmatpush.msra.mxu0 %v2057_v6 }
 0x502   :  { %v1708_v49 = vand.u32 4294901760, %v1707_v46  ;;  %v6303_v50 = vand.u32 4294901760, %v1676_v12  ;;  %v1629_v11 = vadd.f32 %v1628_v2, %v1584_v4 }
 0x503   :  { %2060 = vmatpush.msrb.mxu1 %v2059_v20 }
 0x504   :  { %v1661_v24 = vpop.f32.mrf.mxu1  ;;  %1709 = vmatmul.f32.vlgmr.msrb.gmra.mxu2 %v1708_v49  ;;  %1778 = vmatmul.f32.gmra.mxu3 %v6303_v50  ;;  %v1713_v54 = vsub.f32 %v1676_v12, %v6303_v50 }
 0x505   :  { %v1662_v57 = vadd.f32 %v1661_v24, %v1625_v14  ;;  %2094 = vmatpush.msrb.mxu2 %v2050_v45  ;;  %2216 = vmatpush.msra.mxu1 %v6296_v10  ;;  %v2012_v10 = vand.u32 4294901760, %v2011_v31  ;;  %v1982_v45 = vsel %vm98_vm0, %v1965_v35, 0 }
 0x506   :  { %1821 = vmatmul.f32.gmra.mxu0 %v1713_v54  ;;  %v1714_v60 = vand.u32 4294901760, %v1713_v54  ;;  %v2026_v47 = vand.u32 4294901760, %v1982_v45 }
 0x507   :  { %v1670_v61 = vmul.f32 %v1662_v57, %v6118_v40  ;;  %2097 = vmatpush.msrb.mxu2 %v2056_v63  ;;  %v6318_v40 = vand.u32 4294901760, %v1973_v62  ;;  %2218 = vmatpush.msra.mxu1 %v2000_v59  ;;  %v2013_v43 = vsub.f32 %v2011_v31, %v2012_v10 }
 0x508   :  { %1864 = vmatmul.f32.gmra.mxu1 %v1714_v60  ;;  %v1715_v3 = vsub.f32 %v1713_v54, %v1714_v60  ;;  %v2027_v48 = vsub.f32 %v1982_v45, %v2026_v47 }
 0x509   :  { %v1679_v5 = vsel %vm367_vm1, %v1670_v61, 0  ;;  %v2003_v22 = vsub.f32 %v1973_v62, %v6318_v40  ;;  %v2014_v46 = vand.u32 4294901760, %v2013_v43 }
 0x50a   :  { %v6316_v7 = vand.u32 4294901760, %v1679_v5  ;;  %v1716_v9 = vand.u32 4294901760, %v1715_v3  ;;  %v2028_v14 = vand.u32 4294901760, %v2027_v48 }
 0x50b   :  { %v2004_v30 = vand.u32 4294901760, %v2003_v22 }
 0x50c   :  { %v1665_v15 = vpop.f32.mrf.mxu1  ;;  %1717 = vmatmul.f32.gmra.mxu2 %v1716_v9  ;;  %1782 = vmatmul.f32.gmra.mxu3 %v6316_v7  ;;  %v1721_v16 = vsub.f32 %v1679_v5, %v6316_v7  ;;  %v2029_v51 = vsub.f32 %v2027_v48, %v2028_v14 }
 0x50d   :  { %v1666_v18 = vadd.f32 %v1665_v15, %v1629_v11  ;;  %v2005_v36 = vsub.f32 %v2003_v22, %v2004_v30 }
 0x50e   :  { %1826 = vmatmul.f32.gmra.mxu0 %v1721_v16  ;;  %v1722_v21 = vand.u32 4294901760, %v1721_v16  ;;  %v2030_v52 = vand.u32 4294901760, %v2029_v51 }
 0x50f   :  { %v1671_v23 = vmul.f32 %v1666_v18, %v6125_v53  ;;  %v1964_v53 = vld [vmem:[%s7466_s15 + $0x10] sm:$0xff]  ;;  %v2006_v42 = vand.u32 4294901760, %v2005_v36  ;;  %s5661_s15 = sshll.u32 %s5802_s10, 4  ;;  %s5662_s15 = int_to_ptr.vmem [resolvable:$true] %s5661_s15 }
 0x510   :  { %1870 = vmatmul.f32.gmra.mxu1 %v1722_v21  ;;  %v1723_v19 = vsub.f32 %v1721_v16, %v1722_v21  ;;  %v1979_v38 = vsel %vm98_vm0, %v1964_v53, 0 }
 0x511   :  { %v1682_v26 = vsel %vm367_vm1, %v1671_v23, 0  ;;  %v2018_v8 = vand.u32 4294901760, %v1979_v38 }
 0x512   :  { %v1728_v27 = vand.u32 4294901760, %v1682_v26  ;;  %v1724_v28 = vand.u32 4294901760, %v1723_v19 }
 0x513   :  { %v2019_v44 = vsub.f32 %v1979_v38, %v2018_v8 }
 0x514   :  { %1725 = vmatmul.f32.gmra.mxu2 %v1724_v28  ;;  %1786 = vmatmul.f32.gmra.mxu3 %v1728_v27  ;;  %v1729_v33 = vsub.f32 %v1682_v26, %v1728_v27 }
 0x515   :  { %v2020_v37 = vand.u32 4294901760, %v2019_v44 }
 0x516   :  { %1831 = vmatmul.f32.gmra.mxu0 %v1729_v33  ;;  %v1730_v29 = vand.u32 4294901760, %v1729_v33 }
 0x517   :  { %v2021_v12 = vsub.f32 %v2019_v44, %v2020_v37 }
 0x518   :  { %1876 = vmatmul.f32.gmra.mxu1 %v1730_v29  ;;  %v1731_v39 = vsub.f32 %v1729_v33, %v1730_v29 }
 0x519   :  { %v2022_v49 = vand.u32 4294901760, %v2021_v12 }
 0x51a   :  { %v1732_v41 = vand.u32 4294901760, %v1731_v39 }
 0x51c   :  { %1733 = vmatmul.f32.gmra.mxu2 %v1732_v41  ;;  %1946 = vmatmul.f32.vlgmr.msra.gmra.mxu3 %v6289_v34 }
 0x51e   :  { %2007 = vmatmul.f32.vlgmr.msrb.gmra.mxu0 %v2006_v42 }
 0x520   :  { %2062 = vmatmul.f32.vlgmr.msrb.gmra.mxu1 %v6318_v40 }
 0x524   :  { %1909 = vmatmul.f32.vlgmr.msra.gmra.mxu2 %v6289_v34  ;;  %1950 = vmatmul.f32.gmra.mxu3 %v6303_v50 }
 0x526   :  { %2015 = vmatmul.f32.gmra.mxu0 %v2014_v46 }
 0x528   :  { %2066 = vmatmul.f32.gmra.mxu1 %v2010_v32 }
 0x52c   :  { %1913 = vmatmul.f32.gmra.mxu2 %v6303_v50  ;;  %1954 = vmatmul.f32.gmra.mxu3 %v6316_v7 }
 0x52e   :  { %2023 = vmatmul.f32.gmra.mxu0 %v2022_v49 }
 0x530   :  { %2070 = vmatmul.f32.gmra.mxu1 %v2018_v8 }
 0x534   :  { %1917 = vmatmul.f32.gmra.mxu2 %v6316_v7  ;;  %1958 = vmatmul.f32.gmra.mxu3 %v1728_v27 }
 0x536   :  { %2031 = vmatmul.f32.gmra.mxu0 %v2030_v52 }
 0x538   :  { %2074 = vmatmul.f32.gmra.mxu1 %v2026_v47 }
 0x53c   :  { %1921 = vmatmul.f32.gmra.mxu2 %v1728_v27  ;;  %2140 = vmatmul.f32.vlgmr.msrb.gmra.mxu3 %v2004_v30  ;;  %v5699_v27 = vld [vmem:[%s7467_s6] ss:$0 sm:$0xff] }
 0x53e   :  { %2185 = vmatmul.f32.vlgmr.msra.gmra.mxu0 %v6318_v40 }
 0x540   :  { %2220 = vmatmul.f32.vlgmr.msra.gmra.mxu1 %v6318_v40 }
 0x544   :  { %2100 = vmatmul.f32.vlgmr.msrb.gmra.mxu2 %v2003_v22  ;;  %2146 = vmatmul.f32.gmra.mxu3 %v2012_v10 }
 0x546   :  { %2189 = vmatmul.f32.gmra.mxu0 %v2010_v32 }
 0x548   :  { %2224 = vmatmul.f32.gmra.mxu1 %v2010_v32 }
 0x54c   :  { %2105 = vmatmul.f32.gmra.mxu2 %v2011_v31  ;;  %2152 = vmatmul.f32.gmra.mxu3 %v2020_v37 }
 0x54e   :  { %2193 = vmatmul.f32.gmra.mxu0 %v2018_v8 }
 0x550   :  { %2228 = vmatmul.f32.gmra.mxu1 %v2018_v8 }
 0x554   :  { %2110 = vmatmul.f32.gmra.mxu2 %v2019_v44  ;;  %2158 = vmatmul.f32.gmra.mxu3 %v2028_v14 }
 0x556   :  { %2197 = vmatmul.f32.gmra.mxu0 %v2026_v47 }
 0x558   :  { %2232 = vmatmul.f32.gmra.mxu1 %v2026_v47 }
 0x55c   :  { %2115 = vmatmul.f32.gmra.mxu2 %v2027_v48 }
 0x57b   :  { %v6347_v34 = vpop.f32.mrf.mxu0 }
 0x57d   :  { %v6349_v50 = vpop.f32.mrf.mxu1 }
 0x57f   :  { %v6351_v24 = vpop.f32.mrf.mxu3 }
 0x583   :  { %v6353_v54 = vpop.f32.mrf.mxu0 }
 0x585   :  { %v6355_v55 = vpop.f32.mrf.mxu1 }
 0x587   :  { %v6357_v56 = vpop.f32.mrf.mxu2  ;;  %v6359_v1 = vpop.f32.mrf.mxu3 }
 0x58b   :  { %v6361_v57 = vpop.f32.mrf.mxu0 }
 0x58d   :  { %v6363_v58 = vpop.f32.mrf.mxu1 }
 0x58f   :  { %v6365_v59 = vpop.f32.mrf.mxu2  ;;  %v6367_v60 = vpop.f32.mrf.mxu3 }
 0x593   :  { %v6369_v61 = vpop.f32.mrf.mxu0 }
 0x595   :  { %v6371_v62 = vpop.f32.mrf.mxu1 }
 0x597   :  { %v6373_v63 = vpop.f32.mrf.mxu2  ;;  %v6375_v0 = vpop.f32.mrf.mxu3 }
 0x59b   :  { %v2008_v2 = vpop.f32.mrf.mxu0 }
 0x59c   :  { %v2009_v43 = vadd.f32 %v5699_v27, %v2008_v2 }
 0x59d   :  { %v2063_v3 = vpop.f32.mrf.mxu1 }
 0x59e   :  { %v2064_v48 = vadd.f32 %v2063_v3, %v2009_v43 }
 0x59f   :  { %v6377_v4 = vpop.f32.mrf.mxu2  ;;  %v6379_v5 = vpop.f32.mrf.mxu3 }
 0x5a3   :  { %v2016_v6 = vpop.f32.mrf.mxu0 }
 0x5a4   :  { %v2017_v28 = vadd.f32 %v5699_v27, %v2016_v6 }
 0x5a5   :  { %v2067_v7 = vpop.f32.mrf.mxu1 }
 0x5a6   :  { %v2068_v33 = vadd.f32 %v2067_v7, %v2017_v28 }
 0x5a7   :  { %v6381_v9 = vpop.f32.mrf.mxu2  ;;  %v6383_v40 = vpop.f32.mrf.mxu3 }
 0x5ab   :  { %v2024_v11 = vpop.f32.mrf.mxu0 }
 0x5ac   :  { %v2025_v31 = vadd.f32 %v5699_v27, %v2024_v11 }
 0x5ad   :  { %v2071_v16 = vpop.f32.mrf.mxu1 }
 0x5ae   :  { %v2072_v42 = vadd.f32 %v2071_v16, %v2025_v31 }
 0x5af   :  { %v6385_v13 = vpop.f32.mrf.mxu2  ;;  %v6387_v15 = vpop.f32.mrf.mxu3 }
 0x5b3   :  { %v2032_v20 = vpop.f32.mrf.mxu0 }
 0x5b4   :  { %v2033_v37 = vadd.f32 %v5699_v27, %v2032_v20 }
 0x5b5   :  { %v2075_v21 = vpop.f32.mrf.mxu1 }
 0x5b6   :  { %v2076_v14 = vadd.f32 %v2075_v21, %v2033_v37 }
 0x5b7   :  { %v6389_v17 = vpop.f32.mrf.mxu2  ;;  %v6391_v18 = vpop.f32.mrf.mxu3 }
 0x5bb   :  { %v2186_v25 = vpop.f32.mrf.mxu0 }
 0x5bd   :  { %v2221_v19 = vpop.f32.mrf.mxu1 }
 0x5bf   :  { %v6393_v22 = vpop.f32.mrf.mxu2  ;;  %v2141_v23 = vpop.f32.mrf.mxu3 }
 0x5c3   :  { %v2190_v32 = vpop.f32.mrf.mxu0 }
 0x5c5   :  { %v2225_v29 = vpop.f32.mrf.mxu1 }
 0x5c7   :  { %v2101_v26 = vpop.f32.mrf.mxu2  ;;  %v2147_v30 = vpop.f32.mrf.mxu3 }
 0x5c8   :  { %v2102_v51 = vadd.f32 %v2101_v26, %v2064_v48 }
 0x5ca   :  { %v2142_v28 = vadd.f32 %v2141_v23, %v2102_v51 }
 0x5cb   :  { %v2194_v35 = vpop.f32.mrf.mxu0 }
 0x5cc   :  { %v2187_v3 = vadd.f32 %v2186_v25, %v2142_v28 }
 0x5cd   :  { %v2229_v46 = vpop.f32.mrf.mxu1 }
 0x5ce   :  { %v6412_v26 = vadd.f32 %v2221_v19, %v2187_v3 }
 0x5cf   :  { %v2106_v53 = vpop.f32.mrf.mxu2  ;;  %v2153_v41 = vpop.f32.mrf.mxu3 }
 0x5d0   :  { %v2107_v36 = vadd.f32 %v2106_v53, %v2068_v33  ;;  %v2236_v23 = vmul.f32 %v6412_v26, %v6412_v26 }
 0x5d2   :  { %v2148_v38 = vadd.f32 %v2147_v30, %v2107_v36 }
 0x5d3   :  { %v2198_v16 = vpop.f32.mrf.mxu0 }
 0x5d4   :  { %v2191_v39 = vadd.f32 %v2190_v32, %v2148_v38 }
 0x5d5   :  { %v2233_v27 = vpop.f32.mrf.mxu1 }
 0x5d6   :  { %v6398_v10 = vadd.f32 %v2225_v29, %v2191_v39  ;;  %v2240_v29 = vsel %vm367_vm1, %v2236_v23, 0.0 }
 0x5d7   :  { %v2111_v8 = vpop.f32.mrf.mxu2  ;;  %v2159_v7 = vpop.f32.mrf.mxu3 }
 0x5d8   :  { %v2112_v44 = vadd.f32 %v2111_v8, %v2072_v42  ;;  %v2237_v45 = vmul.f32 %v6398_v10, %v6398_v10 }
 0x5da   :  { %v2154_v47 = vadd.f32 %v2153_v41, %v2112_v44  ;;  %v2243_v12 = vsel %vm367_vm1, %v2237_v45, 0.0 }
 0x5db   :  { %2244 = vadd.xlane.f32.xlu1 %v2243_v12 }
 0x5dc   :  { %v2195_v49 = vadd.f32 %v2194_v35, %v2154_v47 }
 0x5de   :  { %v6403_v52 = vadd.f32 %v2229_v46, %v2195_v49 }
 0x5df   :  { %v2116_v6 = vpop.f32.mrf.mxu2 }
 0x5e0   :  { %v2117_v11 = vadd.f32 %v2116_v6, %v2076_v14  ;;  %v2238_v2 = vmul.f32 %v6403_v52, %v6403_v52 }
 0x5e2   :  { %v2160_v30 = vadd.f32 %v2159_v7, %v2117_v11  ;;  %v2246_v20 = vsel %vm367_vm1, %v2238_v2, 0.0 }
 0x5e3   :  { %2247 = vadd.xlane.f32.xlu0 %v2246_v20 }
 0x5e4   :  { %v2199_v32 = vadd.f32 %v2198_v16, %v2160_v30 }
 0x5e6   :  { %v6408_v33 = vadd.f32 %v2233_v27, %v2199_v32 }
 0x5e8   :  { %v2239_v21 = vmul.f32 %v6408_v33, %v6408_v33 }
 0x5ea   :  { %v2249_v53 = vsel %vm367_vm1, %v2239_v21, 0.0 }
 0x5eb   :  { %2250 = vadd.xlane.f32.xlu2 %v2249_v53 }
 0x5f3   :  { %2241 = vadd.xlane.f32.xlu2 %v2240_v29 }
 0x64e   :  { %v2245_v36 = vpop.xlane.xlu1 %2244 }
 0x64f   :  { %v2253_v31 = vmax.f32 %v2245_v36, 1e-24 }
 0x651   :  { %5721 = vrsqrt.f32 %v2253_v31  ;;  %vm2272_vm2 = vweird.f32 %v2253_v31 }
 0x656   :  { %v2248_v25 = vpop.xlane.xlu0 %2247 }
 0x657   :  { %v5722_v38 = vpop.eup %5721  ;;  %v2254_v39 = vmax.f32 %v2248_v25, 1e-24 }
 0x658   :  { %v2267_v41 = vmul.f32 %v5722_v38, %v2253_v31  ;;  %vm2273_vm14 = vweird.f32 %v5722_v38  ;;  %v6425_v31 = vand.u32 4294901760, %v6408_v33 }
 0x659   :  { %5723 = vrsqrt.f32 %v2254_v39  ;;  %vm2282_vm13 = vweird.f32 %v2254_v39  ;;  %vm2274_vm3 = vmor %vm2272_vm2, %vm2273_vm14 }
 0x65a   :  { %v2268_v42 = vmul.f32 %v5722_v38, %v2267_v41 }
 0x65c   :  { %v2269_v44 = vmul.f32 0.5, %v2268_v42 }
 0x65e   :  { %v2251_v19 = vpop.xlane.xlu2 %2250  ;;  %v2270_v37 = vsub.f32 1.5, %v2269_v44 }
 0x65f   :  { %v5724_v8 = vpop.eup %5723  ;;  %v2255_v35 = vmax.f32 %v2251_v19, 1e-24 }
 0x660   :  { %v2277_v43 = vmul.f32 %v5724_v8, %v2254_v39  ;;  %vm2283_vm12 = vweird.f32 %v5724_v8  ;;  %v2271_v6 = vmul.f32 %v5722_v38, %v2270_v37 }
 0x661   :  { %5725 = vrsqrt.f32 %v2255_v35  ;;  %vm2284_vm15 = vmor %vm2282_vm13, %vm2283_vm12  ;;  %vm2292_vm5 = vweird.f32 %v2255_v35 }
 0x662   :  { %v2278_v45 = vmul.f32 %v5724_v8, %v2277_v43  ;;  %v2275_v28 = vsel %vm2274_vm3, %v5722_v38, %v2271_v6  ;;  %v6441_v43 = vsub.f32 %v6408_v33, %v6425_v31 }
 0x663   :  { %v2297_v32 = vmul.f32 %v2275_v28, %v6398_v10 }
 0x664   :  { %v2279_v46 = vmul.f32 0.5, %v2278_v45  ;;  %v2673_v6 = vand.u32 4294901760, %v6441_v43 }
 0x665   :  { %v2304_v25 = vsel %vm367_vm1, %v2297_v32, 0 }
 0x666   :  { %v2280_v47 = vsub.f32 1.5, %v2279_v46  ;;  %v2242_v12 = vpop.xlane.xlu2 %2241  ;;  %v6449_v46 = vand.u32 4294901760, %v6398_v10 }
 0x667   :  { %v5726_v48 = vpop.eup %5725  ;;  %v2252_v49 = vmax.f32 %v2242_v12, 1e-24  ;;  %v6459_v12 = vand.u32 4294901760, %v6412_v26 }
 0x668   :  { %v2281_v14 = vmul.f32 %v5724_v8, %v2280_v47  ;;  %v2287_v51 = vmul.f32 %v5726_v48, %v2255_v35  ;;  %vm2293_vm4 = vweird.f32 %v5726_v48  ;;  %v6437_v35 = vand.u32 4294901760, %v2304_v25 }
 0x669   :  { %5727 = vrsqrt.f32 %v2252_v49  ;;  %vm2294_vm6 = vmor %vm2292_vm5, %vm2293_vm4  ;;  %vm2262_vm8 = vweird.f32 %v2252_v49 }
 0x66a   :  { %v2285_v7 = vsel %vm2284_vm15, %v5724_v8, %v2281_v14  ;;  %v2288_v11 = vmul.f32 %v5726_v48, %v2287_v51  ;;  %v6435_v8 = vand.u32 4294901760, %v6403_v52 }
 0x66b   :  { %v2298_v2 = vmul.f32 %v2285_v7, %v6403_v52 }
 0x66c   :  { %v2289_v16 = vmul.f32 0.5, %v2288_v11  ;;  %v6467_v14 = vsub.f32 %v6403_v52, %v6435_v8  ;;  %v6477_v11 = vsub.f32 %v6398_v10, %v6449_v46  ;;  %v2674_v10 = vsub.f32 %v6441_v43, %v2673_v6 }
 0x66d   :  { %v2307_v27 = vsel %vm367_vm1, %v2298_v2, 0 }
 0x66e   :  { %v2290_v30 = vsub.f32 1.5, %v2289_v16  ;;  %v6421_v53 = vand.u32 4294901760, %v2307_v27  ;;  %v2679_v28 = vand.u32 4294901760, %v6467_v14  ;;  %v2685_v32 = vand.u32 4294901760, %v6477_v11 }
 0x66f   :  { %v5728_v20 = vpop.eup %5727 }
 0x670   :  { %v2291_v3 = vmul.f32 %v5726_v48, %v2290_v30  ;;  %v2257_v21 = vmul.f32 %v5728_v20, %v2252_v49  ;;  %vm2263_vm7 = vweird.f32 %v5728_v20  ;;  %v6432_v19 = vsub.f32 %v2307_v27, %v6421_v53 }
 0x671   :  { %vm2264_vm9 = vmor %vm2262_vm8, %vm2263_vm7  ;;  %v6463_v49 = vsub.f32 %v2304_v25, %v6437_v35  ;;  %vm4697_vm8 = vcmask 254976  }
 0x672   :  { %v2295_v23 = vsel %vm2294_vm6, %v5726_v48, %v2291_v3  ;;  %v2258_v29 = vmul.f32 %v5728_v20, %v2257_v21 }
 0x673   :  { %v2299_v36 = vmul.f32 %v2295_v23, %v6408_v33  ;;  %v6456_v33 = vand.u32 4294901760, %v6432_v19  ;;  %v2342_v30 = vand.u32 4294901760, %v6463_v49  ;;  %v2680_v23 = vsub.f32 %v6467_v14, %v2679_v28 }
 0x674   :  { %v2259_v38 = vmul.f32 0.5, %v2258_v29 }
 0x675   :  { %v2310_v39 = vsel %vm367_vm1, %v2299_v36, 0  ;;  %v2351_v16 = vsub.f32 %v6432_v19, %v6456_v33  ;;  %v2675_v36 = vand.u32 4294901760, %v2674_v10 }
 0x676   :  { %v6429_v41 = vand.u32 4294901760, %v2310_v39  ;;  %v2260_v42 = vsub.f32 1.5, %v2259_v38  ;;  %v2686_v38 = vsub.f32 %v6477_v11, %v2685_v32 }
 0x677   :  { %v2352_v3 = vand.u32 4294901760, %v2351_v16 }
 0x678   :  { %v2261_v44 = vmul.f32 %v5728_v20, %v2260_v42  ;;  %2325 = vmatpush.xpose.msra.mxu2 %v6429_v41  ;;  %2476 = vmatpush.xpose.msrb.mxu1 %v6429_v41  ;;  %v6446_v45 = vsub.f32 %v2310_v39, %v6429_v41  ;;  %v2681_v42 = vand.u32 4294901760, %v2680_v23 }
 0x67a   :  { %v2265_v37 = vsel %vm2264_vm9, %v5728_v20, %v2261_v44  ;;  %2432 = vmatpush.xpose.msrb.mxu0 %v6446_v45  ;;  %v6453_v47 = vand.u32 4294901760, %v6446_v45  ;;  %v6490_v20 = vsub.f32 %v6412_v26, %v6459_v12 }
 0x67b   :  { %v2296_v48 = vmul.f32 %v2265_v37, %v6412_v26  ;;  %v2343_v26 = vsub.f32 %v6463_v49, %v2342_v30 }
 0x67c   :  { %2327 = vmatpush.xpose.msra.mxu2 %v6421_v53  ;;  %2478 = vmatpush.xpose.msrb.mxu1 %v6421_v53  ;;  %v2359_v51 = vsub.f32 %v6446_v45, %v6453_v47  ;;  %v2691_v29 = vand.u32 4294901760, %v6490_v20 }
 0x67d   :  { %v2301_v7 = vsel %vm367_vm1, %v2296_v48, 0  ;;  %v2344_v44 = vand.u32 4294901760, %v2343_v26  ;;  %v2687_v48 = vand.u32 4294901760, %v2686_v38 }
 0x67e   :  { %v6479_v2 = vand.u32 4294901760, %v2301_v7  ;;  %2435 = vmatpush.xpose.msrb.mxu0 %v6432_v19  ;;  %v6482_v52 = vand.u32 4294901760, %v2359_v51  ;;  %v2692_v37 = vsub.f32 %v6490_v20, %v2691_v29 }
 0x680   :  { %2329 = vmatpush.xpose.msra.mxu2 %v6437_v35  ;;  %2382 = vmatpush.xpose.msra.mxu3 %v6482_v52  ;;  %v2333_v27 = vsub.f32 %v2301_v7, %v6479_v2  ;;  %v2693_v51 = vand.u32 4294901760, %v2692_v37 }
 0x681   :  { %2480 = vmatpush.xpose.msrb.mxu1 %v6437_v35 }
 0x682   :  { %2438 = vmatpush.xpose.msrb.mxu0 %v6463_v49  ;;  %v2334_v21 = vand.u32 4294901760, %v2333_v27 }
 0x684   :  { %2331 = vmatpush.xpose.msra.mxu2 %v6479_v2  ;;  %2388 = vmatpush.xpose.msra.mxu3 %v2352_v3  ;;  %v2335_v25 = vsub.f32 %v2333_v27, %v2334_v21 }
 0x685   :  { %2482 = vmatpush.xpose.msrb.mxu1 %v6479_v2 }
 0x686   :  { %2441 = vmatpush.xpose.msrb.mxu0 %v2333_v27  ;;  %v2336_v39 = vand.u32 4294901760, %v2335_v25 }
 0x688   :  { %2523 = vmatpush.xpose.msrb.mxu2 %v6453_v47  ;;  %2486 = vmatmul.f32.vlgmr.msrb.gmra.mxu1 %v2334_v21 }
 0x689   :  { %2676 = vmatpush.msra.mxu1 %v2675_v36  ;;  %2337 = vmatmul.f32.vlgmr.msra.gmra.mxu2 %v2336_v39  ;;  %v85_v36 = vld [vmem:[%s7431_s11 + $0x8] sm:$0xff] }
 0x68a   :  { %2619 = vmatpush.msra.mxu0 %v6425_v31  ;;  %2394 = vmatpush.xpose.msra.mxu3 %v2344_v44 }
 0x68b   :  { %2682 = vmatpush.msra.mxu1 %v2681_v42  ;;  %2444 = vmatmul.f32.vlgmr.msrb.gmra.mxu0 %v2333_v27 }
 0x68c   :  { %2527 = vmatpush.xpose.msrb.mxu2 %v6456_v33  ;;  %2621 = vmatpush.msra.mxu0 %v6435_v8 }
 0x68d   :  { %2688 = vmatpush.msra.mxu1 %v2687_v48 }
 0x68e   :  { %2623 = vmatpush.msra.mxu0 %v6449_v46  ;;  %2400 = vmatpush.xpose.msra.mxu3 %v2336_v39 }
 0x68f   :  { %2694 = vmatpush.msra.mxu1 %v2693_v51 }
 0x690   :  { %2531 = vmatpush.xpose.msrb.mxu2 %v2342_v30  ;;  %2625 = vmatpush.msra.mxu0 %v6459_v12 }
 0x691   :  { %2860 = vmatpush.msrb.mxu1 %v6425_v31  ;;  %2402 = vmatmul.f32.vlgmr.msra.gmra.mxu3 %v6479_v2 }
 0x692   :  { %2566 = vmatpush.xpose.msrb.mxu3 %v6429_v41  ;;  %2817 = vmatpush.msrb.mxu0 %v2673_v6 }
 0x693   :  { %2862 = vmatpush.msrb.mxu1 %v6435_v8  ;;  %2345 = vmatmul.f32.gmra.mxu2 %v2344_v44 }
 0x694   :  { %2492 = vmatmul.f32.gmra.mxu1 %v2342_v30  ;;  %2821 = vmatpush.msrb.mxu0 %v2679_v28 }
 0x695   :  { %2864 = vmatpush.msrb.mxu1 %v6449_v46  ;;  %2449 = vmatmul.f32.gmra.mxu0 %v6463_v49 }
 0x696   :  { %2535 = vmatpush.xpose.msrb.mxu2 %v2334_v21  ;;  %2568 = vmatpush.xpose.msrb.mxu3 %v6421_v53 }
 0x697   :  { %2825 = vmatpush.msrb.mxu0 %v2685_v32  ;;  %2866 = vmatpush.msrb.mxu1 %v6459_v12 }
 0x699   :  { %2829 = vmatpush.msrb.mxu0 %v2691_v29  ;;  %2406 = vmatmul.f32.gmra.mxu3 %v6437_v35 }
 0x69a   :  { %2726 = vmatpush.msra.mxu2 %v6441_v43  ;;  %2570 = vmatpush.xpose.msrb.mxu3 %v6437_v35 }
 0x69b   :  { %2353 = vmatmul.f32.gmra.mxu2 %v2352_v3 }
 0x69c   :  { %2729 = vmatpush.msra.mxu2 %v6467_v14  ;;  %2498 = vmatmul.f32.gmra.mxu1 %v6456_v33 }
 0x69d   :  { %2454 = vmatmul.f32.gmra.mxu0 %v6432_v19 }
 0x69e   :  { %2732 = vmatpush.msra.mxu2 %v6477_v11  ;;  %2572 = vmatpush.xpose.msrb.mxu3 %v6479_v2 }
 0x6a0   :  { %2735 = vmatpush.msra.mxu2 %v6490_v20 }
 0x6a1   :  { %2410 = vmatmul.f32.gmra.mxu3 %v6421_v53 }
 0x6a2   :  { %2770 = vmatpush.msra.mxu3 %v6425_v31 }
 0x6a3   :  { %2361 = vmatmul.f32.gmra.mxu2 %v6482_v52 }
 0x6a4   :  { %2772 = vmatpush.msra.mxu3 %v6435_v8  ;;  %2504 = vmatmul.f32.gmra.mxu1 %v6453_v47 }
 0x6a5   :  { %2459 = vmatmul.f32.gmra.mxu0 %v6446_v45 }
 0x6a6   :  { %2774 = vmatpush.msra.mxu3 %v6449_v46 }
 0x6a8   :  { %2776 = vmatpush.msra.mxu3 %v6459_v12 }
 0x6a9   :  { %2414 = vmatmul.f32.gmra.mxu3 %v6429_v41 }
 0x6ab   :  { %2537 = vmatmul.f32.vlgmr.msrb.gmra.mxu2 %v6479_v2 }
 0x6b1   :  { %2574 = vmatmul.f32.vlgmr.msrb.gmra.mxu3 %v6479_v2 }
 0x6b3   :  { %2541 = vmatmul.f32.gmra.mxu2 %v6437_v35 }
 0x6b9   :  { %2578 = vmatmul.f32.gmra.mxu3 %v6437_v35 }
 0x6bb   :  { %2545 = vmatmul.f32.gmra.mxu2 %v6421_v53 }
 0x6c1   :  { %2582 = vmatmul.f32.gmra.mxu3 %v6421_v53 }
 0x6c3   :  { %2549 = vmatmul.f32.gmra.mxu2 %v6429_v41 }
 0x6c9   :  { %2586 = vmatmul.f32.gmra.mxu3 %v6429_v41  ;;  %v84_v41 = vld [vmem:[%s7431_s11] sm:$0xff] }
 0x705   :  { %v2487_v12 = vpop.f32.mrf.mxu1 }
 0x708   :  { %v2445_v33 = vpop.f32.mrf.mxu0 }
 0x70c   :  { %v2338_v31 = vpop.f32.mrf.mxu2 }
 0x711   :  { %v2493_v2 = vpop.f32.mrf.mxu1 }
 0x712   :  { %v2450_v7 = vpop.f32.mrf.mxu0 }
 0x714   :  { %v2403_v19 = vpop.f32.mrf.mxu3 }
 0x715   :  { %v2404_v49 = vadd.f32 %v2403_v19, %v2338_v31 }
 0x716   :  { %v2346_v8 = vpop.f32.mrf.mxu2 }
 0x717   :  { %v2446_v6 = vadd.f32 %v2445_v33, %v2404_v49 }
 0x719   :  { %v2488_v53 = vadd.f32 %v2487_v12, %v2446_v6  ;;  %v2499_v42 = vpop.f32.mrf.mxu1  ;;  %v86_v12 = vld [vmem:[%s7431_s11 + $0x10] sm:$0xff] }
 0x71a   :  { %v2455_v21 = vpop.f32.mrf.mxu0 }
 0x71c   :  { %v2407_v43 = vpop.f32.mrf.mxu3 }
 0x71d   :  { %v2408_v11 = vadd.f32 %v2407_v43, %v2346_v8 }
 0x71e   :  { %v2354_v45 = vpop.f32.mrf.mxu2 }
 0x71f   :  { %v2451_v30 = vadd.f32 %v2450_v7, %v2408_v11 }
 0x721   :  { %v2494_v3 = vadd.f32 %v2493_v2, %v2451_v30 }
 0x722   :  { %v2460_v33 = vpop.f32.mrf.mxu0 }
 0x724   :  { %v2411_v46 = vpop.f32.mrf.mxu3 }
 0x725   :  { %v2412_v27 = vadd.f32 %v2411_v46, %v2354_v45 }
 0x726   :  { %v2362_v47 = vpop.f32.mrf.mxu2 }
 0x727   :  { %v2456_v38 = vadd.f32 %v2455_v21, %v2412_v27 }
 0x729   :  { %v2500_v8 = vadd.f32 %v2499_v42, %v2456_v38 }
 0x72c   :  { %v2415_v14 = vpop.f32.mrf.mxu3 }
 0x72d   :  { %v2416_v31 = vadd.f32 %v2415_v14, %v2362_v47  ;;  %v2505_v14 = vpop.f32.mrf.mxu1 }
 0x72e   :  { %v2538_v35 = vpop.f32.mrf.mxu2 }
 0x72f   :  { %v2539_v52 = vadd.f32 %v2538_v35, %v2488_v53  ;;  %v2461_v6 = vadd.f32 %v2460_v33, %v2416_v31  ;;  %v2890_v31 = vld [vmem:[%s7468_s8 + $0x10] sm:$0xff]  ;;  %v2888_v33 = vld [vmem:[%s7468_s8] sm:$0xff] }
 0x734   :  { %v2575_v16 = vpop.f32.mrf.mxu3 }
 0x735   :  { %v2576_v20 = vadd.f32 %v2575_v16, %v2539_v52 }
 0x736   :  { %v2542_v28 = vpop.f32.mrf.mxu2 }
 0x737   :  { %v2590_v10 = vmul.f32 %v2576_v20, %v84_v41  ;;  %v2543_v26 = vadd.f32 %v2542_v28, %v2494_v3  ;;  %v2506_v41 = vadd.f32 %v2505_v14, %v2461_v6  ;;  %v87_v20 = vld [vmem:[%s7431_s11 + $0x18] sm:$0xff] }
 0x739   :  { %v2595_v32 = vsel %vm367_vm1, %v2590_v10, 0 }
 0x73a   :  { %v6550_v23 = vand.u32 4294901760, %v2595_v32 }
 0x73c   :  { %v2627_v29 = vsub.f32 %v2595_v32, %v6550_v23  ;;  %v2579_v25 = vpop.f32.mrf.mxu3  ;;  %2696 = vmatmul.f32.vlgmr.msra.gmra.mxu1 %v6550_v23 }
 0x73d   :  { %v2580_v39 = vadd.f32 %v2579_v25, %v2543_v26 }
 0x73e   :  { %v2628_v44 = vand.u32 4294901760, %v2627_v29  ;;  %v2546_v37 = vpop.f32.mrf.mxu2  ;;  %2738 = vmatmul.f32.vlgmr.msra.gmra.mxu2 %v2627_v29 }
 0x73f   :  { %v2591_v48 = vmul.f32 %v2580_v39, %v85_v36  ;;  %v2547_v46 = vadd.f32 %v2546_v37, %v2500_v8  ;;  %v2922_v8 = vand.u32 4294901760, %v2890_v31 }
 0x740   :  { %v2629_v51 = vsub.f32 %v2627_v29, %v2628_v44  ;;  %2780 = vmatmul.f32.vlgmr.msra.gmra.mxu3 %v2628_v44 }
 0x741   :  { %v2598_v19 = vsel %vm367_vm1, %v2591_v48, 0  ;;  %v2891_v48 = vld [vmem:[%s7468_s8 + $0x18] sm:$0xff] }
 0x742   :  { %v2630_v43 = vand.u32 4294901760, %v2629_v51  ;;  %v2634_v45 = vand.u32 4294901760, %v2598_v19  ;;  %v2920_v51 = vand.u32 4294901760, %v2891_v48 }
 0x744   :  { %v2583_v49 = vpop.f32.mrf.mxu3  ;;  %2631 = vmatmul.f32.vlgmr.msra.gmra.mxu0 %v2630_v43  ;;  %2700 = vmatmul.f32.gmra.mxu1 %v2634_v45  ;;  %v2635_v35 = vsub.f32 %v2598_v19, %v2634_v45  ;;  %v2974_v19 = vsub.f32 %v2891_v48, %v2920_v51 }
 0x745   :  { %v2584_v7 = vadd.f32 %v2583_v49, %v2547_v46  ;;  %2921 = vmatpush.msrb.mxu2 %v2920_v51  ;;  %3072 = vmatpush.msra.mxu1 %v2920_v51 }
 0x746   :  { %2743 = vmatmul.f32.gmra.mxu2 %v2635_v35  ;;  %v2636_v11 = vand.u32 4294901760, %v2635_v35  ;;  %v2550_v53 = vpop.f32.mrf.mxu2  ;;  %v2975_v43 = vand.u32 4294901760, %v2974_v19  ;;  %3028 = vmatpush.msra.mxu0 %v2974_v19 }
 0x747   :  { %v2592_v47 = vmul.f32 %v2584_v7, %v86_v12  ;;  %v2551_v30 = vadd.f32 %v2550_v53, %v2506_v41  ;;  %3074 = vmatpush.msra.mxu1 %v2922_v8  ;;  %2923 = vmatpush.msrb.mxu2 %v2922_v8 }
 0x748   :  { %2786 = vmatmul.f32.gmra.mxu3 %v2636_v11  ;;  %v2637_v2 = vsub.f32 %v2635_v35, %v2636_v11  ;;  %v2976_v35 = vsub.f32 %v2974_v19, %v2975_v43  ;;  %v2926_v11 = vand.u32 4294901760, %v2888_v33 }
 0x749   :  { %v2601_v52 = vsel %vm367_vm1, %v2592_v47, 0 }
 0x74a   :  { %v2642_v16 = vand.u32 4294901760, %v2601_v52  ;;  %v2638_v28 = vand.u32 4294901760, %v2637_v2  ;;  %v2977_v47 = vand.u32 4294901760, %v2976_v35  ;;  %v2992_v2 = vsub.f32 %v2888_v33, %v2926_v11 }
 0x74c   :  { %v2587_v10 = vpop.f32.mrf.mxu3  ;;  %2639 = vmatmul.f32.gmra.mxu0 %v2638_v28  ;;  %2704 = vmatmul.f32.gmra.mxu1 %v2642_v16  ;;  %v2643_v27 = vsub.f32 %v2601_v52, %v2642_v16 }
 0x74d   :  { %v2588_v32 = vadd.f32 %v2587_v10, %v2551_v30  ;;  %2978 = vmatpush.msrb.mxu3 %v2977_v47 }
 0x74e   :  { %2748 = vmatmul.f32.gmra.mxu2 %v2643_v27  ;;  %v2644_v3 = vand.u32 4294901760, %v2643_v27 }
 0x74f   :  { %v2593_v21 = vmul.f32 %v2588_v32, %v87_v20 }
 0x750   :  { %2792 = vmatmul.f32.gmra.mxu3 %v2644_v3  ;;  %v2645_v26 = vsub.f32 %v2643_v27, %v2644_v3 }
 0x751   :  { %v2604_v29 = vsel %vm367_vm1, %v2593_v21, 0 }
 0x752   :  { %v2650_v36 = vand.u32 4294901760, %v2604_v29  ;;  %v2646_v25 = vand.u32 4294901760, %v2645_v26 }
 0x754   :  { %2647 = vmatmul.f32.gmra.mxu0 %v2646_v25  ;;  %2708 = vmatmul.f32.gmra.mxu1 %v2650_v36  ;;  %v2651_v38 = vsub.f32 %v2604_v29, %v2650_v36 }
 0x756   :  { %2753 = vmatmul.f32.gmra.mxu2 %v2651_v38  ;;  %v2652_v39 = vand.u32 4294901760, %v2651_v38 }
 0x758   :  { %2798 = vmatmul.f32.gmra.mxu3 %v2652_v39  ;;  %v2653_v42 = vsub.f32 %v2651_v38, %v2652_v39 }
 0x75a   :  { %v2654_v44 = vand.u32 4294901760, %v2653_v42 }
 0x75c   :  { %2655 = vmatmul.f32.gmra.mxu0 %v2654_v44  ;;  %2868 = vmatmul.f32.vlgmr.msrb.gmra.mxu1 %v6550_v23 }
 0x764   :  { %2831 = vmatmul.f32.vlgmr.msrb.gmra.mxu0 %v6550_v23  ;;  %2872 = vmatmul.f32.gmra.mxu1 %v2634_v45  ;;  %v2889_v23 = vld [vmem:[%s7468_s8 + $0x8] sm:$0xff] }
 0x765   :  { %v2924_v46 = vand.u32 4294901760, %v2889_v23 }
 0x767   :  { %v2986_v7 = vsub.f32 %v2889_v23, %v2924_v46  ;;  %3076 = vmatpush.msra.mxu1 %v2924_v46  ;;  %2925 = vmatpush.msrb.mxu2 %v2924_v46 }
 0x769   :  { %v2987_v53 = vand.u32 4294901760, %v2986_v7  ;;  %3078 = vmatpush.msra.mxu1 %v2926_v11  ;;  %2927 = vmatpush.msrb.mxu2 %v2926_v11 }
 0x76b   :  { %v2988_v41 = vsub.f32 %v2986_v7, %v2987_v53  ;;  %3119 = vmatpush.msra.mxu2 %v2975_v43 }
 0x76c   :  { %2835 = vmatmul.f32.gmra.mxu0 %v2634_v45  ;;  %2876 = vmatmul.f32.gmra.mxu1 %v2642_v16  ;;  %v2980_v45 = vsub.f32 %v2890_v31, %v2922_v8 }
 0x76d   :  { %v2989_v28 = vand.u32 4294901760, %v2988_v41 }
 0x76e   :  { %v2981_v6 = vand.u32 4294901760, %v2980_v45  ;;  %3031 = vmatpush.msra.mxu0 %v2980_v45 }
 0x770   :  { %v2982_v14 = vsub.f32 %v2980_v45, %v2981_v6  ;;  %3034 = vmatpush.msra.mxu0 %v2986_v7  ;;  %3123 = vmatpush.msra.mxu2 %v2981_v6 }
 0x772   :  { %v2983_v52 = vand.u32 4294901760, %v2982_v14  ;;  %3037 = vmatpush.msra.mxu0 %v2992_v2  ;;  %3127 = vmatpush.msra.mxu2 %v2987_v53 }
 0x774   :  { %2839 = vmatmul.f32.gmra.mxu0 %v2642_v16  ;;  %2880 = vmatmul.f32.gmra.mxu1 %v2650_v36  ;;  %v2993_v16 = vand.u32 4294901760, %v2992_v2 }
 0x775   :  { %2984 = vmatpush.msrb.mxu3 %v2983_v52 }
 0x776   :  { %v2994_v30 = vsub.f32 %v2992_v2, %v2993_v16  ;;  %3131 = vmatpush.msra.mxu2 %v2993_v16 }
 0x777   :  { %2990 = vmatpush.msrb.mxu3 %v2989_v28 }
 0x778   :  { %v2995_v27 = vand.u32 4294901760, %v2994_v30 }
 0x77a   :  { %2996 = vmatpush.msrb.mxu3 %v2995_v27 }
 0x77c   :  { %2843 = vmatmul.f32.gmra.mxu0 %v2650_v36  ;;  %3162 = vmatpush.msra.mxu3 %v2920_v51 }
 0x77e   :  { %3164 = vmatpush.msra.mxu3 %v2922_v8 }
 0x780   :  { %3166 = vmatpush.msra.mxu3 %v2924_v46 }
 0x782   :  { %3168 = vmatpush.msra.mxu3 %v2926_v11 }
 0x7b9   :  { %v2697_v37 = vpop.f32.mrf.mxu1 }
 0x7c1   :  { %v2632_v12 = vpop.f32.mrf.mxu0  ;;  %v2701_v49 = vpop.f32.mrf.mxu1 }
 0x7c2   :  { %v2739_v21 = vpop.f32.mrf.mxu2  ;;  %v2698_v26 = vadd.f32 %v2697_v37, %v2632_v12 }
 0x7c3   :  { %v2781_v29 = vpop.f32.mrf.mxu3 }
 0x7c4   :  { %v2740_v25 = vadd.f32 %v2739_v21, %v2698_v26 }
 0x7c6   :  { %v2782_v42 = vadd.f32 %v2781_v29, %v2740_v25 }
 0x7c9   :  { %v2640_v20 = vpop.f32.mrf.mxu0  ;;  %v2705_v10 = vpop.f32.mrf.mxu1 }
 0x7ca   :  { %v2744_v39 = vpop.f32.mrf.mxu2  ;;  %v2702_v44 = vadd.f32 %v2701_v49, %v2640_v20 }
 0x7cb   :  { %v2787_v19 = vpop.f32.mrf.mxu3 }
 0x7cc   :  { %v2745_v23 = vadd.f32 %v2744_v39, %v2702_v44 }
 0x7ce   :  { %v2788_v45 = vadd.f32 %v2787_v19, %v2745_v23 }
 0x7d1   :  { %v2648_v32 = vpop.f32.mrf.mxu0  ;;  %v2709_v3 = vpop.f32.mrf.mxu1 }
 0x7d2   :  { %v2706_v46 = vadd.f32 %v2705_v10, %v2648_v32  ;;  %v2749_v35 = vpop.f32.mrf.mxu2 }
 0x7d3   :  { %v2793_v49 = vpop.f32.mrf.mxu3 }
 0x7d4   :  { %v2750_v11 = vadd.f32 %v2749_v35, %v2706_v46 }
 0x7d6   :  { %v2794_v52 = vadd.f32 %v2793_v49, %v2750_v11 }
 0x7d9   :  { %v2656_v36 = vpop.f32.mrf.mxu0  ;;  %v2869_v38 = vpop.f32.mrf.mxu1 }
 0x7da   :  { %v2710_v41 = vadd.f32 %v2709_v3, %v2656_v36  ;;  %v2754_v32 = vpop.f32.mrf.mxu2 }
 0x7db   :  { %v2799_v39 = vpop.f32.mrf.mxu3 }
 0x7dc   :  { %v2755_v26 = vadd.f32 %v2754_v32, %v2710_v41 }
 0x7de   :  { %v2800_v3 = vadd.f32 %v2799_v39, %v2755_v26 }
 0x7e1   :  { %v2832_v48 = vpop.f32.mrf.mxu0  ;;  %v2873_v8 = vpop.f32.mrf.mxu1 }
 0x7e2   :  { %v2833_v31 = vadd.f32 %v2832_v48, %v2782_v42 }
 0x7e4   :  { %v2870_v51 = vadd.f32 %v2869_v38, %v2833_v31 }
 0x7e6   :  { %v2884_v43 = vmax.f32 %v2870_v51, 0.0 }
 0x7e8   :  { %v2897_v33 = vsel %vm367_vm1, %v2884_v43, 0 }
 0x7e9   :  { %v2928_v37 = vand.u32 4294901760, %v2897_v33  ;;  %v2836_v12 = vpop.f32.mrf.mxu0  ;;  %v2877_v30 = vpop.f32.mrf.mxu1 }
 0x7ea   :  { %v2837_v6 = vadd.f32 %v2836_v12, %v2788_v45 }
 0x7eb   :  { %v2929_v7 = vsub.f32 %v2897_v33, %v2928_v37  ;;  %2998 = vmatmul.f32.vlgmr.msrb.gmra.mxu3 %v2928_v37 }
 0x7ec   :  { %v2874_v47 = vadd.f32 %v2873_v8, %v2837_v6 }
 0x7ed   :  { %v2930_v14 = vand.u32 4294901760, %v2929_v7  ;;  %3040 = vmatmul.f32.vlgmr.msra.gmra.mxu0 %v2929_v7 }
 0x7ee   :  { %v2885_v53 = vmax.f32 %v2874_v47, 0.0 }
 0x7ef   :  { %v2931_v2 = vsub.f32 %v2929_v7, %v2930_v14  ;;  %3082 = vmatmul.f32.vlgmr.msra.gmra.mxu1 %v2930_v14 }
 0x7f0   :  { %v2900_v16 = vsel %vm367_vm1, %v2885_v53, 0 }
 0x7f1   :  { %v2936_v28 = vand.u32 4294901760, %v2900_v16  ;;  %v2840_v20 = vpop.f32.mrf.mxu0  ;;  %v2932_v10 = vand.u32 4294901760, %v2931_v2  ;;  %v2881_v23 = vpop.f32.mrf.mxu1 }
 0x7f2   :  { %v2841_v27 = vadd.f32 %v2840_v20, %v2794_v52 }
 0x7f3   :  { %2933 = vmatmul.f32.vlgmr.msrb.gmra.mxu2 %v2932_v10  ;;  %3002 = vmatmul.f32.gmra.mxu3 %v2936_v28  ;;  %v2937_v21 = vsub.f32 %v2900_v16, %v2936_v28 }
 0x7f4   :  { %v2878_v29 = vadd.f32 %v2877_v30, %v2841_v27 }
 0x7f5   :  { %3045 = vmatmul.f32.gmra.mxu0 %v2937_v21  ;;  %v2938_v25 = vand.u32 4294901760, %v2937_v21 }
 0x7f6   :  { %v2886_v38 = vmax.f32 %v2878_v29, 0.0 }
 0x7f7   :  { %3088 = vmatmul.f32.gmra.mxu1 %v2938_v25  ;;  %v2939_v42 = vsub.f32 %v2937_v21, %v2938_v25 }
 0x7f8   :  { %v2903_v36 = vsel %vm367_vm1, %v2886_v38, 0 }
 0x7f9   :  { %v2944_v44 = vand.u32 4294901760, %v2903_v36  ;;  %v2844_v48 = vpop.f32.mrf.mxu0  ;;  %v2940_v31 = vand.u32 4294901760, %v2939_v42 }
 0x7fa   :  { %v2845_v19 = vadd.f32 %v2844_v48, %v2800_v3 }
 0x7fb   :  { %2941 = vmatmul.f32.gmra.mxu2 %v2940_v31  ;;  %3006 = vmatmul.f32.gmra.mxu3 %v2944_v44  ;;  %v2945_v51 = vsub.f32 %v2903_v36, %v2944_v44 }
 0x7fc   :  { %v2882_v43 = vadd.f32 %v2881_v23, %v2845_v19 }
 0x7fd   :  { %3050 = vmatmul.f32.gmra.mxu0 %v2945_v51  ;;  %v2946_v8 = vand.u32 4294901760, %v2945_v51 }
 0x7fe   :  { %v2887_v45 = vmax.f32 %v2882_v43, 0.0 }
 0x7ff   :  { %3094 = vmatmul.f32.gmra.mxu1 %v2946_v8  ;;  %v2947_v46 = vsub.f32 %v2945_v51, %v2946_v8 }
 0x800   :  { %v2906_v33 = vsel %vm367_vm1, %v2887_v45, 0 }
 0x801   :  { %v2952_v35 = vand.u32 4294901760, %v2906_v33  ;;  %v2948_v12 = vand.u32 4294901760, %v2947_v46 }
 0x803   :  { %2949 = vmatmul.f32.gmra.mxu2 %v2948_v12  ;;  %3010 = vmatmul.f32.gmra.mxu3 %v2952_v35  ;;  %v2953_v6 = vsub.f32 %v2906_v33, %v2952_v35 }
 0x805   :  { %3055 = vmatmul.f32.gmra.mxu0 %v2953_v6  ;;  %v2954_v7 = vand.u32 4294901760, %v2953_v6 }
 0x807   :  { %3100 = vmatmul.f32.gmra.mxu1 %v2954_v7  ;;  %v2955_v11 = vsub.f32 %v2953_v6, %v2954_v7 }
 0x809   :  { %v2956_v47 = vand.u32 4294901760, %v2955_v11 }
 0x80b   :  { %2957 = vmatmul.f32.gmra.mxu2 %v2956_v47  ;;  %3170 = vmatmul.f32.vlgmr.msra.gmra.mxu3 %v2928_v37 }
 0x813   :  { %3133 = vmatmul.f32.vlgmr.msra.gmra.mxu2 %v2928_v37  ;;  %3174 = vmatmul.f32.gmra.mxu3 %v2936_v28  ;;  %v5700_v37 = vld [vmem:[%s7429_s9] ss:$0 sm:$0xff] }
 0x81b   :  { %3137 = vmatmul.f32.gmra.mxu2 %v2936_v28  ;;  %3178 = vmatmul.f32.gmra.mxu3 %v2944_v44 }
 0x823   :  { %3141 = vmatmul.f32.gmra.mxu2 %v2944_v44  ;;  %3182 = vmatmul.f32.gmra.mxu3 %v2952_v35 }
 0x82b   :  { %3145 = vmatmul.f32.gmra.mxu2 %v2952_v35 }
 0x86a   :  { %v3041_v30 = vpop.f32.mrf.mxu0 }
 0x86c   :  { %v3083_v20 = vpop.f32.mrf.mxu1 }
 0x86e   :  { %v2999_v49 = vpop.f32.mrf.mxu3 }
 0x872   :  { %v3046_v32 = vpop.f32.mrf.mxu0 }
 0x874   :  { %v3089_v29 = vpop.f32.mrf.mxu1 }
 0x876   :  { %v2934_v14 = vpop.f32.mrf.mxu2  ;;  %v3003_v53 = vpop.f32.mrf.mxu3 }
 0x877   :  { %v2935_v43 = vadd.f32 %v5700_v37, %v2934_v14 }
 0x879   :  { %v3000_v6 = vadd.f32 %v2999_v49, %v2935_v43 }
 0x87a   :  { %v3051_v36 = vpop.f32.mrf.mxu0 }
 0x87c   :  { %v3095_v51 = vpop.f32.mrf.mxu1 }
 0x87e   :  { %v2942_v2 = vpop.f32.mrf.mxu2  ;;  %v3007_v52 = vpop.f32.mrf.mxu3 }
 0x87f   :  { %v2943_v27 = vadd.f32 %v5700_v37, %v2942_v2  ;;  %v3042_v2 = vadd.f32 %v3041_v30, %v3000_v6 }
 0x881   :  { %v3004_v21 = vadd.f32 %v3003_v53, %v2943_v27 }
 0x882   :  { %v3056_v11 = vpop.f32.mrf.mxu0 }
 0x883   :  { %v3047_v38 = vadd.f32 %v3046_v32, %v3004_v21 }
 0x885   :  { %v3090_v3 = vadd.f32 %v3089_v29, %v3047_v38 }
 0x886   :  { %v2950_v41 = vpop.f32.mrf.mxu2  ;;  %v3011_v16 = vpop.f32.mrf.mxu3 }
 0x887   :  { %v2951_v25 = vadd.f32 %v5700_v37, %v2950_v41 }
 0x889   :  { %v3008_v42 = vadd.f32 %v3007_v52, %v2951_v25  ;;  %v3101_v52 = vpop.f32.mrf.mxu1 }
 0x88b   :  { %v3052_v23 = vadd.f32 %v3051_v36, %v3008_v42 }
 0x88d   :  { %v3096_v46 = vadd.f32 %v3095_v51, %v3052_v23 }
 0x88e   :  { %v2958_v10 = vpop.f32.mrf.mxu2  ;;  %v3171_v28 = vpop.f32.mrf.mxu3 }
 0x88f   :  { %v2959_v31 = vadd.f32 %v5700_v37, %v2958_v10  ;;  %v3084_v37 = vadd.f32 %v3083_v20, %v3042_v2 }
 0x891   :  { %v3012_v45 = vadd.f32 %v3011_v16, %v2959_v31 }
 0x893   :  { %v3057_v53 = vadd.f32 %v3056_v11, %v3012_v45 }
 0x895   :  { %v3102_v41 = vadd.f32 %v3101_v52, %v3057_v53 }
 0x896   :  { %v3134_v26 = vpop.f32.mrf.mxu2  ;;  %v3175_v39 = vpop.f32.mrf.mxu3 }
 0x897   :  { %v3135_v21 = vadd.f32 %v3134_v26, %v3084_v37 }
 0x899   :  { %v6601_v25 = vadd.f32 %v3171_v28, %v3135_v21 }
 0x89b   :  { %v3186_v38 = vmul.f32 %v6601_v25, %v6601_v25 }
 0x89e   :  { %v3138_v44 = vpop.f32.mrf.mxu2  ;;  %v3179_v35 = vpop.f32.mrf.mxu3 }
 0x89f   :  { %v3139_v48 = vadd.f32 %v3138_v44, %v3090_v3 }
 0x8a1   :  { %v6587_v19 = vadd.f32 %v3175_v39, %v3139_v48  ;;  %v3190_v39 = vsel %vm367_vm1, %v3186_v38, 0.0 }
 0x8a3   :  { %v3187_v8 = vmul.f32 %v6587_v19, %v6587_v19 }
 0x8a5   :  { %v3193_v33 = vsel %vm367_vm1, %v3187_v8, 0.0 }
 0x8a6   :  { %v3142_v12 = vpop.f32.mrf.mxu2  ;;  %3194 = vadd.xlane.f32.xlu2 %v3193_v33  ;;  %v3183_v32 = vpop.f32.mrf.mxu3 }
 0x8a7   :  { %v3143_v7 = vadd.f32 %v3142_v12, %v3096_v46 }
 0x8a9   :  { %v6592_v47 = vadd.f32 %v3179_v35, %v3143_v7 }
 0x8ab   :  { %v3188_v14 = vmul.f32 %v6592_v47, %v6592_v47 }
 0x8ad   :  { %v3196_v16 = vsel %vm367_vm1, %v3188_v14, 0.0 }
 0x8ae   :  { %v3146_v10 = vpop.f32.mrf.mxu2  ;;  %3197 = vadd.xlane.f32.xlu1 %v3196_v16 }
 0x8af   :  { %v3147_v27 = vadd.f32 %v3146_v10, %v3102_v41 }
 0x8b1   :  { %v6597_v49 = vadd.f32 %v3183_v32, %v3147_v27 }
 0x8b3   :  { %v3189_v29 = vmul.f32 %v6597_v49, %v6597_v49 }
 0x8b5   :  { %v3199_v30 = vsel %vm367_vm1, %v3189_v29, 0.0 }
 0x8b6   :  { %3200 = vadd.xlane.f32.xlu0 %v3199_v30 }
 0x8be   :  { %3191 = vadd.xlane.f32.xlu0 %v3190_v39 }
 0x919   :  { %v3195_v20 = vpop.xlane.xlu2 %3194 }
 0x91a   :  { %v3203_v42 = vmax.f32 %v3195_v20, 1e-24 }
 0x91c   :  { %5729 = vrsqrt.f32 %v3203_v42  ;;  %vm3222_vm14 = vweird.f32 %v3203_v42 }
 0x921   :  { %v3198_v26 = vpop.xlane.xlu1 %3197 }
 0x922   :  { %v5730_v3 = vpop.eup %5729  ;;  %v3204_v36 = vmax.f32 %v3198_v26, 1e-24 }
 0x923   :  { %v3217_v44 = vmul.f32 %v5730_v3, %v3203_v42  ;;  %vm3223_vm12 = vweird.f32 %v5730_v3  ;;  %v6614_v42 = vand.u32 4294901760, %v6597_v49 }
 0x924   :  { %5731 = vrsqrt.f32 %v3204_v36  ;;  %vm3232_vm11 = vweird.f32 %v3204_v36  ;;  %vm3224_vm15 = vmor %vm3222_vm14, %vm3223_vm12 }
 0x925   :  { %v3218_v48 = vmul.f32 %v5730_v3, %v3217_v44 }
 0x927   :  { %v3219_v43 = vmul.f32 0.5, %v3218_v48 }
 0x929   :  { %v3201_v28 = vpop.xlane.xlu0 %3200  ;;  %v3220_v46 = vsub.f32 1.5, %v3219_v43 }
 0x92a   :  { %v5732_v31 = vpop.eup %5731  ;;  %v3205_v23 = vmax.f32 %v3201_v28, 1e-24 }
 0x92b   :  { %v3227_v51 = vmul.f32 %v5732_v31, %v3204_v36  ;;  %vm3233_vm10 = vweird.f32 %v5732_v31  ;;  %v3221_v53 = vmul.f32 %v5730_v3, %v3220_v46 }
 0x92c   :  { %5733 = vrsqrt.f32 %v3205_v23  ;;  %vm3234_vm13 = vmor %vm3232_vm11, %vm3233_vm10  ;;  %vm3242_vm3 = vweird.f32 %v3205_v23 }
 0x92d   :  { %v3228_v8 = vmul.f32 %v5732_v31, %v3227_v51  ;;  %v3225_v16 = vsel %vm3224_vm15, %v5730_v3, %v3221_v53  ;;  %v6630_v51 = vsub.f32 %v6597_v49, %v6614_v42  ;;  %vm4703_vm15 = vcmask 517376  }
 0x92e   :  { %v3247_v32 = vmul.f32 %v3225_v16, %v6587_v19 }
 0x92f   :  { %v3229_v45 = vmul.f32 0.5, %v3228_v8  ;;  %v3623_v53 = vand.u32 4294901760, %v6630_v51 }
 0x930   :  { %v3254_v26 = vsel %vm367_vm1, %v3247_v32, 0 }
 0x931   :  { %v3230_v33 = vsub.f32 1.5, %v3229_v45  ;;  %v3192_v35 = vpop.xlane.xlu0 %3191  ;;  %v6638_v45 = vand.u32 4294901760, %v6587_v19 }
 0x932   :  { %v5734_v12 = vpop.eup %5733  ;;  %v3202_v6 = vmax.f32 %v3192_v35, 1e-24  ;;  %v6648_v35 = vand.u32 4294901760, %v6601_v25 }
 0x933   :  { %v3231_v7 = vmul.f32 %v5732_v31, %v3230_v33  ;;  %v3237_v11 = vmul.f32 %v5734_v12, %v3205_v23  ;;  %vm3243_vm2 = vweird.f32 %v5734_v12  ;;  %v6626_v23 = vand.u32 4294901760, %v3254_v26 }
 0x934   :  { %5735 = vrsqrt.f32 %v3202_v6  ;;  %vm3244_vm4 = vmor %vm3242_vm3, %vm3243_vm2  ;;  %vm3212_vm6 = vweird.f32 %v3202_v6  ;;  %vm4366_vm2 = vcmask 0  }
 0x935   :  { %v3235_v2 = vsel %vm3234_vm13, %v5732_v31, %v3231_v7  ;;  %v3238_v14 = vmul.f32 %v5734_v12, %v3237_v11  ;;  %v6624_v31 = vand.u32 4294901760, %v6592_v47 }
 0x936   :  { %v3248_v52 = vmul.f32 %v3235_v2, %v6592_v47 }
 0x937   :  { %v3239_v41 = vmul.f32 0.5, %v3238_v14  ;;  %v6656_v7 = vsub.f32 %v6592_v47, %v6624_v31  ;;  %v6666_v14 = vsub.f32 %v6587_v19, %v6638_v45  ;;  %v3624_v19 = vsub.f32 %v6630_v51, %v3623_v53 }
 0x938   :  { %v3257_v27 = vsel %vm367_vm1, %v3248_v52, 0 }
 0x939   :  { %v3240_v10 = vsub.f32 1.5, %v3239_v41  ;;  %v6610_v30 = vand.u32 4294901760, %v3257_v27  ;;  %v3629_v16 = vand.u32 4294901760, %v6656_v7  ;;  %v3635_v32 = vand.u32 4294901760, %v6666_v14 }
 0x93a   :  { %v5736_v37 = vpop.eup %5735 }
 0x93b   :  { %v3241_v21 = vmul.f32 %v5734_v12, %v3240_v10  ;;  %v3207_v29 = vmul.f32 %v5736_v37, %v3202_v6  ;;  %vm3213_vm5 = vweird.f32 %v5736_v37  ;;  %v6621_v28 = vsub.f32 %v3257_v27, %v6610_v30 }
 0x93c   :  { %vm3214_vm7 = vmor %vm3212_vm6, %vm3213_vm5  ;;  %v6652_v6 = vsub.f32 %v3254_v26, %v6626_v23 }
 0x93d   :  { %v3245_v38 = vsel %vm3244_vm4, %v5734_v12, %v3241_v21  ;;  %v3208_v39 = vmul.f32 %v5736_v37, %v3207_v29 }
 0x93e   :  { %v3249_v20 = vmul.f32 %v3245_v38, %v6597_v49  ;;  %v6645_v49 = vand.u32 4294901760, %v6621_v28  ;;  %v3292_v10 = vand.u32 4294901760, %v6652_v6 }
 0x93f   :  { %v3209_v3 = vmul.f32 0.5, %v3208_v39 }
 0x940   :  { %v3260_v36 = vsel %vm367_vm1, %v3249_v20, 0  ;;  %v3301_v41 = vsub.f32 %v6621_v28, %v6645_v49  ;;  %v3293_v38 = vsub.f32 %v6652_v6, %v3292_v10  ;;  %v3625_v20 = vand.u32 4294901760, %v3624_v19 }
 0x941   :  { %v6618_v44 = vand.u32 4294901760, %v3260_v36  ;;  %v3210_v48 = vsub.f32 1.5, %v3209_v3  ;;  %v3636_v3 = vsub.f32 %v6666_v14, %v3635_v32  ;;  %v1780_v19 = vadd.f32 %v6359_v1, %v6365_v59 }
 0x942   :  { %v6688_v21 = vand.u32 4294901760, %v3301_v41  ;;  %v1784_v41 = vadd.f32 %v6367_v60, %v6373_v63  ;;  %v1776_v60 = vadd.f32 %v6351_v24, %v6357_v56 }
 0x943   :  { %v3211_v43 = vmul.f32 %v5736_v37, %v3210_v48  ;;  %3275 = vmatpush.xpose.msrb.mxu0 %v6618_v44  ;;  %3426 = vmatpush.xpose.msrb.mxu3 %v6618_v44  ;;  %v6635_v8 = vsub.f32 %v3260_v36, %v6618_v44  ;;  %v1823_v1 = vadd.f32 %v6353_v54, %v1780_v19 }
 0x944   :  { %v1828_v63 = vadd.f32 %v6361_v57, %v1784_v41 }
 0x945   :  { %v3215_v46 = vsel %vm3214_vm7, %v5736_v37, %v3211_v43  ;;  %3382 = vmatpush.xpose.msrb.mxu2 %v6635_v8  ;;  %v6642_v33 = vand.u32 4294901760, %v6635_v8  ;;  %v6679_v37 = vsub.f32 %v6601_v25, %v6648_v35  ;;  %v3294_v43 = vand.u32 4294901760, %v3293_v38 }
 0x946   :  { %v3246_v12 = vmul.f32 %v3215_v46, %v6601_v25  ;;  %v3630_v25 = vsub.f32 %v6656_v7, %v3629_v16  ;;  %v1872_v24 = vadd.f32 %v6363_v58, %v1828_v63  ;;  %v1866_v54 = vadd.f32 %v6355_v55, %v1823_v1 }
 0x947   :  { %3277 = vmatpush.xpose.msrb.mxu0 %v6610_v30  ;;  %3428 = vmatpush.xpose.msrb.mxu3 %v6610_v30  ;;  %v3309_v11 = vsub.f32 %v6635_v8, %v6642_v33  ;;  %v3641_v39 = vand.u32 4294901760, %v6679_v37 }
 0x948   :  { %v3251_v2 = vsel %vm367_vm1, %v3246_v12, 0  ;;  %v3631_v48 = vand.u32 4294901760, %v3630_v25  ;;  %v3637_v12 = vand.u32 4294901760, %v3636_v3  ;;  %v1919_v57 = vadd.f32 %v6389_v17, %v1872_v24 }
 0x949   :  { %v6668_v52 = vand.u32 4294901760, %v3251_v2  ;;  %3385 = vmatpush.xpose.msrb.mxu2 %v6621_v28  ;;  %v6671_v47 = vand.u32 4294901760, %v3309_v11  ;;  %v3642_v46 = vsub.f32 %v6679_v37, %v3641_v39  ;;  %v1915_v58 = vadd.f32 %v6385_v13, %v1866_v54 }
 0x94a   :  { %v1956_v55 = vadd.f32 %v6387_v15, %v1919_v57 }
 0x94b   :  { %3279 = vmatpush.xpose.msrb.mxu0 %v6626_v23  ;;  %3332 = vmatpush.xpose.msrb.mxu1 %v6671_v47  ;;  %v3283_v27 = vsub.f32 %v3251_v2, %v6668_v52  ;;  %v3643_v11 = vand.u32 4294901760, %v3642_v46  ;;  %v1788_v2 = vadd.f32 %v6375_v0, %v6377_v4  ;;  %v1952_v17 = vadd.f32 %v6383_v40, %v1915_v58 }
 0x94c   :  { %3430 = vmatpush.xpose.msrb.mxu3 %v6626_v23  ;;  %v6754_v13 = vand.u32 4294901760, %v1956_v55 }
 0x94d   :  { %3388 = vmatpush.xpose.msrb.mxu2 %v6652_v6  ;;  %v3284_v29 = vand.u32 4294901760, %v3283_v27  ;;  %v1833_v0 = vadd.f32 %v6369_v61, %v1788_v2  ;;  %v1818_v61 = vadd.f32 %v6347_v34, %v1776_v60 }
 0x94f   :  { %3281 = vmatpush.xpose.msrb.mxu0 %v6668_v52  ;;  %3338 = vmatpush.xpose.msrb.mxu1 %v6688_v21  ;;  %v3285_v26 = vsub.f32 %v3283_v27, %v3284_v29  ;;  %v1878_v59 = vadd.f32 %v6371_v62, %v1833_v0  ;;  %v1860_v34 = vadd.f32 %v6349_v50, %v1818_v61 }
 0x950   :  { %3432 = vmatpush.xpose.msrb.mxu3 %v6668_v52 }
 0x951   :  { %3391 = vmatpush.xpose.msrb.mxu2 %v3283_v27  ;;  %v3286_v36 = vand.u32 4294901760, %v3285_v26  ;;  %v1923_v56 = vadd.f32 %v6393_v22, %v1878_v59  ;;  %v1911_v4 = vadd.f32 %v6381_v9, %v1860_v34  ;;  %v6758_v9 = vand.u32 4294901760, %v1952_v17  ;;  %v5744_v34 = vld [vmem:[%s7431_s11 + $0x8] sm:$0xff] }
 0x953   :  { %3473 = vmatpush.xpose.msra.mxu0 %v6642_v33  ;;  %3436 = vmatmul.f32.vlgmr.msrb.gmra.mxu3 %v3284_v29  ;;  %v1960_v62 = vadd.f32 %v6391_v18, %v1923_v56  ;;  %v1948_v50 = vadd.f32 %v6379_v5, %v1911_v4  ;;  %v6766_v18 = vsub.f32 %v1956_v55, %v6754_v13 }
 0x954   :  { %3626 = vmatpush.msra.mxu3 %v3625_v20  ;;  %3287 = vmatmul.f32.vlgmr.msrb.gmra.mxu0 %v3286_v36 }
 0x955   :  { %3569 = vmatpush.msra.mxu2 %v6614_v42  ;;  %3344 = vmatpush.xpose.msrb.mxu1 %v3294_v43  ;;  %v6747_v22 = vand.u32 4294901760, %v1960_v62  ;;  %v6763_v15 = vand.u32 4294901760, %v1948_v50 }
 0x956   :  { %3632 = vmatpush.msra.mxu3 %v3631_v48  ;;  %3394 = vmatmul.f32.vlgmr.msrb.gmra.mxu2 %v3283_v27 }
 0x957   :  { %3477 = vmatpush.xpose.msra.mxu0 %v6645_v49  ;;  %3571 = vmatpush.msra.mxu2 %v6624_v31  ;;  %v6761_v40 = vsub.f32 %v1960_v62, %v6747_v22 }
 0x958   :  { %3638 = vmatpush.msra.mxu3 %v3637_v12  ;;  %v5743_v12 = vld [vmem:[%s7431_s11] sm:$0xff] }
 0x959   :  { %3573 = vmatpush.msra.mxu2 %v6638_v45  ;;  %3350 = vmatpush.xpose.msrb.mxu1 %v3286_v36  ;;  %v3893_v5 = vand.u32 4294901760, %v6761_v40 }
 0x95a   :  { %3644 = vmatpush.msra.mxu3 %v3643_v11 }
 0x95b   :  { %3481 = vmatpush.xpose.msra.mxu0 %v3292_v10  ;;  %3575 = vmatpush.msra.mxu2 %v6648_v35 }
 0x95c   :  { %3810 = vmatpush.msrb.mxu3 %v6614_v42  ;;  %3352 = vmatmul.f32.vlgmr.msrb.gmra.mxu1 %v6668_v52 }
 0x95d   :  { %3516 = vmatpush.xpose.msra.mxu1 %v6618_v44  ;;  %3767 = vmatpush.msrb.mxu2 %v3623_v53 }
 0x95e   :  { %3812 = vmatpush.msrb.mxu3 %v6624_v31  ;;  %3295 = vmatmul.f32.gmra.mxu0 %v3294_v43 }
 0x95f   :  { %3442 = vmatmul.f32.gmra.mxu3 %v3292_v10  ;;  %3771 = vmatpush.msrb.mxu2 %v3629_v16 }
 0x960   :  { %3814 = vmatpush.msrb.mxu3 %v6638_v45  ;;  %3399 = vmatmul.f32.gmra.mxu2 %v6652_v6 }
 0x961   :  { %3485 = vmatpush.xpose.msra.mxu0 %v3284_v29  ;;  %3518 = vmatpush.xpose.msra.mxu1 %v6610_v30 }
 0x962   :  { %3775 = vmatpush.msrb.mxu2 %v3635_v32  ;;  %3816 = vmatpush.msrb.mxu3 %v6648_v35 }
 0x964   :  { %3779 = vmatpush.msrb.mxu2 %v3641_v39  ;;  %3356 = vmatmul.f32.gmra.mxu1 %v6626_v23 }
 0x965   :  { %3676 = vmatpush.msrb.mxu0 %v6630_v51  ;;  %3520 = vmatpush.xpose.msra.mxu1 %v6626_v23  ;;  %v3894_v51 = vsub.f32 %v6761_v40, %v3893_v5 }
 0x966   :  { %3303 = vmatmul.f32.gmra.mxu0 %v6688_v21 }
 0x967   :  { %3679 = vmatpush.msrb.mxu0 %v6656_v7  ;;  %3448 = vmatmul.f32.gmra.mxu3 %v6645_v49  ;;  %v3895_v49 = vand.u32 4294901760, %v3894_v51 }
 0x968   :  { %3404 = vmatmul.f32.gmra.mxu2 %v6621_v28  ;;  %v6775_v28 = vsub.f32 %v1948_v50, %v6763_v15 }
 0x969   :  { %3682 = vmatpush.msrb.mxu0 %v6666_v14  ;;  %3522 = vmatpush.xpose.msra.mxu1 %v6668_v52 }
 0x96b   :  { %3685 = vmatpush.msrb.mxu0 %v6679_v37 }
 0x96c   :  { %3360 = vmatmul.f32.gmra.mxu1 %v6610_v30 }
 0x96d   :  { %3720 = vmatpush.msrb.mxu1 %v6614_v42  ;;  %v6769_v42 = vsub.f32 %v1952_v17, %v6758_v9 }
 0x96e   :  { %3311 = vmatmul.f32.gmra.mxu0 %v6671_v47 }
 0x96f   :  { %3722 = vmatpush.msrb.mxu1 %v6624_v31  ;;  %3454 = vmatmul.f32.gmra.mxu3 %v6642_v33  ;;  %v3899_v31 = vand.u32 4294901760, %v6766_v18  ;;  %v3911_v33 = vand.u32 4294901760, %v6775_v28 }
 0x970   :  { %3409 = vmatmul.f32.gmra.mxu2 %v6635_v8  ;;  %v3905_v8 = vand.u32 4294901760, %v6769_v42 }
 0x971   :  { %3724 = vmatpush.msrb.mxu1 %v6638_v45  ;;  %v3900_v45 = vsub.f32 %v6766_v18, %v3899_v31  ;;  %v3912_v7 = vsub.f32 %v6775_v28, %v3911_v33 }
 0x973   :  { %3726 = vmatpush.msrb.mxu1 %v6648_v35  ;;  %v3906_v35 = vsub.f32 %v6769_v42, %v3905_v8  ;;  %v3901_v6 = vand.u32 4294901760, %v3900_v45  ;;  %v3913_v14 = vand.u32 4294901760, %v3912_v7 }
 0x974   :  { %3364 = vmatmul.f32.gmra.mxu1 %v6618_v44 }
 0x975   :  { %v3907_v53 = vand.u32 4294901760, %v3906_v35 }
 0x976   :  { %3487 = vmatmul.f32.vlgmr.msra.gmra.mxu0 %v6668_v52 }
 0x977   :  { %3855 = vmatpush.msra.mxu0 %v6747_v22 }
 0x979   :  { %3857 = vmatpush.msra.mxu0 %v6754_v13 }
 0x97b   :  { %3859 = vmatpush.msra.mxu0 %v6758_v9 }
 0x97c   :  { %3524 = vmatmul.f32.vlgmr.msra.gmra.mxu1 %v6668_v52 }
 0x97d   :  { %3861 = vmatpush.msra.mxu0 %v6763_v15  ;;  %3896 = vmatpush.msra.mxu1 %v3895_v49 }
 0x97e   :  { %3491 = vmatmul.f32.gmra.mxu0 %v6626_v23 }
 0x97f   :  { %3902 = vmatpush.msra.mxu1 %v3901_v6 }
 0x981   :  { %3908 = vmatpush.msra.mxu1 %v3907_v53 }
 0x983   :  { %3914 = vmatpush.msra.mxu1 %v3913_v14 }
 0x984   :  { %3528 = vmatmul.f32.gmra.mxu1 %v6626_v23 }
 0x986   :  { %3495 = vmatmul.f32.gmra.mxu0 %v6610_v30 }
 0x98c   :  { %3532 = vmatmul.f32.gmra.mxu1 %v6610_v30 }
 0x98e   :  { %3499 = vmatmul.f32.gmra.mxu0 %v6618_v44 }
 0x994   :  { %3536 = vmatmul.f32.gmra.mxu1 %v6618_v44 }
 0x9d1   :  { %v3288_v52 = vpop.f32.mrf.mxu0 }
 0x9d6   :  { %v3437_v29 = vpop.f32.mrf.mxu3 }
 0x9d9   :  { %v3353_v47 = vpop.f32.mrf.mxu1  ;;  %v3395_v21 = vpop.f32.mrf.mxu2 }
 0x9da   :  { %v3354_v25 = vadd.f32 %v3353_v47, %v3288_v52 }
 0x9db   :  { %v3296_v16 = vpop.f32.mrf.mxu0 }
 0x9dc   :  { %v3396_v39 = vadd.f32 %v3395_v21, %v3354_v25 }
 0x9de   :  { %v3438_v30 = vadd.f32 %v3437_v29, %v3396_v39  ;;  %v3834_v39 = vld [vmem:[%s7432_s12] sm:$0xff] }
 0x9e1   :  { %v3357_v10 = vpop.f32.mrf.mxu1 }
 0x9e2   :  { %v3358_v26 = vadd.f32 %v3357_v10, %v3296_v16  ;;  %v3443_v3 = vpop.f32.mrf.mxu3 }
 0x9e3   :  { %v3304_v37 = vpop.f32.mrf.mxu0  ;;  %v3400_v20 = vpop.f32.mrf.mxu2 }
 0x9e4   :  { %v3401_v43 = vadd.f32 %v3400_v20, %v3358_v26  ;;  %v3837_v20 = vsel %vm367_vm1, %v3834_v39, 0 }
 0x9e5   :  { %v3862_v26 = vand.u32 4294901760, %v3837_v20 }
 0x9e6   :  { %v3444_v19 = vadd.f32 %v3443_v3, %v3401_v43 }
 0x9e9   :  { %v3361_v27 = vpop.f32.mrf.mxu1 }
 0x9ea   :  { %v3362_v2 = vadd.f32 %v3361_v27, %v3304_v37  ;;  %v3449_v56 = vpop.f32.mrf.mxu3 }
 0x9eb   :  { %v3312_v32 = vpop.f32.mrf.mxu0  ;;  %v3405_v0 = vpop.f32.mrf.mxu2 }
 0x9ec   :  { %v3406_v61 = vadd.f32 %v3405_v0, %v3362_v2 }
 0x9ee   :  { %v3450_v17 = vadd.f32 %v3449_v56, %v3406_v61 }
 0x9f1   :  { %v3365_v38 = vpop.f32.mrf.mxu1 }
 0x9f2   :  { %v3366_v4 = vadd.f32 %v3365_v38, %v3312_v32  ;;  %v3455_v7 = vpop.f32.mrf.mxu3 }
 0x9f3   :  { %v3488_v23 = vpop.f32.mrf.mxu0 }
 0x9f4   :  { %v3489_v36 = vadd.f32 %v3488_v23, %v3438_v30  ;;  %v3863_v30 = vsub.f32 %v3837_v20, %v3862_v26 }
 0x9f6   :  { %v3864_v3 = vand.u32 4294901760, %v3863_v30 }
 0x9f9   :  { %v3525_v48 = vpop.f32.mrf.mxu1 }
 0x9fa   :  { %v3526_v46 = vadd.f32 %v3525_v48, %v3489_v36  ;;  %v3865_v36 = vsub.f32 %v3863_v30, %v3864_v3  ;;  %v3835_v48 = vld [vmem:[%s7432_s12 + $0x8] sm:$0xff]  ;;  %s5674_s12 = sshll.u32 %s7443_s24, 4  ;;  %s5675_s12 = int_to_ptr.hbm [resolvable:$true] %s5674_s12 }
 0x9fb   :  { %v3492_v44 = vpop.f32.mrf.mxu0 }
 0x9fc   :  { %v3540_v11 = vmul.f32 %v5743_v12, %v3526_v46  ;;  %v3493_v63 = vadd.f32 %v3492_v44, %v3444_v19  ;;  %v3840_v44 = vsel %vm367_vm1, %v3835_v48, 0  ;;  %v3866_v43 = vand.u32 4294901760, %v3865_v36 }
 0x9fd   :  { %v3870_v46 = vand.u32 4294901760, %v3840_v44 }
 0x9fe   :  { %v3545_v41 = vsel %vm367_vm1, %v3540_v11, 0 }
 0x9ff   :  { %v6807_v60 = vand.u32 4294901760, %v3545_v41  ;;  %v3871_v12 = vsub.f32 %v3840_v44, %v3870_v46 }
 0xa01   :  { %v3577_v1 = vsub.f32 %v3545_v41, %v6807_v60  ;;  %v3529_v59 = vpop.f32.mrf.mxu1  ;;  %3646 = vmatmul.f32.vlgmr.msra.gmra.mxu3 %v6807_v60  ;;  %v3872_v11 = vand.u32 4294901760, %v3871_v12 }
 0xa02   :  { %v3530_v24 = vadd.f32 %v3529_v59, %v3493_v63  ;;  %3972 = vmatpush.msra.mxu3 %v6747_v22 }
 0xa03   :  { %v3578_v54 = vand.u32 4294901760, %v3577_v1  ;;  %v3496_v57 = vpop.f32.mrf.mxu0  ;;  %3688 = vmatmul.f32.vlgmr.msrb.gmra.mxu0 %v3577_v1  ;;  %v3873_v2 = vsub.f32 %v3871_v12, %v3872_v11 }
 0xa04   :  { %v3541_v58 = vmul.f32 %v5744_v34, %v3530_v24  ;;  %3974 = vmatpush.msra.mxu3 %v6754_v13  ;;  %4007 = vmatpush.msrb.mxu0 %v3893_v5  ;;  %v3497_v45 = vadd.f32 %v3496_v57, %v3450_v17  ;;  %v3410_v5 = vpop.f32.mrf.mxu2 }
 0xa05   :  { %v3579_v62 = vsub.f32 %v3577_v1, %v3578_v54  ;;  %3730 = vmatmul.f32.vlgmr.msrb.gmra.mxu1 %v3578_v54  ;;  %v3411_v6 = vadd.f32 %v3410_v5, %v3366_v4  ;;  %v3874_v41 = vand.u32 4294901760, %v3873_v2 }
 0xa06   :  { %v3548_v55 = vsel %vm367_vm1, %v3541_v58, 0  ;;  %3976 = vmatpush.msra.mxu3 %v6758_v9  ;;  %4011 = vmatpush.msrb.mxu0 %v3899_v31 }
 0xa07   :  { %v3580_v50 = vand.u32 4294901760, %v3579_v62  ;;  %v6822_v51 = vand.u32 4294901760, %v3548_v55  ;;  %4042 = vmatpush.msrb.mxu1 %v6747_v22  ;;  %v3456_v52 = vadd.f32 %v3455_v7, %v3411_v6 }
 0xa08   :  { %3978 = vmatpush.msra.mxu3 %v6763_v15  ;;  %4015 = vmatpush.msrb.mxu0 %v3905_v8 }
 0xa09   :  { %4044 = vmatpush.msrb.mxu1 %v6754_v13  ;;  %v3533_v49 = vpop.f32.mrf.mxu1  ;;  %3581 = vmatmul.f32.vlgmr.msra.gmra.mxu2 %v3580_v50  ;;  %v3585_v35 = vsub.f32 %v3548_v55, %v6822_v51  ;;  %v5745_v13 = vld [vmem:[%s7431_s11 + $0x10] sm:$0xff] }
 0xa0a   :  { %v3534_v31 = vadd.f32 %v3533_v49, %v3497_v45  ;;  %3650 = vmatmul.f32.gmra.mxu3 %v6822_v51  ;;  %3938 = vmatpush.msra.mxu2 %v6761_v40 }
 0xa0b   :  { %4019 = vmatpush.msrb.mxu0 %v3911_v33  ;;  %4046 = vmatpush.msrb.mxu1 %v6758_v9  ;;  %v3586_v22 = vand.u32 4294901760, %v3585_v35  ;;  %v3500_v53 = vpop.f32.mrf.mxu0 }
 0xa0c   :  { %v3542_v8 = vmul.f32 %v5745_v13, %v3534_v31  ;;  %3693 = vmatmul.f32.gmra.mxu0 %v3585_v35  ;;  %3941 = vmatpush.msra.mxu2 %v6766_v18  ;;  %v3501_v47 = vadd.f32 %v3500_v53, %v3456_v52  ;;  %v4058_v53 = vld [vmem:[%s7433_s13] sm:$0xff] }
 0xa0d   :  { %4048 = vmatpush.msrb.mxu1 %v6763_v15  ;;  %v3587_v14 = vsub.f32 %v3585_v35, %v3586_v22  ;;  %v5746_v15 = vld [vmem:[%s7431_s11 + $0x18] sm:$0xff]  ;;  %s5672_s11 = sshll.u32 %s5803_s21, 4  ;;  %s5673_s11 = int_to_ptr.vmem [resolvable:$true] %s5672_s11 }
 0xa0e   :  { %v3551_v40 = vsel %vm367_vm1, %v3542_v8, 0  ;;  %3736 = vmatmul.f32.gmra.mxu1 %v3586_v22  ;;  %3944 = vmatpush.msra.mxu2 %v6769_v42 }
 0xa0f   :  { %v3592_v9 = vand.u32 4294901760, %v3551_v40  ;;  %v3588_v33 = vand.u32 4294901760, %v3587_v14 }
 0xa10   :  { %3947 = vmatpush.msra.mxu2 %v6775_v28 }
 0xa11   :  { %v3537_v16 = vpop.f32.mrf.mxu1  ;;  %3589 = vmatmul.f32.gmra.mxu2 %v3588_v33  ;;  %v3593_v10 = vsub.f32 %v3551_v40, %v3592_v9 }
 0xa12   :  { %v3538_v18 = vadd.f32 %v3537_v16, %v3501_v47  ;;  %3654 = vmatmul.f32.gmra.mxu3 %v3592_v9 }
 0xa13   :  { %v3594_v37 = vand.u32 4294901760, %v3593_v10 }
 0xa14   :  { %v3543_v27 = vmul.f32 %v5746_v15, %v3538_v18  ;;  %3698 = vmatmul.f32.gmra.mxu0 %v3593_v10 }
 0xa15   :  { %v3595_v32 = vsub.f32 %v3593_v10, %v3594_v37  ;;  %v4061_v10 = vsel %vm367_vm1, %v4058_v53, 0 }
 0xa16   :  { %v3554_v42 = vsel %vm367_vm1, %v3543_v27, 0  ;;  %3742 = vmatmul.f32.gmra.mxu1 %v3594_v37  ;;  %v6863_v27 = vand.u32 4294901760, %v4061_v10 }
 0xa17   :  { %v3600_v21 = vand.u32 4294901760, %v3554_v42  ;;  %v3596_v29 = vand.u32 4294901760, %v3595_v32 }
 0xa18   :  { %v6871_v39 = vsub.f32 %v4061_v10, %v6863_v27 }
 0xa19   :  { %3597 = vmatmul.f32.gmra.mxu2 %v3596_v29  ;;  %v3601_v28 = vsub.f32 %v3554_v42, %v3600_v21  ;;  %v4059_v29 = vld [vmem:[%s7433_s13 + $0x8] sm:$0xff] }
 0xa1a   :  { %3658 = vmatmul.f32.gmra.mxu3 %v3600_v21 }
 0xa1b   :  { %v3602_v25 = vand.u32 4294901760, %v3601_v28 }
 0xa1c   :  { %3703 = vmatmul.f32.gmra.mxu0 %v3601_v28 }
 0xa1d   :  { %v3603_v38 = vsub.f32 %v3601_v28, %v3602_v25 }
 0xa1e   :  { %3748 = vmatmul.f32.gmra.mxu1 %v3602_v25 }
 0xa1f   :  { %v3604_v23 = vand.u32 4294901760, %v3603_v38 }
 0xa21   :  { %3605 = vmatmul.f32.gmra.mxu2 %v3604_v23 }
 0xa22   :  { %3818 = vmatmul.f32.vlgmr.msrb.gmra.mxu3 %v6807_v60 }
 0xa24   :  { %3867 = vmatmul.f32.vlgmr.msra.gmra.mxu0 %v3866_v43  ;;  %v4088_v43 = vand.u32 4294901760, %v6871_v39 }
 0xa26   :  { %3916 = vmatmul.f32.vlgmr.msra.gmra.mxu1 %v3862_v26 }
 0xa29   :  { %3781 = vmatmul.f32.vlgmr.msrb.gmra.mxu2 %v6807_v60 }
 0xa2a   :  { %3822 = vmatmul.f32.gmra.mxu3 %v6822_v51 }
 0xa2c   :  { %3875 = vmatmul.f32.gmra.mxu0 %v3874_v41 }
 0xa2e   :  { %3920 = vmatmul.f32.gmra.mxu1 %v3870_v46 }
 0xa31   :  { %3785 = vmatmul.f32.gmra.mxu2 %v6822_v51 }
 0xa32   :  { %3826 = vmatmul.f32.gmra.mxu3 %v3592_v9 }
 0xa34   :  { %4021 = vmatmul.f32.vlgmr.msrb.gmra.mxu0 %v3862_v26 }
 0xa36   :  { %4050 = vmatmul.f32.vlgmr.msrb.gmra.mxu1 %v3862_v26 }
 0xa39   :  { %3789 = vmatmul.f32.gmra.mxu2 %v3592_v9 }
 0xa3a   :  { %3830 = vmatmul.f32.gmra.mxu3 %v3600_v21 }
 0xa3c   :  { %4025 = vmatmul.f32.gmra.mxu0 %v3870_v46 }
 0xa3e   :  { %4054 = vmatmul.f32.gmra.mxu1 %v3870_v46 }
 0xa41   :  { %3793 = vmatmul.f32.gmra.mxu2 %v3600_v21 }
 0xa42   :  { %3982 = vmatmul.f32.vlgmr.msra.gmra.mxu3 %v3864_v3  ;;  %v4064_v3 = vsel %vm367_vm1, %v4059_v29, 0 }
 0xa43   :  { %v6880_v46 = vand.u32 4294901760, %v4064_v3 }
 0xa49   :  { %3950 = vmatmul.f32.vlgmr.msra.gmra.mxu2 %v3863_v30 }
 0xa4a   :  { %3988 = vmatmul.f32.gmra.mxu3 %v3872_v11 }
 0xa51   :  { %3955 = vmatmul.f32.gmra.mxu2 %v3871_v12 }
 0xa80   :  { %v3689_v63 = vpop.f32.mrf.mxu0 }
 0xa82   :  { %v3731_v1 = vpop.f32.mrf.mxu1 }
 0xa84   :  { %v3647_v19 = vpop.f32.mrf.mxu3 }
 0xa89   :  { %v3694_v24 = vpop.f32.mrf.mxu0 }
 0xa8b   :  { %v3737_v57 = vpop.f32.mrf.mxu1 }
 0xa8c   :  { %v3582_v0 = vpop.f32.mrf.mxu2 }
 0xa8d   :  { %v3651_v60 = vpop.f32.mrf.mxu3  ;;  %v3648_v35 = vadd.f32 %v3647_v19, %v3582_v0 }
 0xa8f   :  { %v3690_v8 = vadd.f32 %v3689_v63, %v3648_v35  ;;  %v4089_v63 = vsub.f32 %v6871_v39, %v4088_v43 }
 0xa91   :  { %v3699_v62 = vpop.f32.mrf.mxu0  ;;  %v3732_v33 = vadd.f32 %v3731_v1, %v3690_v8 }
 0xa93   :  { %v3743_v4 = vpop.f32.mrf.mxu1 }
 0xa94   :  { %v3590_v59 = vpop.f32.mrf.mxu2 }
 0xa95   :  { %v3655_v61 = vpop.f32.mrf.mxu3  ;;  %v3652_v45 = vadd.f32 %v3651_v60, %v3590_v59  ;;  %v6891_v59 = vsub.f32 %v4064_v3, %v6880_v46 }
 0xa97   :  { %v3695_v6 = vadd.f32 %v3694_v24, %v3652_v45 }
 0xa99   :  { %v3704_v50 = vpop.f32.mrf.mxu0  ;;  %v3738_v40 = vadd.f32 %v3737_v57, %v3695_v6 }
 0xa9b   :  { %v3749_v51 = vpop.f32.mrf.mxu1 }
 0xa9c   :  { %v3598_v56 = vpop.f32.mrf.mxu2 }
 0xa9d   :  { %v3659_v54 = vpop.f32.mrf.mxu3  ;;  %v3656_v5 = vadd.f32 %v3655_v61, %v3598_v56 }
 0xa9f   :  { %v3700_v31 = vadd.f32 %v3699_v62, %v3656_v5 }
 0xaa1   :  { %v3868_v13 = vpop.f32.mrf.mxu0  ;;  %v3744_v52 = vadd.f32 %v3743_v4, %v3700_v31 }
 0xaa3   :  { %v3917_v7 = vpop.f32.mrf.mxu1 }
 0xaa4   :  { %v3606_v34 = vpop.f32.mrf.mxu2  ;;  %v3918_v2 = vadd.f32 %v3917_v7, %v3868_v13 }
 0xaa5   :  { %v3819_v58 = vpop.f32.mrf.mxu3  ;;  %v3660_v14 = vadd.f32 %v3659_v54, %v3606_v34 }
 0xaa7   :  { %v3705_v18 = vadd.f32 %v3704_v50, %v3660_v14 }
 0xaa9   :  { %v3876_v21 = vpop.f32.mrf.mxu0  ;;  %v3750_v38 = vadd.f32 %v3749_v51, %v3705_v18 }
 0xaab   :  { %v3921_v20 = vpop.f32.mrf.mxu1 }
 0xaac   :  { %v3782_v55 = vpop.f32.mrf.mxu2  ;;  %v3922_v45 = vadd.f32 %v3921_v20, %v3876_v21 }
 0xaad   :  { %v3823_v17 = vpop.f32.mrf.mxu3  ;;  %v3783_v37 = vadd.f32 %v3782_v55, %v3732_v33  ;;  %v4090_v55 = vand.u32 4294901760, %v4089_v63 }
 0xaaf   :  { %v3820_v28 = vadd.f32 %v3819_v58, %v3783_v37 }
 0xab1   :  { %v6876_v36 = vand.u32 4294901760, %v3820_v28  ;;  %v4022_v61 = vpop.f32.mrf.mxu0 }
 0xab3   :  { %v4134_v0 = vsub.f32 %v3820_v28, %v6876_v36  ;;  %v4051_v57 = vpop.f32.mrf.mxu1 }
 0xab4   :  { %v3786_v49 = vpop.f32.mrf.mxu2 }
 0xab5   :  { %v3827_v22 = vpop.f32.mrf.mxu3  ;;  %v3787_v47 = vadd.f32 %v3786_v49, %v3738_v40  ;;  %v4135_v62 = vand.u32 4294901760, %v4134_v0 }
 0xab7   :  { %v3824_v32 = vadd.f32 %v3823_v17, %v3787_v47  ;;  %v4096_v17 = vand.u32 4294901760, %v6891_v59  ;;  %v4136_v35 = vsub.f32 %v4134_v0, %v4135_v62 }
 0xab9   :  { %v6873_v26 = vand.u32 4294901760, %v3824_v32  ;;  %v4097_v8 = vsub.f32 %v6891_v59, %v4096_v17  ;;  %v4026_v14 = vpop.f32.mrf.mxu0  ;;  %v4137_v40 = vand.u32 4294901760, %v4136_v35 }
 0xabb   :  { %v4128_v11 = vsub.f32 %v3824_v32, %v6873_v26  ;;  %v4098_v33 = vand.u32 4294901760, %v4097_v8 }
 0xabc   :  { %v3790_v9 = vpop.f32.mrf.mxu2 }
 0xabd   :  { %v3791_v16 = vadd.f32 %v3790_v9, %v3744_v52  ;;  %v3831_v42 = vpop.f32.mrf.mxu3  ;;  %v4129_v56 = vand.u32 4294901760, %v4128_v11  ;;  %v4055_v9 = vpop.f32.mrf.mxu1 }
 0xabf   :  { %v3828_v15 = vadd.f32 %v3827_v22, %v3791_v16  ;;  %v4130_v51 = vsub.f32 %v4128_v11, %v4129_v56 }
 0xac1   :  { %v6868_v25 = vand.u32 4294901760, %v3828_v15  ;;  %v4131_v13 = vand.u32 4294901760, %v4130_v51 }
 0xac3   :  { %v4122_v44 = vsub.f32 %v3828_v15, %v6868_v25 }
 0xac4   :  { %v3794_v23 = vpop.f32.mrf.mxu2 }
 0xac5   :  { %v3795_v30 = vadd.f32 %v3794_v23, %v3750_v38  ;;  %v3983_v41 = vpop.f32.mrf.mxu3  ;;  %v4123_v60 = vand.u32 4294901760, %v4122_v44  ;;  %v5799_v23 = vmov 32.0  }
 0xac6   :  { %5737 = vrcp.f32 %v5799_v23 }
 0xac7   :  { %v3832_v48 = vadd.f32 %v3831_v42, %v3795_v30  ;;  %v4124_v58 = vsub.f32 %v4122_v44, %v4123_v60 }
 0xac9   :  { %v6882_v12 = vand.u32 4294901760, %v3832_v48  ;;  %v4125_v49 = vand.u32 4294901760, %v4124_v58 }
 0xacb   :  { %v4116_v19 = vsub.f32 %v3832_v48, %v6882_v12  ;;  %4079 = vmatpush.msrb.mxu2 %v6882_v12  ;;  %4196 = vmatpush.msra.mxu1 %v6882_v12 }
 0xacc   :  { %v3951_v1 = vpop.f32.mrf.mxu2  ;;  %v5738_v30 = vpop.eup %5737 }
 0xacd   :  { %4081 = vmatpush.msrb.mxu2 %v6868_v25  ;;  %4162 = vmatpush.msra.mxu0 %v4116_v19  ;;  %v4117_v24 = vand.u32 4294901760, %v4116_v19  ;;  %v3952_v54 = vadd.f32 %v3951_v1, %v3918_v2  ;;  %v3989_v22 = vpop.f32.mrf.mxu3  ;;  %v5701_v1 = vld [vmem:[#allocation2] ss:$0 sm:$0xff] }
 0xace   :  { %4198 = vmatpush.msra.mxu1 %v6868_v25 }
 0xacf   :  { %4083 = vmatpush.msrb.mxu2 %v6873_v26  ;;  %4165 = vmatpush.msra.mxu0 %v4122_v44  ;;  %v4118_v34 = vsub.f32 %v4116_v19, %v4117_v24  ;;  %v3984_v4 = vadd.f32 %v3983_v41, %v3952_v54  ;;  %v4289_v44 = vmul.f32 32.0, %v5738_v30 }
 0xad0   :  { %4200 = vmatpush.msra.mxu1 %v6873_v26 }
 0xad1   :  { %4085 = vmatpush.msrb.mxu2 %v6876_v36  ;;  %4168 = vmatpush.msra.mxu0 %v4128_v11  ;;  %v4119_v50 = vand.u32 4294901760, %v4118_v34  ;;  %v4023_v5 = vadd.f32 %v4022_v61, %v3984_v4  ;;  %v5800_v61 = vmov 0  }
 0xad2   :  { %4202 = vmatpush.msra.mxu1 %v6876_v36  ;;  %4091 = vmatmul.f32.vlgmr.msrb.gmra.mxu2 %v4090_v55 }
 0xad3   :  { %4231 = vmatpush.msra.mxu2 %v4117_v24  ;;  %4120 = vmatpush.msrb.mxu3 %v4119_v50  ;;  %v6900_v6 = vadd.f32 %v4051_v57, %v4023_v5 }
 0xad4   :  { %4171 = vmatpush.msra.mxu0 %v4134_v0  ;;  %v3956_v31 = vpop.f32.mrf.mxu2  ;;  %4206 = vmatmul.f32.vlgmr.msra.gmra.mxu1 %v4088_v43 }
 0xad5   :  { %4235 = vmatpush.msra.mxu2 %v4123_v60  ;;  %4174 = vmatmul.f32.vlgmr.msra.gmra.mxu0 %v6871_v39  ;;  %v3957_v7 = vadd.f32 %v3956_v31, %v3922_v45  ;;  %v4282_v53 = vsel %vm367_vm1, %v6900_v6, 0.0  ;;  %v4395_v10 = vand.u32 4294901760, %v6900_v6 }
 0xad6   :  { %4126 = vmatpush.msrb.mxu3 %v4125_v49  ;;  %4283 = vadd.xlane.f32.xlu2 %v4282_v53 }
 0xad7   :  { %4239 = vmatpush.msra.mxu2 %v4129_v56  ;;  %v3990_v52 = vadd.f32 %v3989_v22, %v3957_v7  ;;  %v4427_v32 = vsub.f32 %v6900_v6, %v4395_v10  ;;  %5695 = vset.pattern.permute.xlu1 %v5800_v61 }
 0xad8   :  { %4132 = vmatpush.msrb.mxu3 %v4131_v13  ;;  %5696 = vset.pattern.permute.xlu0 %v5800_v61 }
 0xad9   :  { %4243 = vmatpush.msra.mxu2 %v4135_v62  ;;  %v4027_v47 = vadd.f32 %v4026_v14, %v3990_v52  ;;  %v4428_v29 = vand.u32 4294901760, %v4427_v32  ;;  %4373 = vperm.xlu1 %5695, %v5701_v1  }
 0xada   :  { %4138 = vmatpush.msrb.mxu3 %v4137_v40  ;;  %4099 = vmatmul.f32.gmra.mxu2 %v4098_v33 }
 0xadb   :  { %4140 = vmatmul.f32.vlgmr.msrb.gmra.mxu3 %v6863_v27  ;;  %v6908_v16 = vadd.f32 %v4055_v9, %v4027_v47 }
 0xadc   :  { %4266 = vmatpush.msra.mxu3 %v6882_v12  ;;  %4212 = vmatmul.f32.gmra.mxu1 %v4096_v17 }
 0xadd   :  { %4179 = vmatmul.f32.gmra.mxu0 %v6891_v59  ;;  %v4393_v18 = vand.u32 4294901760, %v6908_v16  ;;  %v4285_v37 = vsel %vm367_vm1, %v6908_v16, 0.0 }
 0xade   :  { %4268 = vmatpush.msra.mxu3 %v6868_v25  ;;  %4286 = vadd.xlane.f32.xlu0 %v4285_v37  ;;  %v4429_v25 = vsub.f32 %v4427_v32, %v4428_v29 }
 0xadf   :  { %v4421_v15 = vsub.f32 %v6908_v16, %v4393_v18  ;;  %4394 = vmatpush.msrb.mxu0 %v4393_v18 }
 0xae0   :  { %4270 = vmatpush.msra.mxu3 %v6873_v26  ;;  %v4430_v38 = vand.u32 4294901760, %v4429_v25 }
 0xae1   :  { %4453 = vmatpush.msrb.mxu2 %v4421_v15  ;;  %4396 = vmatpush.msrb.mxu0 %v4395_v10  ;;  %v4422_v42 = vand.u32 4294901760, %v4421_v15 }
 0xae2   :  { %4272 = vmatpush.msra.mxu3 %v6876_v36  ;;  %4245 = vmatmul.f32.vlgmr.msra.gmra.mxu2 %v6863_v27 }
 0xae3   :  { %4144 = vmatmul.f32.gmra.mxu3 %v6880_v46  ;;  %4456 = vmatpush.msrb.mxu2 %v4427_v32  ;;  %v4423_v21 = vsub.f32 %v4421_v15, %v4422_v42 }
 0xae4   :  { %4478 = vmatpush.msrb.mxu3 %v4393_v18  ;;  %4505 = vmatpush.msra.mxu0 %v4422_v42 }
 0xae5   :  { %v4424_v28 = vand.u32 4294901760, %v4423_v21 }
 0xae6   :  { %4480 = vmatpush.msrb.mxu3 %v4395_v10  ;;  %4509 = vmatpush.msra.mxu0 %v4428_v29 }
 0xae7   :  { %4425 = vmatpush.msrb.mxu1 %v4424_v28 }
 0xae9   :  { %4431 = vmatpush.msrb.mxu1 %v4430_v38 }
 0xaea   :  { %4249 = vmatmul.f32.gmra.mxu2 %v6880_v46 }
 0xaeb   :  { %4274 = vmatmul.f32.vlgmr.msra.gmra.mxu3 %v6863_v27  ;;  %4530 = vmatpush.msra.mxu1 %v4393_v18  ;;  %v4368_v27 = vld [vmem:[%s7434_s14] sm:$0x3] }
 0xaec   :  { %v4377_v39 = vsel %vm98_vm0, %v4368_v27, 0  ;;  %vm4293_vm0 = vweird.f32 %v5738_v30 }
 0xaed   :  { %4532 = vmatpush.msra.mxu1 %v4395_v10  ;;  %v6929_v20 = vand.u32 4294901760, %v4377_v39 }
 0xaef   :  { %4433 = vmatmul.f32.vlgmr.msrb.gmra.mxu1 %v6929_v20  ;;  %v6933_v26 = vsub.f32 %v4377_v39, %v6929_v20 }
 0xaf1   :  { %v6937_v3 = vand.u32 4294901760, %v6933_v26 }
 0xaf2   :  { %4459 = vmatmul.f32.vlgmr.msrb.gmra.mxu2 %v6933_v26 }
 0xaf3   :  { %4278 = vmatmul.f32.gmra.mxu3 %v6880_v46  ;;  %v4400_v48 = vsub.f32 %v6933_v26, %v6937_v3  ;;  %v4290_v46 = vsub.f32 1.0, %v4289_v44 }
 0xaf5   :  { %v4401_v43 = vand.u32 4294901760, %v4400_v48  ;;  %v4291_v2 = vmul.f32 %v5738_v30, %v4290_v46 }
 0xaf7   :  { %4402 = vmatmul.f32.vlgmr.msrb.gmra.mxu0 %v4401_v43  ;;  %4534 = vmatmul.f32.vlgmr.msra.gmra.mxu1 %v6929_v20  ;;  %v4292_v0 = vadd.f32 %v5738_v30, %v4291_v2 }
 0xaf9   :  { %v6944_v56 = vsel %vm4293_vm0, %v5738_v30, %v4292_v0 }
 0xafb   :  { %4484 = vmatmul.f32.vlgmr.msrb.gmra.mxu3 %v6937_v3 }
 0xaff   :  { %4511 = vmatmul.f32.vlgmr.msra.gmra.mxu0 %v6929_v20 }
 0xb49   :  { %v4284_v54 = vpop.xlane.xlu2 %4283 }
 0xb4a   :  { %v4295_v62 = vmul.f32 %v6944_v56, %v4284_v54 }
 0xb4b   :  { %v6977_v25 = vpop.permute.xlu1 %4373 }
 0xb4c   :  { %v6950_v45 = vsub.f32 %v6900_v6, %v4295_v62 }
 0xb4e   :  { %v4317_v7 = vmul.f32 %v6950_v45, %v6950_v45 }
 0xb50   :  { %v4319_v52 = vsel %vm367_vm1, %v4317_v7, 0.0 }
 0xb51   :  { %v4207_v63 = vpop.f32.mrf.mxu1  ;;  %v4287_v49 = vpop.xlane.xlu0 %4286 }
 0xb52   :  { %v4175_v41 = vpop.f32.mrf.mxu0  ;;  %v4296_v13 = vmul.f32 %v6944_v56, %v4287_v49 }
 0xb54   :  { %v6962_v40 = vsub.f32 %v6908_v16, %v4296_v13 }
 0xb55   :  { %v4092_v36 = vpop.f32.mrf.mxu2 }
 0xb56   :  { %v4318_v16 = vmul.f32 %v6962_v40, %v6962_v40 }
 0xb58   :  { %v4322_v32 = vsel %vm367_vm1, %v4318_v16, 0.0 }
 0xb59   :  { %v4213_v51 = vpop.f32.mrf.mxu1 }
 0xb5a   :  { %v4180_v58 = vpop.f32.mrf.mxu0 }
 0xb5d   :  { %v4100_v11 = vpop.f32.mrf.mxu2 }
 0xb5e   :  { %v4141_v12 = vpop.f32.mrf.mxu3 }
 0xb5f   :  { %v4142_v19 = vadd.f32 %v4141_v12, %v4092_v36 }
 0xb61   :  { %v4176_v59 = vadd.f32 %v4175_v41, %v4142_v19  ;;  %v4711_v19 = vld [vmem:[%s7436_s16 + $0x30] sm:$0xff] }
 0xb63   :  { %v4208_v34 = vadd.f32 %v4207_v63, %v4176_v59  ;;  %v4710_v59 = vld [vmem:[%s7436_s16 + $0x28] sm:$0xff] }
 0xb65   :  { %v4246_v24 = vpop.f32.mrf.mxu2 }
 0xb66   :  { %v4145_v60 = vpop.f32.mrf.mxu3  ;;  %v4247_v4 = vadd.f32 %v4246_v24, %v4208_v34 }
 0xb67   :  { %v4146_v57 = vadd.f32 %v4145_v60, %v4100_v11  ;;  %v6994_v60 = vand.u32 4294901760, %v4711_v19 }
 0xb69   :  { %v4181_v50 = vadd.f32 %v4180_v58, %v4146_v57  ;;  %v4763_v54 = vsub.f32 %v4711_v19, %v6994_v60  ;;  %v7005_v57 = vand.u32 4294901760, %v4710_v59  ;;  %v4709_v58 = vld [vmem:[%s7436_s16 + $0x20] sm:$0xff] }
 0xb6b   :  { %v4214_v31 = vadd.f32 %v4213_v51, %v4181_v50 }
 0xb6c   :  { %v4434_v28 = vpop.f32.mrf.mxu1 }
 0xb6d   :  { %v4250_v35 = vpop.f32.mrf.mxu2 }
 0xb6e   :  { %v4275_v55 = vpop.f32.mrf.mxu3  ;;  %v4251_v8 = vadd.f32 %v4250_v35, %v4214_v31 }
 0xb6f   :  { %v6947_v17 = vadd.f32 %v4275_v55, %v4247_v4  ;;  %v4764_v4 = vand.u32 4294901760, %v4763_v54  ;;  %v4769_v55 = vsub.f32 %v4710_v59, %v7005_v57 }
 0xb71   :  { %v4299_v5 = vsel %vm367_vm1, %v6947_v17, 0.0  ;;  %v4554_v22 = vand.u32 4294901760, %v6947_v17  ;;  %v4765_v51 = vsub.f32 %v4763_v54, %v4764_v4 }
 0xb72   :  { %4300 = vadd.xlane.f32.xlu2 %v4299_v5 }
 0xb73   :  { %v4586_v6 = vsub.f32 %v6947_v17, %v4554_v22  ;;  %v4766_v31 = vand.u32 4294901760, %v4765_v51  ;;  %v5108_v51 = vld [vmem:[%s7438_s18 + $0x70] sm:$0xff] }
 0xb74   :  { %v4403_v29 = vpop.f32.mrf.mxu0 }
 0xb75   :  { %v4587_v10 = vand.u32 4294901760, %v4586_v6  ;;  %v4404_v38 = vadd.f32 %v4403_v29, %v6977_v25  ;;  %v4460_v23 = vpop.f32.mrf.mxu2 }
 0xb76   :  { %v4279_v53 = vpop.f32.mrf.mxu3 }
 0xb77   :  { %v6958_v14 = vadd.f32 %v4279_v53, %v4251_v8  ;;  %v4588_v15 = vsub.f32 %v4586_v6, %v4587_v10  ;;  %v4435_v27 = vadd.f32 %v4434_v28, %v4404_v38  ;;  %v4708_v53 = vld [vmem:[%s7436_s16 + $0x18] sm:$0xff] }
 0xb79   :  { %v4302_v9 = vsel %vm367_vm1, %v6958_v14, 0.0  ;;  %v4552_v33 = vand.u32 4294901760, %v6958_v14  ;;  %v4589_v21 = vand.u32 4294901760, %v4588_v15  ;;  %v4705_v15 = vld [vmem:[%s7436_s16] sm:$0xff] }
 0xb7a   :  { %4320 = vadd.xlane.f32.xlu2 %v4319_v52  ;;  %4303 = vadd.xlane.f32.xlu0 %v4302_v9  ;;  %v4707_v52 = vld [vmem:[%s7436_s16 + $0x10] sm:$0xff] }
 0xb7b   :  { %4553 = vmatpush.msra.mxu2 %v4552_v33  ;;  %4637 = vmatpush.msrb.mxu1 %v4552_v33  ;;  %v4580_v47 = vsub.f32 %v6958_v14, %v4552_v33 }
 0xb7c   :  { %v4512_v30 = vpop.f32.mrf.mxu0 }
 0xb7d   :  { %4555 = vmatpush.msra.mxu2 %v4554_v22  ;;  %4612 = vmatpush.msrb.mxu0 %v4580_v47  ;;  %v4581_v18 = vand.u32 4294901760, %v4580_v47 }
 0xb7e   :  { %4639 = vmatpush.msrb.mxu1 %v4554_v22  ;;  %4561 = vmatmul.f32.vlgmr.msra.gmra.mxu2 %v4401_v43  ;;  %v4485_v39 = vpop.f32.mrf.mxu3  ;;  %v4535_v43 = vpop.f32.mrf.mxu1 }
 0xb7f   :  { %4615 = vmatpush.msrb.mxu0 %v4586_v6  ;;  %4664 = vmatpush.msrb.mxu2 %v4581_v18  ;;  %v4582_v37 = vsub.f32 %v4580_v47, %v4581_v18  ;;  %v7032_v47 = vand.u32 4294901760, %v4707_v52 }
 0xb80   :  { %4618 = vmatmul.f32.vlgmr.msrb.gmra.mxu0 %v6933_v26  ;;  %4643 = vmatmul.f32.vlgmr.msrb.gmra.mxu1 %v6937_v3  ;;  %v4461_v26 = vadd.f32 %v4460_v23, %v4435_v27 }
 0xb81   :  { %4668 = vmatpush.msrb.mxu2 %v4587_v10  ;;  %v4583_v42 = vand.u32 4294901760, %v4582_v37  ;;  %v4706_v10 = vld [vmem:[%s7436_s16 + $0x8] sm:$0xff]  ;;  %v7042_v37 = vsub.f32 %v4707_v52, %v7032_v47  ;;  %v5105_v52 = vld [vmem:[%s7438_s18 + $0x58] sm:$0xff] }
 0xb82   :  { %4323 = vadd.xlane.f32.xlu0 %v4322_v32  ;;  %v4486_v3 = vadd.f32 %v4485_v39, %v4461_v26  ;;  %v7039_v16 = vand.u32 4294901760, %v4706_v10 }
 0xb83   :  { %4584 = vmatpush.msra.mxu3 %v4583_v42  ;;  %v4952_v42 = vand.u32 4294901760, %v7042_v37 }
 0xb84   :  { %v4513_v48 = vadd.f32 %v4512_v30, %v4486_v3  ;;  %v7054_v29 = vsub.f32 %v4706_v10, %v7039_v16 }
 0xb85   :  { %4590 = vmatpush.msra.mxu3 %v4589_v21  ;;  %v7051_v21 = vand.u32 4294901760, %v4705_v15  ;;  %v4953_v38 = vsub.f32 %v7042_v37, %v4952_v42 }
 0xb86   :  { %4592 = vmatmul.f32.vlgmr.msra.gmra.mxu3 %v6929_v20  ;;  %4670 = vmatmul.f32.vlgmr.msrb.gmra.mxu2 %v6929_v20  ;;  %v6985_v12 = vadd.f32 %v4535_v43, %v4513_v48  ;;  %v4958_v23 = vand.u32 4294901760, %v7054_v29 }
 0xb87   :  { %4689 = vmatpush.msrb.mxu3 %v4552_v33  ;;  %v4963_v27 = vsub.f32 %v4705_v15, %v7051_v21  ;;  %v4954_v39 = vand.u32 4294901760, %v4953_v38  ;;  %v5102_v15 = vld [vmem:[%s7438_s18 + $0x40] sm:$0xff] }
 0xb88   :  { %4698 = vst.msk [vmem:[#allocation6] sm:$0x3] %vm4697_vm8, %v6985_v12  ;;  %v4959_v26 = vsub.f32 %v7054_v29, %v4958_v23 }
 0xb89   :  { %4691 = vmatpush.msrb.mxu3 %v4554_v22  ;;  %v4964_v30 = vand.u32 4294901760, %v4963_v27 }
 0xb8a   :  { %v4960_v3 = vand.u32 4294901760, %v4959_v26 }
 0xb8e   :  { %4693 = vmatmul.f32.vlgmr.msrb.gmra.mxu3 %v6929_v20  ;;  %v4712_v20 = vld [vmem:[%s7436_s16 + $0x38] sm:$0xff]  ;;  %s5801_s16 = smov 32  }
 0xb8f   :  { %v6987_v11 = vand.u32 4294901760, %v4712_v20 }
 0xb91   :  { %v4757_v0 = vsub.f32 %v4712_v20, %v6987_v11  ;;  %4828 = vmatpush.msra.mxu3 %v6987_v11  ;;  %4728 = vmatpush.msra.mxu0 %v6987_v11 }
 0xb93   :  { %v4758_v24 = vand.u32 4294901760, %v4757_v0  ;;  %4799 = vmatpush.msra.mxu2 %v4757_v0  ;;  %4830 = vmatpush.msra.mxu3 %v6994_v60 }
 0xb94   :  { %4730 = vmatpush.msra.mxu0 %v6994_v60 }
 0xb95   :  { %v4759_v62 = vsub.f32 %v4757_v0, %v4758_v24  ;;  %4802 = vmatpush.msra.mxu2 %v4763_v54  ;;  %4832 = vmatpush.msra.mxu3 %v7005_v57 }
 0xb96   :  { %4732 = vmatpush.msra.mxu0 %v7005_v57 }
 0xb97   :  { %4805 = vmatpush.msra.mxu2 %v4769_v55 }
 0xbe5   :  { %v4301_v36 = vpop.xlane.xlu2 %4300 }
 0xbe6   :  { %v4305_v44 = vmul.f32 %v4301_v36, %v6944_v56  ;;  %v4965_v36 = vsub.f32 %v4963_v27, %v4964_v30 }
 0xbe8   :  { %v4307_v46 = vsub.f32 %v6947_v17, %v4305_v44  ;;  %v4733_v17 = vand.u32 4294901760, %v4709_v58  ;;  %v4966_v44 = vand.u32 4294901760, %v4965_v36 }
 0xbea   :  { %v4325_v2 = vmul.f32 %v4307_v46, %v4307_v46  ;;  %v4309_v41 = vmul.f32 %v4307_v46, %v6950_v45  ;;  %v4770_v45 = vand.u32 4294901760, %v4769_v55  ;;  %v4775_v5 = vsub.f32 %v4709_v58, %v4733_v17  ;;  %4834 = vmatpush.msra.mxu3 %v4733_v17  ;;  %4734 = vmatpush.msra.mxu0 %v4733_v17 }
 0xbec   :  { %v4327_v63 = vsel %vm367_vm1, %v4325_v2, 0.0  ;;  %v4311_v1 = vsel %vm367_vm1, %v4309_v41, 0.0  ;;  %v4771_v22 = vsub.f32 %v4769_v55, %v4770_v45  ;;  %v4776_v13 = vand.u32 4294901760, %v4775_v5  ;;  %4808 = vmatpush.msra.mxu2 %v4775_v5  ;;  %4857 = vmatpush.msrb.mxu0 %v4758_v24 }
 0xbed   :  { %4328 = vadd.xlane.f32.xlu2 %v4327_v63  ;;  %4312 = vadd.xlane.f32.xlu0 %v4311_v1  ;;  %v4304_v61 = vpop.xlane.xlu0 %4303  ;;  %v4901_v41 = vsel %vm367_vm1, %v6985_v12, 0 }
 0xbee   :  { %v4306_v34 = vmul.f32 %v4304_v61, %v6944_v56  ;;  %v4760_v56 = vand.u32 4294901760, %v4759_v62  ;;  %v4777_v6 = vsub.f32 %v4775_v5, %v4776_v13  ;;  %4861 = vmatpush.msrb.mxu0 %v4764_v4  ;;  %v4923_v63 = vand.u32 4294901760, %v4901_v41 }
 0xbf0   :  { %v4308_v50 = vsub.f32 %v6958_v14, %v4306_v34  ;;  %4761 = vmatpush.msra.mxu1 %v4760_v56  ;;  %v4772_v14 = vand.u32 4294901760, %v4771_v22  ;;  %v4778_v9 = vand.u32 4294901760, %v4777_v6  ;;  %4865 = vmatpush.msrb.mxu0 %v4770_v45  ;;  %v4924_v24 = vsub.f32 %v4901_v41, %v4923_v63 }
 0xbf2   :  { %v4326_v49 = vmul.f32 %v4308_v50, %v4308_v50  ;;  %v4310_v35 = vmul.f32 %v4308_v50, %v6962_v40  ;;  %v7023_v40 = vand.u32 4294901760, %v4708_v53  ;;  %4767 = vmatpush.msra.mxu1 %v4766_v31  ;;  %4869 = vmatpush.msrb.mxu0 %v4776_v13  ;;  %v4925_v34 = vand.u32 4294901760, %v4924_v24  ;;  %v5109_v50 = vld [vmem:[%s7438_s18 + $0x78] sm:$0xff]  ;;  %v5107_v31 = vld [vmem:[%s7438_s18 + $0x68] sm:$0xff] }
 0xbf3   :  { %v7081_v56 = vand.u32 4294901760, %v5109_v50 }
 0xbf4   :  { %v4330_v8 = vsel %vm367_vm1, %v4326_v49, 0.0  ;;  %v4314_v7 = vsel %vm367_vm1, %v4310_v35, 0.0  ;;  %4916 = vmatpush.msrb.mxu2 %v7023_v40  ;;  %v7030_v33 = vsub.f32 %v4708_v53, %v7023_v40  ;;  %4773 = vmatpush.msra.mxu1 %v4772_v14  ;;  %v4926_v62 = vsub.f32 %v4924_v24, %v4925_v34 }
 0xbf5   :  { %4331 = vadd.xlane.f32.xlu1 %v4330_v8  ;;  %4315 = vadd.xlane.f32.xlu2 %v4314_v7  ;;  %v7087_v5 = vsub.f32 %v5109_v50, %v7081_v56  ;;  %v7089_v49 = vand.u32 4294901760, %v5108_v51  ;;  %v7102_v8 = vand.u32 4294901760, %v5107_v31  ;;  %v5106_v7 = vld [vmem:[%s7438_s18 + $0x60] sm:$0xff] }
 0xbf6   :  { %4918 = vmatpush.msrb.mxu2 %v7032_v47  ;;  %v4946_v18 = vand.u32 4294901760, %v7030_v33  ;;  %4779 = vmatpush.msra.mxu1 %v4778_v9  ;;  %v4927_v55 = vand.u32 4294901760, %v4926_v62 }
 0xbf7   :  { %v5157_v22 = vand.u32 4294901760, %v7087_v5  ;;  %v7100_v13 = vsub.f32 %v5108_v51, %v7089_v49  ;;  %v7116_v6 = vsub.f32 %v5107_v31, %v7102_v8 }
 0xbf8   :  { %4888 = vmatpush.msrb.mxu1 %v6987_v11  ;;  %v4947_v32 = vsub.f32 %v7030_v33, %v4946_v18  ;;  %4920 = vmatpush.msrb.mxu2 %v7039_v16 }
 0xbf9   :  { %v5158_v53 = vsub.f32 %v7087_v5, %v5157_v22  ;;  %v5163_v14 = vand.u32 4294901760, %v7100_v13 }
 0xbfa   :  { %4890 = vmatpush.msrb.mxu1 %v6994_v60  ;;  %v4948_v28 = vand.u32 4294901760, %v4947_v32  ;;  %4922 = vmatpush.msrb.mxu2 %v7051_v21  ;;  %v4324_v32 = vpop.xlane.xlu0 %4323 }
 0xbfb   :  { %v5159_v9 = vand.u32 4294901760, %v5158_v53  ;;  %v5098_v53 = vld [vmem:[%s7438_s18 + $0x20] sm:$0xff] }
 0xbfc   :  { %4892 = vmatpush.msrb.mxu1 %v7005_v57  ;;  %4949 = vmatpush.msrb.mxu3 %v4948_v28 }
 0xbfd   :  { %v4619_v20 = vpop.f32.mrf.mxu0  ;;  %v4644_v2 = vpop.f32.mrf.mxu1 }
 0xbfe   :  { %4894 = vmatpush.msrb.mxu1 %v4733_v17  ;;  %4955 = vmatpush.msrb.mxu3 %v4954_v39  ;;  %v4321_v17 = vpop.xlane.xlu2 %4320 }
 0xc00   :  { %4961 = vmatpush.msrb.mxu3 %v4960_v3 }
 0xc01   :  { %v4562_v48 = vpop.f32.mrf.mxu2 }
 0xc02   :  { %4967 = vmatpush.msrb.mxu3 %v4966_v44  ;;  %v4563_v43 = vadd.f32 %v4562_v48, %v6977_v25 }
 0xc09   :  { %v4593_v46 = vpop.f32.mrf.mxu3  ;;  %v4671_v0 = vpop.f32.mrf.mxu2 }
 0xc0a   :  { %v4594_v11 = vadd.f32 %v4593_v46, %v4563_v43 }
 0xc0c   :  { %v4620_v19 = vadd.f32 %v4619_v20, %v4594_v11 }
 0xc0e   :  { %v4645_v60 = vadd.f32 %v4644_v2, %v4620_v19 }
 0xc10   :  { %v4672_v1 = vadd.f32 %v4671_v0, %v4645_v60  ;;  %v5101_v0 = vld [vmem:[%s7438_s18 + $0x38] sm:$0xff] }
 0xc11   :  { %v4694_v59 = vpop.f32.mrf.mxu3 }
 0xc12   :  { %v4695_v61 = vadd.f32 %v4694_v59, %v4672_v1  ;;  %v7198_v59 = vand.u32 4294901760, %v5101_v0 }
 0xc14   :  { %v4713_v54 = vsel %vm367_vm1, %v4695_v61, 0  ;;  %4700 = vrot.lane.b32.xlu0 %v4695_v61, %s5801_s16 }
 0xc15   :  { %v4735_v25 = vand.u32 4294901760, %v4713_v54 }
 0xc17   :  { %v4736_v57 = vsub.f32 %v4713_v54, %v4735_v25  ;;  %4781 = vmatmul.f32.vlgmr.msra.gmra.mxu1 %v4735_v25  ;;  %v5100_v54 = vld [vmem:[%s7438_s18 + $0x30] sm:$0xff] }
 0xc18   :  { %5016 = vmatpush.msra.mxu1 %v7023_v40 }
 0xc19   :  { %v4737_v58 = vand.u32 4294901760, %v4736_v57  ;;  %4811 = vmatmul.f32.vlgmr.msra.gmra.mxu2 %v4736_v57 }
 0xc1a   :  { %5018 = vmatpush.msra.mxu1 %v7032_v47  ;;  %5045 = vmatpush.msra.mxu2 %v4946_v18  ;;  %v7135_v18 = vand.u32 4294901760, %v5105_v52 }
 0xc1b   :  { %v4738_v12 = vsub.f32 %v4736_v57, %v4737_v58  ;;  %4838 = vmatmul.f32.vlgmr.msra.gmra.mxu3 %v4737_v58 }
 0xc1c   :  { %5020 = vmatpush.msra.mxu1 %v7039_v16  ;;  %5049 = vmatpush.msra.mxu2 %v4952_v42  ;;  %v7159_v39 = vsub.f32 %v5105_v52, %v7135_v18 }
 0xc1d   :  { %v4739_v4 = vand.u32 4294901760, %v4738_v12  ;;  %5076 = vmatpush.msra.mxu3 %v7023_v40  ;;  %v7118_v40 = vand.u32 4294901760, %v5106_v7 }
 0xc1e   :  { %5022 = vmatpush.msra.mxu1 %v7051_v21  ;;  %5053 = vmatpush.msra.mxu2 %v4958_v23  ;;  %v5181_v44 = vand.u32 4294901760, %v7159_v39 }
 0xc1f   :  { %4740 = vmatmul.f32.vlgmr.msra.gmra.mxu0 %v4739_v4  ;;  %4896 = vmatmul.f32.vlgmr.msrb.gmra.mxu1 %v4735_v25  ;;  %v7131_v10 = vsub.f32 %v5106_v7, %v7118_v40  ;;  %v7221_v4 = vand.u32 4294901760, %v5100_v54 }
 0xc20   :  { %5078 = vmatpush.msra.mxu3 %v7032_v47  ;;  %4987 = vmatpush.msra.mxu0 %v7030_v33  ;;  %v5164_v33 = vsub.f32 %v7100_v13, %v5163_v14  ;;  %v5169_v47 = vand.u32 4294901760, %v7116_v6  ;;  %v5182_v41 = vsub.f32 %v7159_v39, %v5181_v44 }
 0xc21   :  { %4928 = vmatmul.f32.vlgmr.msrb.gmra.mxu2 %v4927_v55  ;;  %5160 = vmatpush.msrb.mxu1 %v5159_v9  ;;  %v5175_v28 = vand.u32 4294901760, %v7131_v10  ;;  %v5099_v55 = vld [vmem:[%s7438_s18 + $0x28] sm:$0xff]  ;;  %v7233_v31 = vsub.f32 %v5100_v54, %v7221_v4  ;;  %v7243_v9 = vand.u32 4294901760, %v5098_v53 }
 0xc22   :  { %5057 = vmatpush.msra.mxu2 %v4964_v30  ;;  %5080 = vmatpush.msra.mxu3 %v7039_v16  ;;  %v5104_v16 = vld [vmem:[%s7438_s18 + $0x50] sm:$0xff]  ;;  %v7163_v30 = vand.u32 4294901760, %v5102_v15  ;;  %v5183_v61 = vand.u32 4294901760, %v5182_v41  ;;  %v7235_v7 = vand.u32 4294901760, %v5099_v55 }
 0xc23   :  { %4969 = vmatmul.f32.vlgmr.msrb.gmra.mxu3 %v4923_v63  ;;  %4990 = vmatpush.msra.mxu0 %v7042_v37  ;;  %v5103_v37 = vld [vmem:[%s7438_s18 + $0x48] sm:$0xff]  ;;  %v7151_v38 = vand.u32 4294901760, %v5104_v16  ;;  %v5176_v48 = vsub.f32 %v7131_v10, %v5175_v28 }
 0xc24   :  { %5082 = vmatpush.msra.mxu3 %v7051_v21  ;;  %5258 = vmatpush.msrb.mxu2 %v7087_v5  ;;  %v5165_v21 = vand.u32 4294901760, %v5164_v33  ;;  %v7161_v26 = vand.u32 4294901760, %v5103_v37  ;;  %v7184_v2 = vsub.f32 %v5102_v15, %v7163_v30  ;;  %v7253_v15 = vsub.f32 %v5099_v55, %v7235_v7 }
 0xc25   :  { %4993 = vmatpush.msra.mxu0 %v7054_v29  ;;  %v5170_v29 = vsub.f32 %v7116_v6, %v5169_v47  ;;  %v7175_v43 = vsub.f32 %v5104_v16, %v7151_v38  ;;  %v5177_v20 = vand.u32 4294901760, %v5176_v48  ;;  %v5096_v48 = vld [vmem:[%s7438_s18 + $0x10] sm:$0xff] }
 0xc26   :  { %5311 = vmatpush.msrb.mxu3 %v7081_v56  ;;  %5261 = vmatpush.msrb.mxu2 %v7100_v13  ;;  %v7181_v11 = vsub.f32 %v5103_v37, %v7161_v26  ;;  %v5199_v1 = vand.u32 4294901760, %v7184_v2  ;;  %v5211_v37 = vand.u32 4294901760, %v7233_v31 }
 0xc27   :  { %4871 = vmatmul.f32.vlgmr.msrb.gmra.mxu0 %v4735_v25  ;;  %5026 = vmatmul.f32.vlgmr.msra.gmra.mxu1 %v4925_v34  ;;  %v5171_v36 = vand.u32 4294901760, %v5170_v29  ;;  %v5187_v19 = vand.u32 4294901760, %v7175_v43  ;;  %v7216_v34 = vsub.f32 %v5101_v0, %v7198_v59 }
 0xc28   :  { %4996 = vmatpush.msra.mxu0 %v4963_v27  ;;  %5313 = vmatpush.msrb.mxu3 %v7089_v49  ;;  %v5200_v57 = vsub.f32 %v7184_v2, %v5199_v1 }
 0xc29   :  { %5059 = vmatmul.f32.vlgmr.msra.gmra.mxu2 %v4923_v63  ;;  %5166 = vmatpush.msrb.mxu1 %v5165_v21  ;;  %v7261_v21 = vsub.f32 %v5098_v53, %v7243_v9 }
 0xc2a   :  { %5115 = vmatpush.msrb.mxu0 %v7081_v56  ;;  %5315 = vmatpush.msrb.mxu3 %v7102_v8  ;;  %v5201_v51 = vand.u32 4294901760, %v5200_v57 }
 0xc2b   :  { %5084 = vmatmul.f32.vlgmr.msra.gmra.mxu3 %v4923_v63  ;;  %5264 = vmatpush.msrb.mxu2 %v7116_v6  ;;  %v5193_v63 = vand.u32 4294901760, %v7181_v11  ;;  %v5223_v41 = vand.u32 4294901760, %v7261_v21 }
 0xc2c   :  { %5117 = vmatpush.msrb.mxu0 %v7089_v49  ;;  %5317 = vmatpush.msrb.mxu3 %v7118_v40 }
 0xc2d   :  { %5267 = vmatpush.msrb.mxu2 %v7131_v10  ;;  %5172 = vmatpush.msrb.mxu1 %v5171_v36  ;;  %v5194_v25 = vsub.f32 %v7181_v11, %v5193_v63  ;;  %v5212_v36 = vsub.f32 %v7233_v31, %v5211_v37 }
 0xc2e   :  { %5119 = vmatpush.msrb.mxu0 %v7102_v8  ;;  %5319 = vmatpush.msrb.mxu3 %v7135_v18 }
 0xc2f   :  { %4999 = vmatmul.f32.vlgmr.msra.gmra.mxu0 %v4924_v24  ;;  %5270 = vmatpush.msrb.mxu2 %v7159_v39  ;;  %v5188_v24 = vsub.f32 %v7175_v43, %v5187_v19  ;;  %v5195_v50 = vand.u32 4294901760, %v5194_v25  ;;  %v5095_v25 = vld [vmem:[%s7438_s18 + $0x8] sm:$0xff] }
 0xc30   :  { %5121 = vmatpush.msrb.mxu0 %v7118_v40  ;;  %5321 = vmatpush.msrb.mxu3 %v7151_v38  ;;  %v7313_v55 = vand.u32 4294901760, %v5095_v25 }
 0xc31   :  { %5273 = vmatpush.msrb.mxu2 %v7175_v43  ;;  %5178 = vmatpush.msrb.mxu1 %v5177_v20  ;;  %v5189_v62 = vand.u32 4294901760, %v5188_v24  ;;  %v5213_v24 = vand.u32 4294901760, %v5212_v36 }
 0xc32   :  { %5123 = vmatpush.msrb.mxu0 %v7135_v18  ;;  %5323 = vmatpush.msrb.mxu3 %v7161_v26 }
 0xc33   :  { %5276 = vmatpush.msrb.mxu2 %v7181_v11  ;;  %5184 = vmatpush.msrb.mxu1 %v5183_v61 }
 0xc34   :  { %5125 = vmatpush.msrb.mxu0 %v7151_v38  ;;  %5325 = vmatpush.msrb.mxu3 %v7163_v30 }
 0xc35   :  { %5279 = vmatpush.msrb.mxu2 %v7184_v2  ;;  %5190 = vmatpush.msrb.mxu1 %v5189_v62 }
 0xc36   :  { %5127 = vmatpush.msrb.mxu0 %v7161_v26  ;;  %5327 = vmatpush.msrb.mxu3 %v7198_v59 }
 0xc37   :  { %5282 = vmatpush.msrb.mxu2 %v7216_v34  ;;  %5196 = vmatpush.msrb.mxu1 %v5195_v50 }
 0xc38   :  { %5129 = vmatpush.msrb.mxu0 %v7163_v30  ;;  %5329 = vmatpush.msrb.mxu3 %v7221_v4 }
 0xc39   :  { %5285 = vmatpush.msrb.mxu2 %v7233_v31  ;;  %5202 = vmatpush.msrb.mxu1 %v5201_v51 }
 0xc3a   :  { %5131 = vmatpush.msrb.mxu0 %v7198_v59  ;;  %5331 = vmatpush.msrb.mxu3 %v7235_v7 }
 0xc3b   :  { %5288 = vmatpush.msrb.mxu2 %v7253_v15 }
 0xc3c   :  { %5133 = vmatpush.msrb.mxu0 %v7221_v4  ;;  %5333 = vmatpush.msrb.mxu3 %v7243_v9 }
 0xc3d   :  { %5291 = vmatpush.msrb.mxu2 %v7261_v21 }
 0xc3e   :  { %5135 = vmatpush.msrb.mxu0 %v7235_v7 }
 0xc40   :  { %5137 = vmatpush.msrb.mxu0 %v7243_v9 }
 0xc60   :  { %v4329_v45 = vpop.xlane.xlu2 %4328  ;;  %v4313_v50 = vpop.xlane.xlu0 %4312 }
 0xc61   :  { %v7093_v35 = vmul.f32 %v4329_v45, %v4321_v17  ;;  %v5205_v45 = vand.u32 4294901760, %v7216_v34 }
 0xc63   :  { %5739 = vrsqrt.f32 %v7093_v35  ;;  %v5206_v16 = vsub.f32 %v7216_v34, %v5205_v45  ;;  %vm4341_vm10 = vweird.f32 %v7093_v35 }
 0xc68   :  { %v4332_v42 = vpop.xlane.xlu1 %4331  ;;  %v4316_v51 = vpop.xlane.xlu2 %4315 }
 0xc69   :  { %v7154_v23 = vpop.eup %5739  ;;  %v7156_v27 = vmul.f32 %v4332_v42, %v4324_v32  ;;  %v5097_v32 = vld [vmem:[%s7438_s18 + $0x18] sm:$0xff] }
 0xc6a   :  { %v4336_v3 = vmul.f32 %v7154_v23, %v7093_v35  ;;  %vm4342_vm9 = vweird.f32 %v7154_v23  ;;  %v7263_v29 = vand.u32 4294901760, %v5097_v32  ;;  %v5217_v35 = vand.u32 4294901760, %v7253_v15 }
 0xc6b   :  { %5741 = vrsqrt.f32 %v7156_v27  ;;  %vm7278_vm12 = vmor %vm4341_vm10, %vm4342_vm9  ;;  %vm4351_vm13 = vweird.f32 %v7156_v27 }
 0xc6c   :  { %v4337_v46 = vmul.f32 %v7154_v23, %v4336_v3  ;;  %v5207_v3 = vand.u32 4294901760, %v5206_v16  ;;  %v7284_v0 = vsub.f32 %v5097_v32, %v7263_v29  ;;  %v5218_v54 = vsub.f32 %v7253_v15, %v5217_v35  ;;  %5139 = vmatpush.msrb.mxu0 %v7263_v29  ;;  %5335 = vmatpush.msrb.mxu3 %v7263_v29 }
 0xc6e   :  { %v4338_v60 = vmul.f32 0.5, %v4337_v46  ;;  %5208 = vmatpush.msrb.mxu1 %v5207_v3  ;;  %v5219_v62 = vand.u32 4294901760, %v5218_v54  ;;  %5294 = vmatpush.msrb.mxu2 %v7284_v0  ;;  %v7327_v3 = vsub.f32 %v5095_v25, %v7313_v55 }
 0xc70   :  { %v4339_v12 = vsub.f32 1.5, %v4338_v60  ;;  %v7286_v60 = vand.u32 4294901760, %v5096_v48  ;;  %5214 = vmatpush.msrb.mxu1 %v5213_v24 }
 0xc71   :  { %v7219_v58 = vpop.eup %5741 }
 0xc72   :  { %v4346_v17 = vmul.f32 %v7219_v58, %v7156_v27  ;;  %v4340_v33 = vmul.f32 %v7154_v23, %v4339_v12  ;;  %vm4352_vm11 = vweird.f32 %v7219_v58  ;;  %v5229_v27 = vand.u32 4294901760, %v7284_v0  ;;  %5141 = vmatpush.msrb.mxu0 %v7286_v60  ;;  %5337 = vmatpush.msrb.mxu3 %v7286_v60 }
 0xc73   :  { %v7307_v12 = vsub.f32 %v5096_v48, %v7286_v60  ;;  %vm4353_vm14 = vmor %vm4351_vm13, %vm4352_vm11  ;;  %5220 = vmatpush.msrb.mxu1 %v5219_v62 }
 0xc74   :  { %v4347_v52 = vmul.f32 %v7219_v58, %v4346_v17  ;;  %v4344_v61 = vsel %vm7278_vm12, %v7154_v23, %v4340_v33  ;;  %v5224_v23 = vsub.f32 %v7261_v21, %v5223_v41  ;;  %v5094_v17 = vld [vmem:[%s7438_s18] sm:$0xff]  ;;  %v5230_v33 = vsub.f32 %v7284_v0, %v5229_v27  ;;  %5143 = vmatpush.msrb.mxu0 %v7313_v55  ;;  %v5459_v0 = vld [vmem:[%s7440_s20 + $0x18] sm:$0xff] }
 0xc75   :  { %v5235_v16 = vand.u32 4294901760, %v7307_v12  ;;  %v4355_v32 = vmul.f32 %v4344_v61, %v4313_v50  ;;  %v7329_v36 = vand.u32 4294901760, %v5094_v17  ;;  %5297 = vmatpush.msrb.mxu2 %v7307_v12  ;;  %5339 = vmatpush.msrb.mxu3 %v7313_v55 }
 0xc76   :  { %v4348_v42 = vmul.f32 0.5, %v4347_v52  ;;  %v5225_v52 = vand.u32 4294901760, %v5224_v23 }
 0xc77   :  { %v5236_v48 = vsub.f32 %v7307_v12, %v5235_v16  ;;  %v5246_v61 = vsub.f32 %v5094_v17, %v7329_v36  ;;  %5145 = vmatpush.msrb.mxu0 %v7329_v36  ;;  %5300 = vmatpush.msrb.mxu2 %v7327_v3 }
 0xc78   :  { %v4349_v20 = vsub.f32 1.5, %v4348_v42  ;;  %5226 = vmatpush.msrb.mxu1 %v5225_v52  ;;  %5341 = vmatpush.msrb.mxu3 %v7329_v36 }
 0xc79   :  { %v5237_v24 = vand.u32 4294901760, %v5236_v48  ;;  %5352 = vmatpush.msra.mxu0 %v5157_v22  ;;  %5303 = vmatpush.msrb.mxu2 %v5246_v61 }
 0xc7a   :  { %v4350_v57 = vmul.f32 %v7219_v58, %v4349_v20  ;;  %v5241_v20 = vand.u32 4294901760, %v7327_v3 }
 0xc7b   :  { %5356 = vmatpush.msra.mxu0 %v5163_v14 }
 0xc7c   :  { %v4354_v53 = vsel %vm4353_vm14, %v7219_v58, %v4350_v57  ;;  %v5231_v58 = vand.u32 4294901760, %v5230_v33  ;;  %v5242_v25 = vsub.f32 %v7327_v3, %v5241_v20  ;;  %v5247_v57 = vand.u32 4294901760, %v5246_v61 }
 0xc7d   :  { %v4356_v42 = vmul.f32 %v4354_v53, %v4316_v51  ;;  %5360 = vmatpush.msra.mxu0 %v5169_v47  ;;  %v5457_v53 = vld [vmem:[%s7440_s20 + $0x8] sm:$0xff] }
 0xc7e   :  { %5232 = vmatpush.msrb.mxu1 %v5231_v58  ;;  %v5243_v62 = vand.u32 4294901760, %v5242_v25  ;;  %v5248_v17 = vsub.f32 %v5246_v61, %v5247_v57 }
 0xc7f   :  { %v4357_v46 = vadd.f32 %v4356_v42, %v4355_v32  ;;  %5364 = vmatpush.msra.mxu0 %v5175_v28  ;;  %v5456_v32 = vld [vmem:[%s7440_s20] sm:$0xff] }
 0xc80   :  { %5238 = vmatpush.msrb.mxu1 %v5237_v24  ;;  %v5249_v22 = vand.u32 4294901760, %v5248_v17  ;;  %v5485_v58 = vand.u32 4294901760, %v5456_v32  ;;  %v5703_v17 = vld [vmem:[%s7439_s19] ss:$0 sm:$0xff] }
 0xc81   :  { %v4358_v54 = vrot.slane %v4357_v46, 4  ;;  %5368 = vmatpush.msra.mxu0 %v5181_v44 }
 0xc82   :  { %5244 = vmatpush.msrb.mxu1 %v5243_v62  ;;  %v5527_v61 = vsub.f32 %v5456_v32, %v5485_v58 }
 0xc83   :  { %v4359_v23 = vadd.f32 %v4358_v54, %v4357_v46  ;;  %5372 = vmatpush.msra.mxu0 %v5187_v19 }
 0xc84   :  { %5250 = vmatpush.msrb.mxu1 %v5249_v22  ;;  %v5528_v25 = vand.u32 4294901760, %v5527_v61 }
 0xc85   :  { %v4360_v5 = vrot.slane %v4359_v23, 2  ;;  %5376 = vmatpush.msra.mxu0 %v5193_v63 }
 0xc86   :  { %v4701_v50 = vpop.permute.xlu0 %4700  ;;  %5419 = vmatpush.msra.mxu1 %v7081_v56 }
 0xc87   :  { %v4361_v51 = vadd.f32 %v4360_v5, %v4359_v23  ;;  %4704 = vst.msk [vmem:[#allocation6] sm:$0x3] %vm4703_vm15, %v4701_v50  ;;  %5380 = vmatpush.msra.mxu0 %v5199_v1  ;;  %v5529_v23 = vsub.f32 %v5527_v61, %v5528_v25 }
 0xc88   :  { %5421 = vmatpush.msra.mxu1 %v7089_v49  ;;  %5677 = dma.vmem_to_hbm [thread:$0]  %s5673_s11, 32, %s5675_s12, [#allocation7]  }
 0xc89   :  { %v4362_v13 = vrot.slane %v4361_v51, 1  ;;  %5384 = vmatpush.msra.mxu0 %v5205_v45  ;;  %v5702_v45 = vld [vmem:[%s7437_s17] ss:$0 sm:$0xff]  ;;  %v5530_v62 = vand.u32 4294901760, %v5529_v23 }
 0xc8a   :  { %5423 = vmatpush.msra.mxu1 %v7102_v8 }
 0xc8b   :  { %v4363_v14 = vadd.f32 %v4362_v13, %v4361_v51  ;;  %5388 = vmatpush.msra.mxu0 %v5211_v37 }
 0xc8c   :  { %5425 = vmatpush.msra.mxu1 %v7118_v40 }
 0xc8d   :  { %v4364_v6 = vsub.f32 0.0, %v4363_v14  ;;  %5392 = vmatpush.msra.mxu0 %v5217_v35 }
 0xc8e   :  { %5427 = vmatpush.msra.mxu1 %v7135_v18 }
 0xc8f   :  { %v4365_v56 = vmul.f32 0.5, %v4364_v6  ;;  %5396 = vmatpush.msra.mxu0 %v5223_v41 }
 0xc90   :  { %5429 = vmatpush.msra.mxu1 %v7151_v38 }
 0xc91   :  { %4367 = vst.msk [vmem:[#allocation4] sm:$0x1] %vm4366_vm2, %v4365_v56  ;;  %5400 = vmatpush.msra.mxu0 %v5229_v27  ;;  %v5458_v27 = vld [vmem:[%s7440_s20 + $0x10] sm:$0xff] }
 0xc92   :  { %5431 = vmatpush.msra.mxu1 %v7161_v26  ;;  %5666 = dma.vmem_to_hbm [thread:$0]  %s5662_s15, 16, %s5664_s25, [#allocation5]  }
 0xc93   :  { %5404 = vmatpush.msra.mxu0 %v5235_v16  ;;  %v5483_v16 = vand.u32 4294901760, %v5457_v53 }
 0xc94   :  { %5433 = vmatpush.msra.mxu1 %v7163_v30  ;;  %v4782_v49 = vpop.f32.mrf.mxu1 }
 0xc95   :  { %5408 = vmatpush.msra.mxu0 %v5241_v20 }
 0xc96   :  { %5435 = vmatpush.msra.mxu1 %v7198_v59 }
 0xc97   :  { %5412 = vmatpush.msra.mxu0 %v5247_v57 }
 0xc98   :  { %5437 = vmatpush.msra.mxu1 %v7221_v4 }
 0xc9a   :  { %5439 = vmatpush.msra.mxu1 %v7235_v7 }
 0xc9c   :  { %v4741_v8 = vpop.f32.mrf.mxu0  ;;  %v4812_v40 = vpop.f32.mrf.mxu2  ;;  %5441 = vmatpush.msra.mxu1 %v7243_v9 }
 0xc9d   :  { %v4783_v47 = vadd.f32 %v4782_v49, %v4741_v8  ;;  %v4897_v38 = vpop.f32.mrf.mxu1 }
 0xc9e   :  { %v4839_v10 = vpop.f32.mrf.mxu3  ;;  %5443 = vmatpush.msra.mxu1 %v7263_v29 }
 0xc9f   :  { %v4813_v18 = vadd.f32 %v4812_v40, %v4783_v47 }
 0xca0   :  { %5445 = vmatpush.msra.mxu1 %v7286_v60  ;;  %v5479_v60 = vand.u32 4294901760, %v5459_v0 }
 0xca1   :  { %v4840_v28 = vadd.f32 %v4839_v10, %v4813_v18 }
 0xca2   :  { %5447 = vmatpush.msra.mxu1 %v7313_v55  ;;  %v7396_v12 = vsub.f32 %v5459_v0, %v5479_v60  ;;  %v5481_v55 = vand.u32 4294901760, %v5458_v27  ;;  %5480 = vmatpush.msra.mxu2 %v5479_v60 }
 0xca4   :  { %v4872_v39 = vpop.f32.mrf.mxu0  ;;  %v4929_v30 = vpop.f32.mrf.mxu2  ;;  %5449 = vmatpush.msra.mxu1 %v7329_v36  ;;  %v5510_v52 = vand.u32 4294901760, %v7396_v12  ;;  %v5515_v33 = vsub.f32 %v5458_v27, %v5481_v55  ;;  %5482 = vmatpush.msra.mxu2 %v5481_v55  ;;  %v5521_v36 = vsub.f32 %v5457_v53, %v5483_v16 }
 0xca5   :  { %v4873_v26 = vadd.f32 %v4872_v39, %v4840_v28  ;;  %v5027_v1 = vpop.f32.mrf.mxu1 }
 0xca6   :  { %v4970_v43 = vpop.f32.mrf.mxu3  ;;  %v5511_v42 = vsub.f32 %v7396_v12, %v5510_v52  ;;  %v5516_v3 = vand.u32 4294901760, %v5515_v33  ;;  %5484 = vmatpush.msra.mxu2 %v5483_v16  ;;  %v5522_v20 = vand.u32 4294901760, %v5521_v36 }
 0xca7   :  { %v4898_v44 = vadd.f32 %v4897_v38, %v4873_v26 }
 0xca8   :  { %v5512_v48 = vand.u32 4294901760, %v5511_v42  ;;  %v5517_v46 = vsub.f32 %v5515_v33, %v5516_v3  ;;  %5486 = vmatpush.msra.mxu2 %v5485_v58  ;;  %v5523_v54 = vsub.f32 %v5521_v36, %v5522_v20 }
 0xca9   :  { %v4930_v11 = vadd.f32 %v4929_v30, %v4898_v44 }
 0xcaa   :  { %5513 = vmatpush.msra.mxu3 %v5512_v48  ;;  %v5518_v24 = vand.u32 4294901760, %v5517_v46  ;;  %v5524_v57 = vand.u32 4294901760, %v5523_v54 }
 0xcab   :  { %v4971_v2 = vadd.f32 %v4970_v43, %v4930_v11  ;;  %v5704_v11 = vld [vmem:[#allocation3] ss:$0 sm:$0xff] }
 0xcac   :  { %v5000_v19 = vpop.f32.mrf.mxu0  ;;  %v5060_v34 = vpop.f32.mrf.mxu2  ;;  %5519 = vmatpush.msra.mxu3 %v5518_v24 }
 0xcad   :  { %v5001_v63 = vadd.f32 %v5000_v19, %v4971_v2 }
 0xcae   :  { %v5085_v31 = vpop.f32.mrf.mxu3  ;;  %5525 = vmatpush.msra.mxu3 %v5524_v57 }
 0xcaf   :  { %v5028_v59 = vadd.f32 %v5027_v1, %v5001_v63 }
 0xcb0   :  { %5531 = vmatpush.msra.mxu3 %v5530_v62 }
 0xcb1   :  { %v5061_v4 = vadd.f32 %v5060_v34, %v5028_v59 }
 0xcb3   :  { %v5086_v7 = vadd.f32 %v5085_v31, %v5061_v4 }
 0xcb5   :  { %v5092_v9 = vadd.f32 %v5702_v45, %v5086_v7 }
 0xcb7   :  { %v5093_v37 = vmax.f32 %v5092_v9, 0.0 }
 0xcb9   :  { %v5146_v15 = vand.u32 4294901760, %v5093_v37 }
 0xcbb   :  { %v5147_v21 = vsub.f32 %v5093_v37, %v5146_v15  ;;  %5252 = vmatmul.f32.vlgmr.msrb.gmra.mxu1 %v5146_v15 }
 0xcbd   :  { %v5148_v29 = vand.u32 4294901760, %v5147_v21  ;;  %5306 = vmatmul.f32.vlgmr.msrb.gmra.mxu2 %v5147_v21 }
 0xcbe   :  { %5551 = vmatpush.msrb.mxu2 %v7396_v12 }
 0xcbf   :  { %v5149_v35 = vsub.f32 %v5147_v21, %v5148_v29  ;;  %5345 = vmatmul.f32.vlgmr.msrb.gmra.mxu3 %v5148_v29 }
 0xcc0   :  { %5554 = vmatpush.msrb.mxu2 %v5515_v33  ;;  %5580 = vmatpush.msrb.mxu3 %v5479_v60 }
 0xcc1   :  { %v5150_v41 = vand.u32 4294901760, %v5149_v35 }
 0xcc2   :  { %5557 = vmatpush.msrb.mxu2 %v5521_v36  ;;  %5582 = vmatpush.msrb.mxu3 %v5481_v55 }
 0xcc3   :  { %5151 = vmatmul.f32.vlgmr.msrb.gmra.mxu0 %v5150_v41  ;;  %5451 = vmatmul.f32.vlgmr.msra.gmra.mxu1 %v5146_v15 }
 0xcc4   :  { %5560 = vmatpush.msrb.mxu2 %v5527_v61  ;;  %5584 = vmatpush.msrb.mxu3 %v5483_v16 }
 0xcc6   :  { %5586 = vmatpush.msrb.mxu3 %v5485_v58 }
 0xccb   :  { %5414 = vmatmul.f32.vlgmr.msra.gmra.mxu0 %v5146_v15 }
 0xd38   :  { %v5253_v5 = vpop.f32.mrf.mxu1 }
 0xd40   :  { %v5152_v22 = vpop.f32.mrf.mxu0  ;;  %v5307_v13 = vpop.f32.mrf.mxu2 }
 0xd41   :  { %v5153_v50 = vadd.f32 %v5703_v17, %v5152_v22  ;;  %v5452_v40 = vpop.f32.mrf.mxu1 }
 0xd42   :  { %v5346_v6 = vpop.f32.mrf.mxu3 }
 0xd43   :  { %v5254_v51 = vadd.f32 %v5253_v5, %v5153_v50 }
 0xd45   :  { %v5308_v14 = vadd.f32 %v5307_v13, %v5254_v51 }
 0xd47   :  { %v5347_v56 = vadd.f32 %v5346_v6, %v5308_v14 }
 0xd48   :  { %v5415_v49 = vpop.f32.mrf.mxu0 }
 0xd49   :  { %v5416_v8 = vadd.f32 %v5415_v49, %v5347_v56 }
 0xd4b   :  { %v5453_v47 = vadd.f32 %v5452_v40, %v5416_v8 }
 0xd4d   :  { %v5455_v10 = vmax.f32 %v5453_v47, 0.0 }
 0xd4f   :  { %v5465_v18 = vsel %vm367_vm1, %v5455_v10, 0  ;;  %vm5652_vm1 = vcmask 1024  }
 0xd50   :  { %v5487_v28 = vand.u32 4294901760, %v5465_v18 }
 0xd52   :  { %v5488_v38 = vsub.f32 %v5465_v18, %v5487_v28  ;;  %5533 = vmatmul.f32.vlgmr.msra.gmra.mxu3 %v5487_v28 }
 0xd53   :  { %5640 = vmatpush.msra.mxu3 %v5479_v60 }
 0xd54   :  { %v5489_v39 = vand.u32 4294901760, %v5488_v38 }
 0xd55   :  { %5642 = vmatpush.msra.mxu3 %v5481_v55 }
 0xd56   :  { %v5490_v26 = vsub.f32 %v5488_v38, %v5489_v39 }
 0xd57   :  { %5644 = vmatpush.msra.mxu3 %v5483_v16 }
 0xd58   :  { %v5491_v30 = vand.u32 4294901760, %v5490_v26 }
 0xd59   :  { %5646 = vmatpush.msra.mxu3 %v5485_v58 }
 0xd5a   :  { %5492 = vmatmul.f32.vlgmr.msra.gmra.mxu2 %v5491_v30  ;;  %5590 = vmatmul.f32.vlgmr.msrb.gmra.mxu3 %v5489_v39 }
 0xd5b   :  { %5609 = vmatpush.msra.mxu2 %v5510_v52 }
 0xd5d   :  { %5613 = vmatpush.msra.mxu2 %v5516_v3 }
 0xd5f   :  { %5617 = vmatpush.msra.mxu2 %v5522_v20 }
 0xd61   :  { %5621 = vmatpush.msra.mxu2 %v5528_v25 }
 0xd62   :  { %5563 = vmatmul.f32.vlgmr.msrb.gmra.mxu2 %v5488_v38  ;;  %5648 = vmatmul.f32.vlgmr.msra.gmra.mxu3 %v5487_v28 }
 0xd6a   :  { %5623 = vmatmul.f32.vlgmr.msra.gmra.mxu2 %v5487_v28 }
 0xdd5   :  { %v5534_v44 = vpop.f32.mrf.mxu3 }
 0xddd   :  { %v5493_v43 = vpop.f32.mrf.mxu2  ;;  %v5591_v19 = vpop.f32.mrf.mxu3 }
 0xdde   :  { %v5494_v2 = vadd.f32 %v5704_v11, %v5493_v43 }
 0xde0   :  { %v5535_v1 = vadd.f32 %v5534_v44, %v5494_v2 }
 0xde5   :  { %v5564_v63 = vpop.f32.mrf.mxu2  ;;  %v5649_v31 = vpop.f32.mrf.mxu3 }
 0xde6   :  { %v5565_v59 = vadd.f32 %v5564_v63, %v5535_v1 }
 0xde8   :  { %v5592_v34 = vadd.f32 %v5591_v19, %v5565_v59 }
 0xded   :  { %v5624_v4 = vpop.f32.mrf.mxu2 }
 0xdee   :  { %v5625_v45 = vadd.f32 %v5624_v4, %v5592_v34 }
 0xdf0   :  { %v5650_v7 = vadd.f32 %v5649_v31, %v5625_v45 }
 0xdf2   :  { %5653 = vst.msk [vmem:[%s7441_s22] sm:$0x3] %vm5652_vm1, %v5650_v7 }
 0xdf3   :  { %5795 = dma.done.wait [#allocation5], 16  }
 0xdf4   :  { %5796 = vsyncadd [#allocation5], 4294967280 }
 0xdf5   :  { %5797 = dma.done.wait [#allocation7], 32  }
 0xdf6   :  { %5798 = vsyncadd [#allocation7], 4294967264 }
 0xdf7   :  { %5688 = vsyncpa [#allocation5], 1 }
 0xdf8   :  { %5689 = vsyncpa [#allocation7], 1 }

</bundles_post_ra>
